<compile_context>
chip_gen: v5e
topology: v5e:2x2
jax: 0.10.0
libtpu: 0.0.40
codegen_flags: <defaults>
</compile_context>

<pallas_src>
import functools
import math

import jax
import jax.numpy as jnp
from jax import lax
from jax.experimental import pallas as pl
from jax.experimental.pallas import tpu as pltpu

BN_EPS = 1e-5
ACT_DTYPE = jnp.bfloat16      # inter-layer activation storage (halves HBM traffic)


def _round_up(x, m):
    return (x + m - 1) // m * m


# ---------------------------------------------------------------------------
# Kernel 1: fused 3x3 stride-1 conv (replication pad) + BatchNorm2d (training
# batch stats, gamma=1/beta=0) + optional residual add + optional ReLU.
#
# The padded input is flattened to (N*Hp*Wp + tail, Cin) in the wrapper.  Output
# row q = n*Hp*Wp + ho*Wp + wo; tap (ki,kj) contributes xflat[q + ki*Wp + kj] @ w[ki,kj],
# so each tap is one contiguous-slab matmul accumulated into an f32 VMEM scratch.
# Rows with ho >= Ho or wo >= Wo are junk: they are excluded from the BN statistics
# via a 0/1 mask and dropped by a reshape+slice in the wrapper (no in-kernel
# compaction loop, no extra VMEM round trip).  Grid axis = Cout tiles (parallel).
# ---------------------------------------------------------------------------
def _conv3x3s1_bn_kernel(x_ref, w_ref, mask_ref, *rest, Wp, rows, count,
                         relu, has_residual):
    if has_residual:
        r_ref, o_ref, acc_ref = rest
    else:
        o_ref, acc_ref = rest

    for t in range(9):                           # static unroll over the 9 taps
        ki, kj = divmod(t, 3)
        a = x_ref[pl.ds(ki * Wp + kj, rows), :]  # shifted slab (bf16), stays in VMEM
        contrib = jnp.dot(a, w_ref[t], preferred_element_type=jnp.float32)
        if t == 0:
            acc_ref[...] = contrib
        else:
            acc_ref[...] += contrib

    m = mask_ref[...]                            # (rows, 1) 0/1 validity mask
    acc = acc_ref[...]
    inv_cnt = 1.0 / count
    mean = jnp.sum(acc * m, axis=0, keepdims=True) * inv_cnt
    cen = acc - mean                             # two-pass variance (no cancellation)
    var = jnp.sum((cen * cen) * m, axis=0, keepdims=True) * inv_cnt
    y = cen * lax.rsqrt(var + BN_EPS)
    if has_residual:
        y = y + r_ref[...].astype(jnp.float32)
    if relu:
        y = jnp.maximum(y, 0.0)
    o_ref[...] = y.astype(o_ref.dtype)


# ---------------------------------------------------------------------------
# Kernel 2: fused GEMM + bias + optional BatchNorm (training batch stats)
# + optional ReLU.  Grid axis = output-column tiles (parallel); bf16 operands,
# f32 accumulation, two-pass variance, rsqrt BN apply.
# Used for: 1x1 convs, stride-2 3x3 convs (tiny im2col), Linear heads, fc_unet.
# ---------------------------------------------------------------------------
def _gemm_bn_kernel(a_ref, b_ref, bias_ref, o_ref, *, use_bn, relu):
    acc = jnp.dot(a_ref[...], b_ref[...], preferred_element_type=jnp.float32)
    acc = acc + bias_ref[...]
    if use_bn:
        inv_cnt = 1.0 / a_ref.shape[0]
        mean = jnp.sum(acc, axis=0, keepdims=True) * inv_cnt
        cen = acc - mean
        var = jnp.sum(cen * cen, axis=0, keepdims=True) * inv_cnt
        acc = cen * lax.rsqrt(var + BN_EPS)
    if relu:
        acc = jnp.maximum(acc, 0.0)
    o_ref[...] = acc.astype(o_ref.dtype)


def gemm_bn(a, b, bias=None, *, use_bn=False, relu=False, out_dtype=ACT_DTYPE):
    """(M,K) @ (K,N) + bias [-> BatchNorm(train)] [-> ReLU], fused, N-tiled."""
    M, K = a.shape
    K2, Nc = b.shape
    assert K == K2
    if bias is None:
        bias = jnp.zeros((Nc,), jnp.float32)
    a = a.astype(ACT_DTYPE)
    b = b.astype(ACT_DTYPE)
    bias2 = bias.astype(jnp.float32).reshape(1, Nc)
    nt = 128 if Nc % 128 == 0 else Nc            # parallel output-column tiles
    return pl.pallas_call(
        functools.partial(_gemm_bn_kernel, use_bn=use_bn, relu=relu),
        out_shape=jax.ShapeDtypeStruct((M, Nc), out_dtype),
        grid_spec=pltpu.PrefetchScalarGridSpec(
            num_scalar_prefetch=0,
            grid=(Nc // nt,),
            in_specs=[pl.BlockSpec((M, K), lambda j: (0, 0)),
                      pl.BlockSpec((K, nt), lambda j: (0, j)),
                      pl.BlockSpec((1, nt), lambda j: (0, j))],
            out_specs=pl.BlockSpec((M, nt), lambda j: (0, j))),
        compiler_params=pltpu.CompilerParams(
            dimension_semantics=("parallel",)),
    )(a, b, bias2)


def conv3x3_bn(x, w, *, stride=1, residual=None, relu=True, out_dtype=ACT_DTYPE):
    """ReplicationPad2d(1) + Conv2d(3x3, bias=False) + BatchNorm2d(train) [+res] [+ReLU]."""
    N, H, W, Cin = x.shape
    Cout = w.shape[0]

    if stride == 1:
        Ho, Wo = H, W
        Wp = _round_up(W + 2, 8)       # sublane-aligned row stride
        Hp = H + 3                     # top 1 / bottom 2 replication pad rows
        R = Hp * Wp
        rows = N * R                   # accumulator rows (junk rows masked)

        xp = jnp.pad(x, ((0, 0), (1, 2), (1, Wp - W - 1), (0, 0)), mode='edge')
        xflat = jnp.pad(xp.astype(ACT_DTYPE).reshape(rows, Cin),
                        ((0, 3 * Wp), (0, 0)))   # tail keeps every tap read in bounds
        wt = jnp.transpose(w, (2, 3, 1, 0)).reshape(9, Cin, Cout).astype(ACT_DTYPE)

        q = jnp.arange(rows, dtype=jnp.int32)
        rem = q % R
        mask = (((rem // Wp) < Ho) & ((rem % Wp) < Wo)).astype(jnp.float32)[:, None]

        ct = 128 if Cout % 128 == 0 else Cout    # parallel Cout tiles (BN is per-channel)

        in_arrays = [xflat, wt, mask]
        in_specs = [pl.BlockSpec((rows + 3 * Wp, Cin), lambda c: (0, 0)),
                    pl.BlockSpec((9, Cin, ct), lambda c: (0, 0, c)),
                    pl.BlockSpec((rows, 1), lambda c: (0, 0))]
        if residual is not None:
            rp = jnp.pad(residual.astype(ACT_DTYPE),
                         ((0, 0), (0, Hp - Ho), (0, Wp - Wo), (0, 0)))
            in_arrays.append(rp.reshape(rows, Cout))
            in_specs.append(pl.BlockSpec((rows, ct), lambda c: (0, c)))

        out = pl.pallas_call(
            functools.partial(_conv3x3s1_bn_kernel, Wp=Wp, rows=rows,
                              count=float(N * Ho * Wo), relu=relu,
                              has_residual=residual is not None),
            out_shape=jax.ShapeDtypeStruct((rows, Cout), out_dtype),
            grid_spec=pltpu.PrefetchScalarGridSpec(
                num_scalar_prefetch=0,
                grid=(Cout // ct,),
                in_specs=in_specs,
                out_specs=pl.BlockSpec((rows, ct), lambda c: (0, c)),
                scratch_shapes=[pltpu.VMEM((rows, ct), jnp.float32)]),
            compiler_params=pltpu.CompilerParams(
                dimension_semantics=("parallel",)),
        )(*in_arrays)
        # drop junk rows/cols: single strided slice handled by XLA
        return out.reshape(N, Hp, Wp, Cout)[:, :Ho, :Wo, :]

    # Stride-2 3x3 convs act on tiny tensors in this net: bf16 im2col + fused GEMM+BN.
    assert residual is None
    xp = jnp.pad(x, ((0, 0), (1, 1), (1, 1), (0, 0)), mode='edge')
    Ho = (H - 1) // stride + 1
    Wo = (W - 1) // stride + 1
    cols = []
    for ki in range(3):
        for kj in range(3):
            cols.append(lax.slice(
                xp, (0, ki, kj, 0),
                (N, ki + stride * (Ho - 1) + 1, kj + stride * (Wo - 1) + 1, Cin),
                (1, stride, stride, 1)))
    patch = jnp.concatenate(cols, axis=-1).reshape(N * Ho * Wo, 9 * Cin)
    wm = jnp.transpose(w, (2, 3, 1, 0)).reshape(9 * Cin, Cout)
    y = gemm_bn(patch, wm, None, use_bn=True, relu=relu, out_dtype=out_dtype)
    return y.reshape(N, Ho, Wo, Cout)


def conv1x1_bn(x, w, *, stride=1, bias=None, use_bn=True, relu=False,
               out_dtype=ACT_DTYPE):
    N, H, W, Cin = x.shape
    Cout = w.shape[0]
    xs = x[:, ::stride, ::stride, :] if stride > 1 else x
    Ho, Wo = xs.shape[1], xs.shape[2]
    y = gemm_bn(xs.reshape(-1, Cin), w.reshape(Cout, Cin).T, bias,
                use_bn=use_bn, relu=relu, out_dtype=out_dtype)
    return y.reshape(N, Ho, Wo, Cout)


# ---------------------------------------------------------------------------
# Kernel 3: VQ head — proj einsum, gumbel-softmax (dim=-1), qy softmax (dim=HW),
# KL term, feat2 einsum, and L2 channel-normalize of feat1/feat2.  One grid step
# per batch element, batch axis "parallel".  bf16 MXU operands, f32 math.
# ---------------------------------------------------------------------------
def _vq_kernel(feat_ref, embd_ref, embdt_ref, gumb_ref,
               f1_ref, f2_ref, diff_ref, *, tau):
    f = feat_ref[0]            # (HW, C) f32
    e = embd_ref[...]          # (C, K) bf16
    et = embdt_ref[...]        # (K, C) bf16
    g = gumb_ref[0]            # (HW, K) f32

    proj = jnp.dot(f.astype(jnp.bfloat16), e,
                   preferred_element_type=jnp.float32)               # (HW, K)

    # gumbel softmax over the code dim (torch dim=-1); per-row scale washes out in
    # the L2 normalize of feat2, so the approx EUP reciprocal is safe here.
    y = (proj + g) * (1.0 / tau)
    y = y - jnp.max(y, axis=-1, keepdims=True)
    p = jnp.exp(y)
    soft = p * pl.reciprocal(jnp.sum(p, axis=-1, keepdims=True), approx=True)

    # qy = softmax over spatial positions (torch dim=1)
    q = proj - jnp.max(proj, axis=0, keepdims=True)
    qe = jnp.exp(q)
    qy = qe / jnp.sum(qe, axis=0, keepdims=True)
    diff_b = jnp.sum(qy * jnp.log(qy * 6.0 + 1e-10), keepdims=True)   # (1,1)
    diff_ref[0] = jnp.broadcast_to(diff_b, (1, 128))

    feat2 = jnp.dot(soft.astype(jnp.bfloat16), et,
                    preferred_element_type=jnp.float32)               # (HW, C)

    # Normalize(power=2) along channels via rsqrt (EUP); tiny eps guards zero rows.
    f1_ref[0] = f * lax.rsqrt(jnp.sum(f * f, axis=-1, keepdims=True) + 1e-24)
    f2_ref[0] = feat2 * lax.rsqrt(jnp.sum(feat2 * feat2, axis=-1, keepdims=True) + 1e-24)


def pallas_vq_head(feat, embd, gumb, tau):
    B, HW, C = feat.shape
    K = embd.shape[1]
    return pl.pallas_call(
        functools.partial(_vq_kernel, tau=tau),
        out_shape=(jax.ShapeDtypeStruct((B, HW, C), jnp.float32),
                   jax.ShapeDtypeStruct((B, HW, C), jnp.float32),
                   jax.ShapeDtypeStruct((B, 1, 128), jnp.float32)),
        grid_spec=pltpu.PrefetchScalarGridSpec(
            num_scalar_prefetch=0,
            grid=(B,),
            in_specs=[pl.BlockSpec((1, HW, C), lambda b: (b, 0, 0)),
                      pl.BlockSpec((C, K), lambda b: (0, 0)),
                      pl.BlockSpec((K, C), lambda b: (0, 0)),
                      pl.BlockSpec((1, HW, K), lambda b: (b, 0, 0))],
            out_specs=[pl.BlockSpec((1, HW, C), lambda b: (b, 0, 0)),
                       pl.BlockSpec((1, HW, C), lambda b: (b, 0, 0)),
                       pl.BlockSpec((1, 1, 128), lambda b: (b, 0, 0))]),
        compiler_params=pltpu.CompilerParams(
            dimension_semantics=("parallel",)),
    )(feat.astype(jnp.float32), embd.astype(jnp.bfloat16),
      embd.T.astype(jnp.bfloat16), gumb.astype(jnp.float32))


# ---------------------------------------------------------------------------
# Cheap JAX glue (tiny tensors): maxpool, nearest upsample, skip concat.
# ---------------------------------------------------------------------------
def maxpool3x3_s2(x):
    # ReplicationPad2d(1) + MaxPool2d(3, stride=2)
    N, H, W, C = x.shape
    xp = jnp.pad(x, ((0, 0), (1, 1), (1, 1), (0, 0)), mode='edge')
    Ho = (H - 1) // 2 + 1
    Wo = (W - 1) // 2 + 1
    vals = []
    for ki in range(3):
        for kj in range(3):
            vals.append(lax.slice(
                xp, (0, ki, kj, 0),
                (N, ki + 2 * (Ho - 1) + 1, kj + 2 * (Wo - 1) + 1, C),
                (1, 2, 2, 1)))
    return jnp.max(jnp.stack(vals, 0), axis=0)


def upsample_nearest2x(x):
    return jnp.repeat(jnp.repeat(x, 2, axis=1), 2, axis=2)


# ---------------------------------------------------------------------------
# Network composition (ResNet / ResUnet2 / E_Fusion), parameters deterministic.
# ---------------------------------------------------------------------------
def basic_block(x, blk, stride):
    if blk['ds'] is not None:
        identity = conv1x1_bn(x, blk['ds'], stride=stride, use_bn=True, relu=False)
    else:
        identity = x
    out = conv3x3_bn(x, blk['conv1'], stride=stride, relu=True)
    # conv2 + bn2 + (+= identity) + relu, all fused
    out = conv3x3_bn(out, blk['conv2'], stride=1, residual=identity, relu=True)
    return out


def encoder_forward(enc, x):
    d1 = conv3x3_bn(x, enc['layer0'], stride=2, relu=True)
    d2 = maxpool3x3_s2(d1)
    h = d2
    for blk in enc['layer1']:
        h = basic_block(h, blk, 1)
    d3 = h
    for i, blk in enumerate(enc['layer2']):
        h = basic_block(h, blk, 2 if i == 0 else 1)
    d4 = h
    for i, blk in enumerate(enc['layer3']):
        h = basic_block(h, blk, 2 if i == 0 else 1)
    d5 = h
    return d1, d2, d3, d4, d5


def decoder_block(x, w):
    y = conv3x3_bn(x, w, stride=1, relu=True)
    return upsample_nearest2x(y)


def resunet_forward(params, x):
    e1, _, e2, e3, e4 = encoder_forward(params['enc'], x)
    center = decoder_block(e4, params['dec']['center'])
    d2 = decoder_block(jnp.concatenate([center, e3], axis=-1), params['dec']['decoder1'])
    d3 = decoder_block(jnp.concatenate([d2, e2], axis=-1), params['dec']['decoder2'])
    d4 = decoder_block(jnp.concatenate([d3, e1], axis=-1), params['dec']['decoder3'])
    return d4, e4


def e_fusion_forward(params, x_nchw, gumbel_key):
    temperature = 0.8
    kld_scale = 0.0005
    x = jnp.transpose(x_nchw, (0, 2, 3, 1)).astype(ACT_DTYPE)   # NCHW -> NHWC, bf16
    d4, e4 = resunet_forward(params, x)
    feat = conv1x1_bn(d4, params['fc_unet']['w'], bias=params['fc_unet']['b'],
                      use_bn=False, relu=False, out_dtype=jnp.float32)
    B, H, W, C = feat.shape

    # fc1..fc6 heads on AdaptiveAvgPool2d((1,1)) of e4, fused into ONE GEMM+BN+ReLU
    # (BatchNorm1d is per-channel, so concatenating the 6 heads along the output
    #  dimension keeps the statistics identical to 6 separate heads).
    ins_pool = jnp.mean(e4.astype(jnp.float32), axis=(1, 2))            # (B, 256)
    w_all = jnp.concatenate([p['w'] for p in params['fc']], axis=1)     # (256, 768)
    b_all = jnp.concatenate([p['b'] for p in params['fc']], axis=0)     # (768,)
    heads = gemm_bn(ins_pool, w_all, b_all, use_bn=True, relu=True,
                    out_dtype=jnp.float32)                              # (B, 768)
    glob = jnp.transpose(heads.reshape(B, 6, 128), (0, 2, 1))           # (B, 128, 6)

    emb_w = jnp.concatenate(params['embed'], axis=0)   # (6, 128)  == divs
    embd = emb_w.T                                     # (128, 6) shared over batch

    # align_loss(embd, glob): squared L2 over channel dim, mean over (B, 6)
    loss_bt = jnp.mean(jnp.sum((embd[None] - glob) ** 2, axis=1))

    # uniform_loss(norm(divs)): log mean exp(-2 * pdist^2)
    divs = emb_w / jnp.sqrt(jnp.sum(emb_w ** 2, axis=1, keepdims=True))
    pd2 = jnp.sum((divs[:, None, :] - divs[None, :, :]) ** 2, axis=-1)
    iu = jnp.triu_indices(6, k=1)
    loss_dv = jnp.log(jnp.mean(jnp.exp(-2.0 * pd2[iu])))

    # VQ head (Pallas): proj, gumbel-softmax, qy, KL term, feat2, L2-normalize
    feat_flat = feat.reshape(B, H * W, C)
    gumb = jax.random.gumbel(gumbel_key, (B, H * W, 6), jnp.float32)
    f1, f2, diff_raw = pallas_vq_head(feat_flat, embd, gumb, tau=temperature)
    diff = kld_scale * jnp.sum(diff_raw[:, 0, 0]) / (B * 6)

    feat1 = jnp.transpose(f1.reshape(B, H, W, C), (0, 3, 1, 2))
    feat2 = jnp.transpose(f2.reshape(B, H, W, C), (0, 3, 1, 2))
    return feat1, feat2, diff + loss_bt + loss_dv


def init_params(key):
    keys = iter(jax.random.split(key, 64))
    nk = lambda: next(keys)

    def conv_init(cout, cin, k):
        std = math.sqrt(2.0 / (k * k * cout))   # ResNet/ResUnet2 init: N(0, sqrt(2/n))
        return jax.random.normal(nk(), (cout, cin, k, k), jnp.float32) * std

    enc = {
        'layer0': conv_init(64, 6, 3),
        'layer1': [{'conv1': conv_init(64, 64, 3), 'conv2': conv_init(64, 64, 3), 'ds': None},
                   {'conv1': conv_init(64, 64, 3), 'conv2': conv_init(64, 64, 3), 'ds': None}],
        'layer2': [{'conv1': conv_init(128, 64, 3), 'conv2': conv_init(128, 128, 3),
                    'ds': conv_init(128, 64, 1)},
                   {'conv1': conv_init(128, 128, 3), 'conv2': conv_init(128, 128, 3), 'ds': None}],
        'layer3': [{'conv1': conv_init(256, 128, 3), 'conv2': conv_init(256, 256, 3),
                    'ds': conv_init(256, 128, 1)},
                   {'conv1': conv_init(256, 256, 3), 'conv2': conv_init(256, 256, 3), 'ds': None}],
    }
    dec = {
        'center': conv_init(256, 256, 3),
        'decoder1': conv_init(128, 384, 3),
        'decoder2': conv_init(192, 192, 3),
        'decoder3': conv_init(128, 256, 3),
    }
    fc_unet = {'w': jax.random.normal(nk(), (128, 128, 1, 1), jnp.float32) * 0.05,
               'b': jnp.zeros((128,), jnp.float32)}
    fcs = [{'w': jax.random.normal(nk(), (256, 128), jnp.float32) * 0.05,   # Linear(256,128)
            'b': jnp.zeros((128,), jnp.float32)} for _ in range(6)]
    embeds = [jax.random.normal(nk(), (1, 128), jnp.float32) for _ in range(6)]  # nn.Embedding(1,128)
    return {'enc': enc, 'dec': dec, 'fc_unet': fc_unet, 'fc': fcs, 'embed': embeds}


if __name__ == "__main__":
    key = jax.random.PRNGKey(0)
    kp, kx, kg = jax.random.split(key, 3)
    params = init_params(kp)

    B, Cin, S = 2, 6, 32          # E_Fusion(in_channel=6); S divisible by 16
    x = jax.random.normal(kx, (B, Cin, S, S), jnp.float32)

    fwd = jax.jit(e_fusion_forward)
    feat1, feat2, loss = fwd(params, x, kg)
    jax.block_until_ready((feat1, feat2, loss))

    assert feat1.shape == (B, 128, S, S) and feat2.shape == (B, 128, S, S)
    assert loss.shape == ()
    assert bool(jnp.isfinite(loss))
    print("KERNEL_OK")
</pallas_src>

<mosaic_0001>
module attributes {stable_mosaic.version = 11 : i64} {
  func.func @_gemm_bn_kernel(%arg0: i32, %arg1: memref<512x54xbf16, #tpu.memory_space<vmem>>, %arg2: memref<54x64xbf16, #tpu.memory_space<vmem>>, %arg3: memref<1x64xf32, #tpu.memory_space<vmem>>, %arg4: memref<512x64xbf16, #tpu.memory_space<vmem>>) attributes {dimension_semantics = [#tpu.dimension_semantics<parallel>], iteration_bounds = array<i64: 1>, scalar_prefetch = 0 : i64, scratch_operands = 0 : i64, tpu.core_type = #tpu.core_type<tc>, window_params = [{pipeline_mode = #tpu.pipeline_mode<synchronous>, transform_indices = @transform_0, window_bounds = array<i64: 512, 54>}, {transform_indices = @transform_1, window_bounds = array<i64: 54, 64>}, {transform_indices = @transform_2, window_bounds = array<i64: 1, 64>}, {transform_indices = @transform_3, window_bounds = array<i64: 512, 64>}]} {
    %c0 = arith.constant 0 : index
    %c0_0 = arith.constant 0 : index
    %0 = vector.load %arg1[%c0, %c0_0] : memref<512x54xbf16, #tpu.memory_space<vmem>>, vector<512x54xbf16>
    %c0_1 = arith.constant 0 : index
    %c0_2 = arith.constant 0 : index
    %1 = vector.load %arg2[%c0_1, %c0_2] : memref<54x64xbf16, #tpu.memory_space<vmem>>, vector<54x64xbf16>
    %cst = arith.constant dense<0.000000e+00> : vector<512x64xf32>
    %2 = tpu.matmul %0, %1, %cst {dimension_numbers = #tpu.dot_dimension_numbers<[1], [0], [0], [1], [0, 0, 1, 1], [], []>} : vector<512x54xbf16>, vector<54x64xbf16>, vector<512x64xf32> -> vector<512x64xf32>
    %c0_3 = arith.constant 0 : index
    %c0_4 = arith.constant 0 : index
    %3 = vector.load %arg3[%c0_3, %c0_4] : memref<1x64xf32, #tpu.memory_space<vmem>>, vector<1x64xf32>
    %4 = vector.broadcast %3 : vector<1x64xf32> to vector<512x64xf32>
    %5 = arith.addf %2, %4 : vector<512x64xf32>
    %cst_5 = arith.constant dense<0.000000e+00> : vector<64xf32>
    %6 = vector.multi_reduction <add>, %5, %cst_5 [0] : vector<512x64xf32> to vector<64xf32>
    %7 = vector.shape_cast %6 : vector<64xf32> to vector<1x64xf32>
    %cst_6 = arith.constant 0.001953125 : f32
    %8 = vector.broadcast %cst_6 : f32 to vector<1x64xf32>
    %9 = arith.mulf %7, %8 : vector<1x64xf32>
    %10 = vector.broadcast %9 : vector<1x64xf32> to vector<512x64xf32>
    %11 = arith.subf %5, %10 : vector<512x64xf32>
    %12 = arith.mulf %11, %11 : vector<512x64xf32>
    %cst_7 = arith.constant dense<0.000000e+00> : vector<64xf32>
    %13 = vector.multi_reduction <add>, %12, %cst_7 [0] : vector<512x64xf32> to vector<64xf32>
    %14 = vector.shape_cast %13 : vector<64xf32> to vector<1x64xf32>
    %cst_8 = arith.constant 0.001953125 : f32
    %15 = vector.broadcast %cst_8 : f32 to vector<1x64xf32>
    %16 = arith.mulf %14, %15 : vector<1x64xf32>
    %cst_9 = arith.constant 9.99999974E-6 : f32
    %17 = vector.broadcast %cst_9 : f32 to vector<1x64xf32>
    %18 = arith.addf %16, %17 : vector<1x64xf32>
    %19 = math.rsqrt %18 : vector<1x64xf32>
    %20 = vector.broadcast %19 : vector<1x64xf32> to vector<512x64xf32>
    %21 = arith.mulf %11, %20 : vector<512x64xf32>
    %cst_10 = arith.constant 0.000000e+00 : f32
    %22 = vector.broadcast %cst_10 : f32 to vector<512x64xf32>
    %23 = arith.maximumf %21, %22 : vector<512x64xf32>
    %24 = arith.truncf %23 : vector<512x64xf32> to vector<512x64xbf16>
    %c0_11 = arith.constant 0 : index
    %c0_12 = arith.constant 0 : index
    %25 = vector.load %arg4[%c0_11, %c0_12] : memref<512x64xbf16, #tpu.memory_space<vmem>>, vector<512x64xbf16>
    tpu.vector_store %arg4[%c0_11, %c0_12], %24 {strides = array<i32>} : memref<512x64xbf16, #tpu.memory_space<vmem>>, vector<512x64xbf16>,
    return
  }
  func.func @transform_0(%arg0: i32) -> (i32, i32) {
    %c0_i32 = arith.constant 0 : i32
    %c0_i32_0 = arith.constant 0 : i32
    %c0_i32_1 = arith.constant 0 : i32
    return %c0_i32, %c0_i32_0 : i32, i32
  }
  func.func @transform_1(%arg0: i32) -> (i32, i32) {
    %c0_i32 = arith.constant 0 : i32
    %c0_i32_0 = arith.constant 0 : i32
    return %c0_i32, %arg0 : i32, i32
  }
  func.func @transform_2(%arg0: i32) -> (i32, i32) {
    %c0_i32 = arith.constant 0 : i32
    %c0_i32_0 = arith.constant 0 : i32
    return %c0_i32, %arg0 : i32, i32
  }
  func.func @transform_3(%arg0: i32) -> (i32, i32) {
    %c0_i32 = arith.constant 0 : i32
    %c0_i32_0 = arith.constant 0 : i32
    return %c0_i32, %arg0 : i32, i32
  }
}

module attributes {stable_mosaic.version = 11 : i64} {
  func.func @_conv3x3s1_bn_kernel(%arg0: i32, %arg1: memref<400x64xbf16, #tpu.memory_space<vmem>>, %arg2: memref<9x64x64xbf16, #tpu.memory_space<vmem>>, %arg3: memref<352x1xf32, #tpu.memory_space<vmem>>, %arg4: memref<352x64xbf16, #tpu.memory_space<vmem>>, %arg5: memref<352x64xf32, #tpu.memory_space<vmem>>) attributes {dimension_semantics = [#tpu.dimension_semantics<parallel>], iteration_bounds = array<i64: 1>, scalar_prefetch = 0 : i64, scratch_operands = 1 : i64, tpu.core_type = #tpu.core_type<tc>, window_params = [{pipeline_mode = #tpu.pipeline_mode<synchronous>, transform_indices = @transform_0, window_bounds = array<i64: 400, 64>}, {transform_indices = @transform_1, window_bounds = array<i64: 9, 64, 64>}, {pipeline_mode = #tpu.pipeline_mode<synchronous>, transform_indices = @transform_2, window_bounds = array<i64: 352, 1>}, {transform_indices = @transform_3, window_bounds = array<i64: 352, 64>}]} {
    %c0 = arith.constant 0 : index
    %c0_0 = arith.constant 0 : index
    %0 = vector.load %arg1[%c0, %c0_0] : memref<400x64xbf16, #tpu.memory_space<vmem>>, vector<352x64xbf16>
    %c0_1 = arith.constant 0 : index
    %c0_2 = arith.constant 0 : index
    %c0_3 = arith.constant 0 : index
    %1 = vector.load %arg2[%c0_1, %c0_2, %c0_3] : memref<9x64x64xbf16, #tpu.memory_space<vmem>>, vector<1x64x64xbf16>
    %2 = vector.shape_cast %1 : vector<1x64x64xbf16> to vector<64x64xbf16>
    %cst = arith.constant dense<0.000000e+00> : vector<352x64xf32>
    %3 = tpu.matmul %0, %2, %cst {dimension_numbers = #tpu.dot_dimension_numbers<[1], [0], [0], [1], [0, 0, 1, 1], [], []>} : vector<352x64xbf16>, vector<64x64xbf16>, vector<352x64xf32> -> vector<352x64xf32>
    %c0_4 = arith.constant 0 : index
    %c0_5 = arith.constant 0 : index
    %4 = vector.load %arg5[%c0_4, %c0_5] : memref<352x64xf32, #tpu.memory_space<vmem>>, vector<352x64xf32>
    tpu.vector_store %arg5[%c0_4, %c0_5], %3 {strides = array<i32>} : memref<352x64xf32, #tpu.memory_space<vmem>>, vector<352x64xf32>,
    %c1 = arith.constant 1 : index
    %c0_6 = arith.constant 0 : index
    %5 = vector.load %arg1[%c1, %c0_6] : memref<400x64xbf16, #tpu.memory_space<vmem>>, vector<352x64xbf16>
    %c1_7 = arith.constant 1 : index
    %c0_8 = arith.constant 0 : index
    %c0_9 = arith.constant 0 : index
    %6 = vector.load %arg2[%c1_7, %c0_8, %c0_9] : memref<9x64x64xbf16, #tpu.memory_space<vmem>>, vector<1x64x64xbf16>
    %7 = vector.shape_cast %6 : vector<1x64x64xbf16> to vector<64x64xbf16>
    %cst_10 = arith.constant dense<0.000000e+00> : vector<352x64xf32>
    %8 = tpu.matmul %5, %7, %cst_10 {dimension_numbers = #tpu.dot_dimension_numbers<[1], [0], [0], [1], [0, 0, 1, 1], [], []>} : vector<352x64xbf16>, vector<64x64xbf16>, vector<352x64xf32> -> vector<352x64xf32>
    %c0_11 = arith.constant 0 : index
    %c0_12 = arith.constant 0 : index
    %9 = vector.load %arg5[%c0_11, %c0_12] : memref<352x64xf32, #tpu.memory_space<vmem>>, vector<352x64xf32>
    %10 = arith.addf %9, %8 : vector<352x64xf32>
    %c0_13 = arith.constant 0 : index
    %c0_14 = arith.constant 0 : index
    %11 = vector.load %arg5[%c0_13, %c0_14] : memref<352x64xf32, #tpu.memory_space<vmem>>, vector<352x64xf32>
    tpu.vector_store %arg5[%c0_13, %c0_14], %10 {strides = array<i32>} : memref<352x64xf32, #tpu.memory_space<vmem>>, vector<352x64xf32>,
    %c2 = arith.constant 2 : index
    %c0_15 = arith.constant 0 : index
    %12 = vector.load %arg1[%c2, %c0_15] : memref<400x64xbf16, #tpu.memory_space<vmem>>, vector<352x64xbf16>
    %c2_16 = arith.constant 2 : index
    %c0_17 = arith.constant 0 : index
    %c0_18 = arith.constant 0 : index
    %13 = vector.load %arg2[%c2_16, %c0_17, %c0_18] : memref<9x64x64xbf16, #tpu.memory_space<vmem>>, vector<1x64x64xbf16>
    %14 = vector.shape_cast %13 : vector<1x64x64xbf16> to vector<64x64xbf16>
    %cst_19 = arith.constant dense<0.000000e+00> : vector<352x64xf32>
    %15 = tpu.matmul %12, %14, %cst_19 {dimension_numbers = #tpu.dot_dimension_numbers<[1], [0], [0], [1], [0, 0, 1, 1], [], []>} : vector<352x64xbf16>, vector<64x64xbf16>, vector<352x64xf32> -> vector<352x64xf32>
    %c0_20 = arith.constant 0 : index
    %c0_21 = arith.constant 0 : index
    %16 = vector.load %arg5[%c0_20, %c0_21] : memref<352x64xf32, #tpu.memory_space<vmem>>, vector<352x64xf32>
    %17 = arith.addf %16, %15 : vector<352x64xf32>
    %c0_22 = arith.constant 0 : index
    %c0_23 = arith.constant 0 : index
    %18 = vector.load %arg5[%c0_22, %c0_23] : memref<352x64xf32, #tpu.memory_space<vmem>>, vector<352x64xf32>
    tpu.vector_store %arg5[%c0_22, %c0_23], %17 {strides = array<i32>} : memref<352x64xf32, #tpu.memory_space<vmem>>, vector<352x64xf32>,
    %c16 = arith.constant 16 : index
    %c0_24 = arith.constant 0 : index
    %19 = vector.load %arg1[%c16, %c0_24] : memref<400x64xbf16, #tpu.memory_space<vmem>>, vector<352x64xbf16>
    %c3 = arith.constant 3 : index
    %c0_25 = arith.constant 0 : index
    %c0_26 = arith.constant 0 : index
    %20 = vector.load %arg2[%c3, %c0_25, %c0_26] : memref<9x64x64xbf16, #tpu.memory_space<vmem>>, vector<1x64x64xbf16>
    %21 = vector.shape_cast %20 : vector<1x64x64xbf16> to vector<64x64xbf16>
    %cst_27 = arith.constant dense<0.000000e+00> : vector<352x64xf32>
    %22 = tpu.matmul %19, %21, %cst_27 {dimension_numbers = #tpu.dot_dimension_numbers<[1], [0], [0], [1], [0, 0, 1, 1], [], []>} : vector<352x64xbf16>, vector<64x64xbf16>, vector<352x64xf32> -> vector<352x64xf32>
    %c0_28 = arith.constant 0 : index
    %c0_29 = arith.constant 0 : index
    %23 = vector.load %arg5[%c0_28, %c0_29] : memref<352x64xf32, #tpu.memory_space<vmem>>, vector<352x64xf32>
    %24 = arith.addf %23, %22 : vector<352x64xf32>
    %c0_30 = arith.constant 0 : index
    %c0_31 = arith.constant 0 : index
    %25 = vector.load %arg5[%c0_30, %c0_31] : memref<352x64xf32, #tpu.memory_space<vmem>>, vector<352x64xf32>
    tpu.vector_store %arg5[%c0_30, %c0_31], %24 {strides = array<i32>} : memref<352x64xf32, #tpu.memory_space<vmem>>, vector<352x64xf32>,
    %c17 = arith.constant 17 : index
    %c0_32 = arith.constant 0 : index
    %26 = vector.load %arg1[%c17, %c0_32] : memref<400x64xbf16, #tpu.memory_space<vmem>>, vector<352x64xbf16>
    %c4 = arith.constant 4 : index
    %c0_33 = arith.constant 0 : index
    %c0_34 = arith.constant 0 : index
    %27 = vector.load %arg2[%c4, %c0_33, %c0_34] : memref<9x64x64xbf16, #tpu.memory_space<vmem>>, vector<1x64x64xbf16>
    %28 = vector.shape_cast %27 : vector<1x64x64xbf16> to vector<64x64xbf16>
    %cst_35 = arith.constant dense<0.000000e+00> : vector<352x64xf32>
    %29 = tpu.matmul %26, %28, %cst_35 {dimension_numbers = #tpu.dot_dimension_numbers<[1], [0], [0], [1], [0, 0, 1, 1], [], []>} : vector<352x64xbf16>, vector<64x64xbf16>, vector<352x64xf32> -> vector<352x64xf32>
    %c0_36 = arith.constant 0 : index
    %c0_37 = arith.constant 0 : index
    %30 = vector.load %arg5[%c0_36, %c0_37] : memref<352x64xf32, #tpu.memory_space<vmem>>, vector<352x64xf32>
    %31 = arith.addf %30, %29 : vector<352x64xf32>
    %c0_38 = arith.constant 0 : index
    %c0_39 = arith.constant 0 : index
    %32 = vector.load %arg5[%c0_38, %c0_39] : memref<352x64xf32, #tpu.memory_space<vmem>>, vector<352x64xf32>
    tpu.vector_store %arg5[%c0_38, %c0_39], %31 {strides = array<i32>} : memref<352x64xf32, #tpu.memory_space<vmem>>, vector<352x64xf32>,
    %c18 = arith.constant 18 : index
    %c0_40 = arith.constant 0 : index
    %33 = vector.load %arg1[%c18, %c0_40] : memref<400x64xbf16, #tpu.memory_space<vmem>>, vector<352x64xbf16>
    %c5 = arith.constant 5 : index
    %c0_41 = arith.constant 0 : index
    %c0_42 = arith.constant 0 : index
    %34 = vector.load %arg2[%c5, %c0_41, %c0_42] : memref<9x64x64xbf16, #tpu.memory_space<vmem>>, vector<1x64x64xbf16>
    %35 = vector.shape_cast %34 : vector<1x64x64xbf16> to vector<64x64xbf16>
    %cst_43 = arith.constant dense<0.000000e+00> : vector<352x64xf32>
    %36 = tpu.matmul %33, %35, %cst_43 {dimension_numbers = #tpu.dot_dimension_numbers<[1], [0], [0], [1], [0, 0, 1, 1], [], []>} : vector<352x64xbf16>, vector<64x64xbf16>, vector<352x64xf32> -> vector<352x64xf32>
    %c0_44 = arith.constant 0 : index
    %c0_45 = arith.constant 0 : index
    %37 = vector.load %arg5[%c0_44, %c0_45] : memref<352x64xf32, #tpu.memory_space<vmem>>, vector<352x64xf32>
    %38 = arith.addf %37, %36 : vector<352x64xf32>
    %c0_46 = arith.constant 0 : index
    %c0_47 = arith.constant 0 : index
    %39 = vector.load %arg5[%c0_46, %c0_47] : memref<352x64xf32, #tpu.memory_space<vmem>>, vector<352x64xf32>
    tpu.vector_store %arg5[%c0_46, %c0_47], %38 {strides = array<i32>} : memref<352x64xf32, #tpu.memory_space<vmem>>, vector<352x64xf32>,
    %c32 = arith.constant 32 : index
    %c0_48 = arith.constant 0 : index
    %40 = vector.load %arg1[%c32, %c0_48] : memref<400x64xbf16, #tpu.memory_space<vmem>>, vector<352x64xbf16>
    %c6 = arith.constant 6 : index
    %c0_49 = arith.constant 0 : index
    %c0_50 = arith.constant 0 : index
    %41 = vector.load %arg2[%c6, %c0_49, %c0_50] : memref<9x64x64xbf16, #tpu.memory_space<vmem>>, vector<1x64x64xbf16>
    %42 = vector.shape_cast %41 : vector<1x64x64xbf16> to vector<64x64xbf16>
    %cst_51 = arith.constant dense<0.000000e+00> : vector<352x64xf32>
    %43 = tpu.matmul %40, %42, %cst_51 {dimension_numbers = #tpu.dot_dimension_numbers<[1], [0], [0], [1], [0, 0, 1, 1], [], []>} : vector<352x64xbf16>, vector<64x64xbf16>, vector<352x64xf32> -> vector<352x64xf32>
    %c0_52 = arith.constant 0 : index
    %c0_53 = arith.constant 0 : index
    %44 = vector.load %arg5[%c0_52, %c0_53] : memref<352x64xf32, #tpu.memory_space<vmem>>, vector<352x64xf32>
    %45 = arith.addf %44, %43 : vector<352x64xf32>
    %c0_54 = arith.constant 0 : index
    %c0_55 = arith.constant 0 : index
    %46 = vector.load %arg5[%c0_54, %c0_55] : memref<352x64xf32, #tpu.memory_space<vmem>>, vector<352x64xf32>
    tpu.vector_store %arg5[%c0_54, %c0_55], %45 {strides = array<i32>} : memref<352x64xf32, #tpu.memory_space<vmem>>, vector<352x64xf32>,
    %c33 = arith.constant 33 : index
    %c0_56 = arith.constant 0 : index
    %47 = vector.load %arg1[%c33, %c0_56] : memref<400x64xbf16, #tpu.memory_space<vmem>>, vector<352x64xbf16>
    %c7 = arith.constant 7 : index
    %c0_57 = arith.constant 0 : index
    %c0_58 = arith.constant 0 : index
    %48 = vector.load %arg2[%c7, %c0_57, %c0_58] : memref<9x64x64xbf16, #tpu.memory_space<vmem>>, vector<1x64x64xbf16>
    %49 = vector.shape_cast %48 : vector<1x64x64xbf16> to vector<64x64xbf16>
    %cst_59 = arith.constant dense<0.000000e+00> : vector<352x64xf32>
    %50 = tpu.matmul %47, %49, %cst_59 {dimension_numbers = #tpu.dot_dimension_numbers<[1], [0], [0], [1], [0, 0, 1, 1], [], []>} : vector<352x64xbf16>, vector<64x64xbf16>, vector<352x64xf32> -> vector<352x64xf32>
    %c0_60 = arith.constant 0 : index
    %c0_61 = arith.constant 0 : index
    %51 = vector.load %arg5[%c0_60, %c0_61] : memref<352x64xf32, #tpu.memory_space<vmem>>, vector<352x64xf32>
    %52 = arith.addf %51, %50 : vector<352x64xf32>
    %c0_62 = arith.constant 0 : index
    %c0_63 = arith.constant 0 : index
    %53 = vector.load %arg5[%c0_62, %c0_63] : memref<352x64xf32, #tpu.memory_space<vmem>>, vector<352x64xf32>
    tpu.vector_store %arg5[%c0_62, %c0_63], %52 {strides = array<i32>} : memref<352x64xf32, #tpu.memory_space<vmem>>, vector<352x64xf32>,
    %c34 = arith.constant 34 : index
    %c0_64 = arith.constant 0 : index
    %54 = vector.load %arg1[%c34, %c0_64] : memref<400x64xbf16, #tpu.memory_space<vmem>>, vector<352x64xbf16>
    %c8 = arith.constant 8 : index
    %c0_65 = arith.constant 0 : index
    %c0_66 = arith.constant 0 : index
    %55 = vector.load %arg2[%c8, %c0_65, %c0_66] : memref<9x64x64xbf16, #tpu.memory_space<vmem>>, vector<1x64x64xbf16>
    %56 = vector.shape_cast %55 : vector<1x64x64xbf16> to vector<64x64xbf16>
    %cst_67 = arith.constant dense<0.000000e+00> : vector<352x64xf32>
    %57 = tpu.matmul %54, %56, %cst_67 {dimension_numbers = #tpu.dot_dimension_numbers<[1], [0], [0], [1], [0, 0, 1, 1], [], []>} : vector<352x64xbf16>, vector<64x64xbf16>, vector<352x64xf32> -> vector<352x64xf32>
    %c0_68 = arith.constant 0 : index
    %c0_69 = arith.constant 0 : index
    %58 = vector.load %arg5[%c0_68, %c0_69] : memref<352x64xf32, #tpu.memory_space<vmem>>, vector<352x64xf32>
    %59 = arith.addf %58, %57 : vector<352x64xf32>
    %c0_70 = arith.constant 0 : index
    %c0_71 = arith.constant 0 : index
    %60 = vector.load %arg5[%c0_70, %c0_71] : memref<352x64xf32, #tpu.memory_space<vmem>>, vector<352x64xf32>
    tpu.vector_store %arg5[%c0_70, %c0_71], %59 {strides = array<i32>} : memref<352x64xf32, #tpu.memory_space<vmem>>, vector<352x64xf32>,
    %c0_72 = arith.constant 0 : index
    %c0_73 = arith.constant 0 : index
    %61 = vector.load %arg3[%c0_72, %c0_73] : memref<352x1xf32, #tpu.memory_space<vmem>>, vector<352x1xf32>
    %c0_74 = arith.constant 0 : index
    %c0_75 = arith.constant 0 : index
    %62 = vector.load %arg5[%c0_74, %c0_75] : memref<352x64xf32, #tpu.memory_space<vmem>>, vector<352x64xf32>
    %63 = vector.broadcast %61 : vector<352x1xf32> to vector<352x64xf32>
    %64 = arith.mulf %62, %63 : vector<352x64xf32>
    %cst_76 = arith.constant dense<0.000000e+00> : vector<64xf32>
    %65 = vector.multi_reduction <add>, %64, %cst_76 [0] : vector<352x64xf32> to vector<64xf32>
    %66 = vector.shape_cast %65 : vector<64xf32> to vector<1x64xf32>
    %cst_77 = arith.constant 7.812500e-03 : f32
    %67 = vector.broadcast %cst_77 : f32 to vector<1x64xf32>
    %68 = arith.mulf %66, %67 : vector<1x64xf32>
    %69 = vector.broadcast %68 : vector<1x64xf32> to vector<352x64xf32>
    %70 = arith.subf %62, %69 : vector<352x64xf32>
    %71 = arith.mulf %70, %70 : vector<352x64xf32>
    %72 = vector.broadcast %61 : vector<352x1xf32> to vector<352x64xf32>
    %73 = arith.mulf %71, %72 : vector<352x64xf32>
    %cst_78 = arith.constant dense<0.000000e+00> : vector<64xf32>
    %74 = vector.multi_reduction <add>, %73, %cst_78 [0] : vector<352x64xf32> to vector<64xf32>
    %75 = vector.shape_cast %74 : vector<64xf32> to vector<1x64xf32>
    %cst_79 = arith.constant 7.812500e-03 : f32
    %76 = vector.broadcast %cst_79 : f32 to vector<1x64xf32>
    %77 = arith.mulf %75, %76 : vector<1x64xf32>
    %cst_80 = arith.constant 9.99999974E-6 : f32
    %78 = vector.broadcast %cst_80 : f32 to vector<1x64xf32>
    %79 = arith.addf %77, %78 : vector<1x64xf32>
    %80 = math.rsqrt %79 : vector<1x64xf32>
    %81 = vector.broadcast %80 : vector<1x64xf32> to vector<352x64xf32>
    %82 = arith.mulf %70, %81 : vector<352x64xf32>
    %cst_81 = arith.constant 0.000000e+00 : f32
    %83 = vector.broadcast %cst_81 : f32 to vector<352x64xf32>
    %84 = arith.maximumf %82, %83 : vector<352x64xf32>
    %85 = arith.truncf %84 : vector<352x64xf32> to vector<352x64xbf16>
    %c0_82 = arith.constant 0 : index
    %c0_83 = arith.constant 0 : index
    %86 = vector.load %arg4[%c0_82, %c0_83] : memref<352x64xbf16, #tpu.memory_space<vmem>>, vector<352x64xbf16>
    tpu.vector_store %arg4[%c0_82, %c0_83], %85 {strides = array<i32>} : memref<352x64xbf16, #tpu.memory_space<vmem>>, vector<352x64xbf16>,
    return
  }
  func.func @transform_0(%arg0: i32) -> (i32, i32) {
    %c0_i32 = arith.constant 0 : i32
    %c0_i32_0 = arith.constant 0 : i32
    %c0_i32_1 = arith.constant 0 : i32
    return %c0_i32, %c0_i32_0 : i32, i32
  }
  func.func @transform_1(%arg0: i32) -> (i32, i32, i32) {
    %c0_i32 = arith.constant 0 : i32
    %c0_i32_0 = arith.constant 0 : i32
    %c0_i32_1 = arith.constant 0 : i32
    return %c0_i32, %c0_i32_0, %arg0 : i32, i32, i32
  }
  func.func @transform_2(%arg0: i32) -> (i32, i32) {
    %c0_i32 = arith.constant 0 : i32
    %c0_i32_0 = arith.constant 0 : i32
    %c0_i32_1 = arith.constant 0 : i32
    return %c0_i32, %c0_i32_0 : i32, i32
  }
  func.func @transform_3(%arg0: i32) -> (i32, i32) {
    %c0_i32 = arith.constant 0 : i32
    %c0_i32_0 = arith.constant 0 : i32
    return %c0_i32, %arg0 : i32, i32
  }
}

module attributes {stable_mosaic.version = 11 : i64} {
  func.func @_conv3x3s1_bn_kernel(%arg0: i32, %arg1: memref<400x64xbf16, #tpu.memory_space<vmem>>, %arg2: memref<9x64x64xbf16, #tpu.memory_space<vmem>>, %arg3: memref<352x1xf32, #tpu.memory_space<vmem>>, %arg4: memref<352x64xbf16, #tpu.memory_space<vmem>>, %arg5: memref<352x64xbf16, #tpu.memory_space<vmem>>, %arg6: memref<352x64xf32, #tpu.memory_space<vmem>>) attributes {dimension_semantics = [#tpu.dimension_semantics<parallel>], iteration_bounds = array<i64: 1>, scalar_prefetch = 0 : i64, scratch_operands = 1 : i64, tpu.core_type = #tpu.core_type<tc>, window_params = [{pipeline_mode = #tpu.pipeline_mode<synchronous>, transform_indices = @transform_0, window_bounds = array<i64: 400, 64>}, {transform_indices = @transform_1, window_bounds = array<i64: 9, 64, 64>}, {pipeline_mode = #tpu.pipeline_mode<synchronous>, transform_indices = @transform_2, window_bounds = array<i64: 352, 1>}, {transform_indices = @transform_3, window_bounds = array<i64: 352, 64>}, {transform_indices = @transform_4, window_bounds = array<i64: 352, 64>}]} {
    %c0 = arith.constant 0 : index
    %c0_0 = arith.constant 0 : index
    %0 = vector.load %arg1[%c0, %c0_0] : memref<400x64xbf16, #tpu.memory_space<vmem>>, vector<352x64xbf16>
    %c0_1 = arith.constant 0 : index
    %c0_2 = arith.constant 0 : index
    %c0_3 = arith.constant 0 : index
    %1 = vector.load %arg2[%c0_1, %c0_2, %c0_3] : memref<9x64x64xbf16, #tpu.memory_space<vmem>>, vector<1x64x64xbf16>
    %2 = vector.shape_cast %1 : vector<1x64x64xbf16> to vector<64x64xbf16>
    %cst = arith.constant dense<0.000000e+00> : vector<352x64xf32>
    %3 = tpu.matmul %0, %2, %cst {dimension_numbers = #tpu.dot_dimension_numbers<[1], [0], [0], [1], [0, 0, 1, 1], [], []>} : vector<352x64xbf16>, vector<64x64xbf16>, vector<352x64xf32> -> vector<352x64xf32>
    %c0_4 = arith.constant 0 : index
    %c0_5 = arith.constant 0 : index
    %4 = vector.load %arg6[%c0_4, %c0_5] : memref<352x64xf32, #tpu.memory_space<vmem>>, vector<352x64xf32>
    tpu.vector_store %arg6[%c0_4, %c0_5], %3 {strides = array<i32>} : memref<352x64xf32, #tpu.memory_space<vmem>>, vector<352x64xf32>,
    %c1 = arith.constant 1 : index
    %c0_6 = arith.constant 0 : index
    %5 = vector.load %arg1[%c1, %c0_6] : memref<400x64xbf16, #tpu.memory_space<vmem>>, vector<352x64xbf16>
    %c1_7 = arith.constant 1 : index
    %c0_8 = arith.constant 0 : index
    %c0_9 = arith.constant 0 : index
    %6 = vector.load %arg2[%c1_7, %c0_8, %c0_9] : memref<9x64x64xbf16, #tpu.memory_space<vmem>>, vector<1x64x64xbf16>
    %7 = vector.shape_cast %6 : vector<1x64x64xbf16> to vector<64x64xbf16>
    %cst_10 = arith.constant dense<0.000000e+00> : vector<352x64xf32>
    %8 = tpu.matmul %5, %7, %cst_10 {dimension_numbers = #tpu.dot_dimension_numbers<[1], [0], [0], [1], [0, 0, 1, 1], [], []>} : vector<352x64xbf16>, vector<64x64xbf16>, vector<352x64xf32> -> vector<352x64xf32>
    %c0_11 = arith.constant 0 : index
    %c0_12 = arith.constant 0 : index
    %9 = vector.load %arg6[%c0_11, %c0_12] : memref<352x64xf32, #tpu.memory_space<vmem>>, vector<352x64xf32>
    %10 = arith.addf %9, %8 : vector<352x64xf32>
    %c0_13 = arith.constant 0 : index
    %c0_14 = arith.constant 0 : index
    %11 = vector.load %arg6[%c0_13, %c0_14] : memref<352x64xf32, #tpu.memory_space<vmem>>, vector<352x64xf32>
    tpu.vector_store %arg6[%c0_13, %c0_14], %10 {strides = array<i32>} : memref<352x64xf32, #tpu.memory_space<vmem>>, vector<352x64xf32>,
    %c2 = arith.constant 2 : index
    %c0_15 = arith.constant 0 : index
    %12 = vector.load %arg1[%c2, %c0_15] : memref<400x64xbf16, #tpu.memory_space<vmem>>, vector<352x64xbf16>
    %c2_16 = arith.constant 2 : index
    %c0_17 = arith.constant 0 : index
    %c0_18 = arith.constant 0 : index
    %13 = vector.load %arg2[%c2_16, %c0_17, %c0_18] : memref<9x64x64xbf16, #tpu.memory_space<vmem>>, vector<1x64x64xbf16>
    %14 = vector.shape_cast %13 : vector<1x64x64xbf16> to vector<64x64xbf16>
    %cst_19 = arith.constant dense<0.000000e+00> : vector<352x64xf32>
    %15 = tpu.matmul %12, %14, %cst_19 {dimension_numbers = #tpu.dot_dimension_numbers<[1], [0], [0], [1], [0, 0, 1, 1], [], []>} : vector<352x64xbf16>, vector<64x64xbf16>, vector<352x64xf32> -> vector<352x64xf32>
    %c0_20 = arith.constant 0 : index
    %c0_21 = arith.constant 0 : index
    %16 = vector.load %arg6[%c0_20, %c0_21] : memref<352x64xf32, #tpu.memory_space<vmem>>, vector<352x64xf32>
    %17 = arith.addf %16, %15 : vector<352x64xf32>
    %c0_22 = arith.constant 0 : index
    %c0_23 = arith.constant 0 : index
    %18 = vector.load %arg6[%c0_22, %c0_23] : memref<352x64xf32, #tpu.memory_space<vmem>>, vector<352x64xf32>
    tpu.vector_store %arg6[%c0_22, %c0_23], %17 {strides = array<i32>} : memref<352x64xf32, #tpu.memory_space<vmem>>, vector<352x64xf32>,
    %c16 = arith.constant 16 : index
    %c0_24 = arith.constant 0 : index
    %19 = vector.load %arg1[%c16, %c0_24] : memref<400x64xbf16, #tpu.memory_space<vmem>>, vector<352x64xbf16>
    %c3 = arith.constant 3 : index
    %c0_25 = arith.constant 0 : index
    %c0_26 = arith.constant 0 : index
    %20 = vector.load %arg2[%c3, %c0_25, %c0_26] : memref<9x64x64xbf16, #tpu.memory_space<vmem>>, vector<1x64x64xbf16>
    %21 = vector.shape_cast %20 : vector<1x64x64xbf16> to vector<64x64xbf16>
    %cst_27 = arith.constant dense<0.000000e+00> : vector<352x64xf32>
    %22 = tpu.matmul %19, %21, %cst_27 {dimension_numbers = #tpu.dot_dimension_numbers<[1], [0], [0], [1], [0, 0, 1, 1], [], []>} : vector<352x64xbf16>, vector<64x64xbf16>, vector<352x64xf32> -> vector<352x64xf32>
    %c0_28 = arith.constant 0 : index
    %c0_29 = arith.constant 0 : index
    %23 = vector.load %arg6[%c0_28, %c0_29] : memref<352x64xf32, #tpu.memory_space<vmem>>, vector<352x64xf32>
    %24 = arith.addf %23, %22 : vector<352x64xf32>
    %c0_30 = arith.constant 0 : index
    %c0_31 = arith.constant 0 : index
    %25 = vector.load %arg6[%c0_30, %c0_31] : memref<352x64xf32, #tpu.memory_space<vmem>>, vector<352x64xf32>
    tpu.vector_store %arg6[%c0_30, %c0_31], %24 {strides = array<i32>} : memref<352x64xf32, #tpu.memory_space<vmem>>, vector<352x64xf32>,
    %c17 = arith.constant 17 : index
    %c0_32 = arith.constant 0 : index
    %26 = vector.load %arg1[%c17, %c0_32] : memref<400x64xbf16, #tpu.memory_space<vmem>>, vector<352x64xbf16>
    %c4 = arith.constant 4 : index
    %c0_33 = arith.constant 0 : index
    %c0_34 = arith.constant 0 : index
    %27 = vector.load %arg2[%c4, %c0_33, %c0_34] : memref<9x64x64xbf16, #tpu.memory_space<vmem>>, vector<1x64x64xbf16>
    %28 = vector.shape_cast %27 : vector<1x64x64xbf16> to vector<64x64xbf16>
    %cst_35 = arith.constant dense<0.000000e+00> : vector<352x64xf32>
    %29 = tpu.matmul %26, %28, %cst_35 {dimension_numbers = #tpu.dot_dimension_numbers<[1], [0], [0], [1], [0, 0, 1, 1], [], []>} : vector<352x64xbf16>, vector<64x64xbf16>, vector<352x64xf32> -> vector<352x64xf32>
    %c0_36 = arith.constant 0 : index
    %c0_37 = arith.constant 0 : index
    %30 = vector.load %arg6[%c0_36, %c0_37] : memref<352x64xf32, #tpu.memory_space<vmem>>, vector<352x64xf32>
    %31 = arith.addf %30, %29 : vector<352x64xf32>
    %c0_38 = arith.constant 0 : index
    %c0_39 = arith.constant 0 : index
    %32 = vector.load %arg6[%c0_38, %c0_39] : memref<352x64xf32, #tpu.memory_space<vmem>>, vector<352x64xf32>
    tpu.vector_store %arg6[%c0_38, %c0_39], %31 {strides = array<i32>} : memref<352x64xf32, #tpu.memory_space<vmem>>, vector<352x64xf32>,
    %c18 = arith.constant 18 : index
    %c0_40 = arith.constant 0 : index
    %33 = vector.load %arg1[%c18, %c0_40] : memref<400x64xbf16, #tpu.memory_space<vmem>>, vector<352x64xbf16>
    %c5 = arith.constant 5 : index
    %c0_41 = arith.constant 0 : index
    %c0_42 = arith.constant 0 : index
    %34 = vector.load %arg2[%c5, %c0_41, %c0_42] : memref<9x64x64xbf16, #tpu.memory_space<vmem>>, vector<1x64x64xbf16>
    %35 = vector.shape_cast %34 : vector<1x64x64xbf16> to vector<64x64xbf16>
    %cst_43 = arith.constant dense<0.000000e+00> : vector<352x64xf32>
    %36 = tpu.matmul %33, %35, %cst_43 {dimension_numbers = #tpu.dot_dimension_numbers<[1], [0], [0], [1], [0, 0, 1, 1], [], []>} : vector<352x64xbf16>, vector<64x64xbf16>, vector<352x64xf32> -> vector<352x64xf32>
    %c0_44 = arith.constant 0 : index
    %c0_45 = arith.constant 0 : index
    %37 = vector.load %arg6[%c0_44, %c0_45] : memref<352x64xf32, #tpu.memory_space<vmem>>, vector<352x64xf32>
    %38 = arith.addf %37, %36 : vector<352x64xf32>
    %c0_46 = arith.constant 0 : index
    %c0_47 = arith.constant 0 : index
    %39 = vector.load %arg6[%c0_46, %c0_47] : memref<352x64xf32, #tpu.memory_space<vmem>>, vector<352x64xf32>
    tpu.vector_store %arg6[%c0_46, %c0_47], %38 {strides = array<i32>} : memref<352x64xf32, #tpu.memory_space<vmem>>, vector<352x64xf32>,
    %c32 = arith.constant 32 : index
    %c0_48 = arith.constant 0 : index
    %40 = vector.load %arg1[%c32, %c0_48] : memref<400x64xbf16, #tpu.memory_space<vmem>>, vector<352x64xbf16>
    %c6 = arith.constant 6 : index
    %c0_49 = arith.constant 0 : index
    %c0_50 = arith.constant 0 : index
    %41 = vector.load %arg2[%c6, %c0_49, %c0_50] : memref<9x64x64xbf16, #tpu.memory_space<vmem>>, vector<1x64x64xbf16>
    %42 = vector.shape_cast %41 : vector<1x64x64xbf16> to vector<64x64xbf16>
    %cst_51 = arith.constant dense<0.000000e+00> : vector<352x64xf32>
    %43 = tpu.matmul %40, %42, %cst_51 {dimension_numbers = #tpu.dot_dimension_numbers<[1], [0], [0], [1], [0, 0, 1, 1], [], []>} : vector<352x64xbf16>, vector<64x64xbf16>, vector<352x64xf32> -> vector<352x64xf32>
    %c0_52 = arith.constant 0 : index
    %c0_53 = arith.constant 0 : index
    %44 = vector.load %arg6[%c0_52, %c0_53] : memref<352x64xf32, #tpu.memory_space<vmem>>, vector<352x64xf32>
    %45 = arith.addf %44, %43 : vector<352x64xf32>
    %c0_54 = arith.constant 0 : index
    %c0_55 = arith.constant 0 : index
    %46 = vector.load %arg6[%c0_54, %c0_55] : memref<352x64xf32, #tpu.memory_space<vmem>>, vector<352x64xf32>
    tpu.vector_store %arg6[%c0_54, %c0_55], %45 {strides = array<i32>} : memref<352x64xf32, #tpu.memory_space<vmem>>, vector<352x64xf32>,
    %c33 = arith.constant 33 : index
    %c0_56 = arith.constant 0 : index
    %47 = vector.load %arg1[%c33, %c0_56] : memref<400x64xbf16, #tpu.memory_space<vmem>>, vector<352x64xbf16>
    %c7 = arith.constant 7 : index
    %c0_57 = arith.constant 0 : index
    %c0_58 = arith.constant 0 : index
    %48 = vector.load %arg2[%c7, %c0_57, %c0_58] : memref<9x64x64xbf16, #tpu.memory_space<vmem>>, vector<1x64x64xbf16>
    %49 = vector.shape_cast %48 : vector<1x64x64xbf16> to vector<64x64xbf16>
    %cst_59 = arith.constant dense<0.000000e+00> : vector<352x64xf32>
    %50 = tpu.matmul %47, %49, %cst_59 {dimension_numbers = #tpu.dot_dimension_numbers<[1], [0], [0], [1], [0, 0, 1, 1], [], []>} : vector<352x64xbf16>, vector<64x64xbf16>, vector<352x64xf32> -> vector<352x64xf32>
    %c0_60 = arith.constant 0 : index
    %c0_61 = arith.constant 0 : index
    %51 = vector.load %arg6[%c0_60, %c0_61] : memref<352x64xf32, #tpu.memory_space<vmem>>, vector<352x64xf32>
    %52 = arith.addf %51, %50 : vector<352x64xf32>
    %c0_62 = arith.constant 0 : index
    %c0_63 = arith.constant 0 : index
    %53 = vector.load %arg6[%c0_62, %c0_63] : memref<352x64xf32, #tpu.memory_space<vmem>>, vector<352x64xf32>
    tpu.vector_store %arg6[%c0_62, %c0_63], %52 {strides = array<i32>} : memref<352x64xf32, #tpu.memory_space<vmem>>, vector<352x64xf32>,
    %c34 = arith.constant 34 : index
    %c0_64 = arith.constant 0 : index
    %54 = vector.load %arg1[%c34, %c0_64] : memref<400x64xbf16, #tpu.memory_space<vmem>>, vector<352x64xbf16>
    %c8 = arith.constant 8 : index
    %c0_65 = arith.constant 0 : index
    %c0_66 = arith.constant 0 : index
    %55 = vector.load %arg2[%c8, %c0_65, %c0_66] : memref<9x64x64xbf16, #tpu.memory_space<vmem>>, vector<1x64x64xbf16>
    %56 = vector.shape_cast %55 : vector<1x64x64xbf16> to vector<64x64xbf16>
    %cst_67 = arith.constant dense<0.000000e+00> : vector<352x64xf32>
    %57 = tpu.matmul %54, %56, %cst_67 {dimension_numbers = #tpu.dot_dimension_numbers<[1], [0], [0], [1], [0, 0, 1, 1], [], []>} : vector<352x64xbf16>, vector<64x64xbf16>, vector<352x64xf32> -> vector<352x64xf32>
    %c0_68 = arith.constant 0 : index
    %c0_69 = arith.constant 0 : index
    %58 = vector.load %arg6[%c0_68, %c0_69] : memref<352x64xf32, #tpu.memory_space<vmem>>, vector<352x64xf32>
    %59 = arith.addf %58, %57 : vector<352x64xf32>
    %c0_70 = arith.constant 0 : index
    %c0_71 = arith.constant 0 : index
    %60 = vector.load %arg6[%c0_70, %c0_71] : memref<352x64xf32, #tpu.memory_space<vmem>>, vector<352x64xf32>
    tpu.vector_store %arg6[%c0_70, %c0_71], %59 {strides = array<i32>} : memref<352x64xf32, #tpu.memory_space<vmem>>, vector<352x64xf32>,
    %c0_72 = arith.constant 0 : index
    %c0_73 = arith.constant 0 : index
    %61 = vector.load %arg3[%c0_72, %c0_73] : memref<352x1xf32, #tpu.memory_space<vmem>>, vector<352x1xf32>
    %c0_74 = arith.constant 0 : index
    %c0_75 = arith.constant 0 : index
    %62 = vector.load %arg6[%c0_74, %c0_75] : memref<352x64xf32, #tpu.memory_space<vmem>>, vector<352x64xf32>
    %63 = vector.broadcast %61 : vector<352x1xf32> to vector<352x64xf32>
    %64 = arith.mulf %62, %63 : vector<352x64xf32>
    %cst_76 = arith.constant dense<0.000000e+00> : vector<64xf32>
    %65 = vector.multi_reduction <add>, %64, %cst_76 [0] : vector<352x64xf32> to vector<64xf32>
    %66 = vector.shape_cast %65 : vector<64xf32> to vector<1x64xf32>
    %cst_77 = arith.constant 7.812500e-03 : f32
    %67 = vector.broadcast %cst_77 : f32 to vector<1x64xf32>
    %68 = arith.mulf %66, %67 : vector<1x64xf32>
    %69 = vector.broadcast %68 : vector<1x64xf32> to vector<352x64xf32>
    %70 = arith.subf %62, %69 : vector<352x64xf32>
    %71 = arith.mulf %70, %70 : vector<352x64xf32>
    %72 = vector.broadcast %61 : vector<352x1xf32> to vector<352x64xf32>
    %73 = arith.mulf %71, %72 : vector<352x64xf32>
    %cst_78 = arith.constant dense<0.000000e+00> : vector<64xf32>
    %74 = vector.multi_reduction <add>, %73, %cst_78 [0] : vector<352x64xf32> to vector<64xf32>
    %75 = vector.shape_cast %74 : vector<64xf32> to vector<1x64xf32>
    %cst_79 = arith.constant 7.812500e-03 : f32
    %76 = vector.broadcast %cst_79 : f32 to vector<1x64xf32>
    %77 = arith.mulf %75, %76 : vector<1x64xf32>
    %cst_80 = arith.constant 9.99999974E-6 : f32
    %78 = vector.broadcast %cst_80 : f32 to vector<1x64xf32>
    %79 = arith.addf %77, %78 : vector<1x64xf32>
    %80 = math.rsqrt %79 : vector<1x64xf32>
    %81 = vector.broadcast %80 : vector<1x64xf32> to vector<352x64xf32>
    %82 = arith.mulf %70, %81 : vector<352x64xf32>
    %c0_81 = arith.constant 0 : index
    %c0_82 = arith.constant 0 : index
    %83 = vector.load %arg4[%c0_81, %c0_82] : memref<352x64xbf16, #tpu.memory_space<vmem>>, vector<352x64xbf16>
    %84 = arith.extf %83 : vector<352x64xbf16> to vector<352x64xf32>
    %85 = arith.addf %82, %84 : vector<352x64xf32>
    %cst_83 = arith.constant 0.000000e+00 : f32
    %86 = vector.broadcast %cst_83 : f32 to vector<352x64xf32>
    %87 = arith.maximumf %85, %86 : vector<352x64xf32>
    %88 = arith.truncf %87 : vector<352x64xf32> to vector<352x64xbf16>
    %c0_84 = arith.constant 0 : index
    %c0_85 = arith.constant 0 : index
    %89 = vector.load %arg5[%c0_84, %c0_85] : memref<352x64xbf16, #tpu.memory_space<vmem>>, vector<352x64xbf16>
    tpu.vector_store %arg5[%c0_84, %c0_85], %88 {strides = array<i32>} : memref<352x64xbf16, #tpu.memory_space<vmem>>, vector<352x64xbf16>,
    return
  }
  func.func @transform_0(%arg0: i32) -> (i32, i32) {
    %c0_i32 = arith.constant 0 : i32
    %c0_i32_0 = arith.constant 0 : i32
    %c0_i32_1 = arith.constant 0 : i32
    return %c0_i32, %c0_i32_0 : i32, i32
  }
  func.func @transform_1(%arg0: i32) -> (i32, i32, i32) {
    %c0_i32 = arith.constant 0 : i32
    %c0_i32_0 = arith.constant 0 : i32
    %c0_i32_1 = arith.constant 0 : i32
    return %c0_i32, %c0_i32_0, %arg0 : i32, i32, i32
  }
  func.func @transform_2(%arg0: i32) -> (i32, i32) {
    %c0_i32 = arith.constant 0 : i32
    %c0_i32_0 = arith.constant 0 : i32
    %c0_i32_1 = arith.constant 0 : i32
    return %c0_i32, %c0_i32_0 : i32, i32
  }
  func.func @transform_3(%arg0: i32) -> (i32, i32) {
    %c0_i32 = arith.constant 0 : i32
    %c0_i32_0 = arith.constant 0 : i32
    return %c0_i32, %arg0 : i32, i32
  }
  func.func @transform_4(%arg0: i32) -> (i32, i32) {
    %c0_i32 = arith.constant 0 : i32
    %c0_i32_0 = arith.constant 0 : i32
    return %c0_i32, %arg0 : i32, i32
  }
}

module attributes {stable_mosaic.version = 11 : i64} {
  func.func @_gemm_bn_kernel(%arg0: i32, %arg1: memref<32x576xbf16, #tpu.memory_space<vmem>>, %arg2: memref<576x128xbf16, #tpu.memory_space<vmem>>, %arg3: memref<1x128xf32, #tpu.memory_space<vmem>>, %arg4: memref<32x128xbf16, #tpu.memory_space<vmem>>) attributes {dimension_semantics = [#tpu.dimension_semantics<parallel>], iteration_bounds = array<i64: 1>, scalar_prefetch = 0 : i64, scratch_operands = 0 : i64, tpu.core_type = #tpu.core_type<tc>, window_params = [{pipeline_mode = #tpu.pipeline_mode<synchronous>, transform_indices = @transform_0, window_bounds = array<i64: 32, 576>}, {transform_indices = @transform_1, window_bounds = array<i64: 576, 128>}, {transform_indices = @transform_2, window_bounds = array<i64: 1, 128>}, {transform_indices = @transform_3, window_bounds = array<i64: 32, 128>}]} {
    %c0 = arith.constant 0 : index
    %c0_0 = arith.constant 0 : index
    %0 = vector.load %arg1[%c0, %c0_0] : memref<32x576xbf16, #tpu.memory_space<vmem>>, vector<32x576xbf16>
    %c0_1 = arith.constant 0 : index
    %c0_2 = arith.constant 0 : index
    %1 = vector.load %arg2[%c0_1, %c0_2] : memref<576x128xbf16, #tpu.memory_space<vmem>>, vector<576x128xbf16>
    %cst = arith.constant dense<0.000000e+00> : vector<32x128xf32>
    %2 = tpu.matmul %0, %1, %cst {dimension_numbers = #tpu.dot_dimension_numbers<[1], [0], [0], [1], [0, 0, 1, 1], [], []>} : vector<32x576xbf16>, vector<576x128xbf16>, vector<32x128xf32> -> vector<32x128xf32>
    %c0_3 = arith.constant 0 : index
    %c0_4 = arith.constant 0 : index
    %3 = vector.load %arg3[%c0_3, %c0_4] : memref<1x128xf32, #tpu.memory_space<vmem>>, vector<1x128xf32>
    %4 = vector.broadcast %3 : vector<1x128xf32> to vector<32x128xf32>
    %5 = arith.addf %2, %4 : vector<32x128xf32>
    %cst_5 = arith.constant dense<0.000000e+00> : vector<128xf32>
    %6 = vector.multi_reduction <add>, %5, %cst_5 [0] : vector<32x128xf32> to vector<128xf32>
    %7 = vector.shape_cast %6 : vector<128xf32> to vector<1x128xf32>
    %cst_6 = arith.constant 3.125000e-02 : f32
    %8 = vector.broadcast %cst_6 : f32 to vector<1x128xf32>
    %9 = arith.mulf %7, %8 : vector<1x128xf32>
    %10 = vector.broadcast %9 : vector<1x128xf32> to vector<32x128xf32>
    %11 = arith.subf %5, %10 : vector<32x128xf32>
    %12 = arith.mulf %11, %11 : vector<32x128xf32>
    %cst_7 = arith.constant dense<0.000000e+00> : vector<128xf32>
    %13 = vector.multi_reduction <add>, %12, %cst_7 [0] : vector<32x128xf32> to vector<128xf32>
    %14 = vector.shape_cast %13 : vector<128xf32> to vector<1x128xf32>
    %cst_8 = arith.constant 3.125000e-02 : f32
    %15 = vector.broadcast %cst_8 : f32 to vector<1x128xf32>
    %16 = arith.mulf %14, %15 : vector<1x128xf32>
    %cst_9 = arith.constant 9.99999974E-6 : f32
    %17 = vector.broadcast %cst_9 : f32 to vector<1x128xf32>
    %18 = arith.addf %16, %17 : vector<1x128xf32>
    %19 = math.rsqrt %18 : vector<1x128xf32>
    %20 = vector.broadcast %19 : vector<1x128xf32> to vector<32x128xf32>
    %21 = arith.mulf %11, %20 : vector<32x128xf32>
    %cst_10 = arith.constant 0.000000e+00 : f32
    %22 = vector.broadcast %cst_10 : f32 to vector<32x128xf32>
    %23 = arith.maximumf %21, %22 : vector<32x128xf32>
    %24 = arith.truncf %23 : vector<32x128xf32> to vector<32x128xbf16>
    %c0_11 = arith.constant 0 : index
    %c0_12 = arith.constant 0 : index
    %25 = vector.load %arg4[%c0_11, %c0_12] : memref<32x128xbf16, #tpu.memory_space<vmem>>, vector<32x128xbf16>
    tpu.vector_store %arg4[%c0_11, %c0_12], %24 {strides = array<i32>} : memref<32x128xbf16, #tpu.memory_space<vmem>>, vector<32x128xbf16>,
    return
  }
  func.func @transform_0(%arg0: i32) -> (i32, i32) {
    %c0_i32 = arith.constant 0 : i32
    %c0_i32_0 = arith.constant 0 : i32
    %c0_i32_1 = arith.constant 0 : i32
    return %c0_i32, %c0_i32_0 : i32, i32
  }
  func.func @transform_1(%arg0: i32) -> (i32, i32) {
    %c0_i32 = arith.constant 0 : i32
    %c0_i32_0 = arith.constant 0 : i32
    return %c0_i32, %arg0 : i32, i32
  }
  func.func @transform_2(%arg0: i32) -> (i32, i32) {
    %c0_i32 = arith.constant 0 : i32
    %c0_i32_0 = arith.constant 0 : i32
    return %c0_i32, %arg0 : i32, i32
  }
  func.func @transform_3(%arg0: i32) -> (i32, i32) {
    %c0_i32 = arith.constant 0 : i32
    %c0_i32_0 = arith.constant 0 : i32
    return %c0_i32, %arg0 : i32, i32
  }
}

module attributes {stable_mosaic.version = 11 : i64} {
  func.func @_gemm_bn_kernel(%arg0: i32, %arg1: memref<32x64xbf16, #tpu.memory_space<vmem>>, %arg2: memref<64x128xbf16, #tpu.memory_space<vmem>>, %arg3: memref<1x128xf32, #tpu.memory_space<vmem>>, %arg4: memref<32x128xbf16, #tpu.memory_space<vmem>>) attributes {dimension_semantics = [#tpu.dimension_semantics<parallel>], iteration_bounds = array<i64: 1>, scalar_prefetch = 0 : i64, scratch_operands = 0 : i64, tpu.core_type = #tpu.core_type<tc>, window_params = [{pipeline_mode = #tpu.pipeline_mode<synchronous>, transform_indices = @transform_0, window_bounds = array<i64: 32, 64>}, {transform_indices = @transform_1, window_bounds = array<i64: 64, 128>}, {transform_indices = @transform_2, window_bounds = array<i64: 1, 128>}, {transform_indices = @transform_3, window_bounds = array<i64: 32, 128>}]} {
    %c0 = arith.constant 0 : index
    %c0_0 = arith.constant 0 : index
    %0 = vector.load %arg1[%c0, %c0_0] : memref<32x64xbf16, #tpu.memory_space<vmem>>, vector<32x64xbf16>
    %c0_1 = arith.constant 0 : index
    %c0_2 = arith.constant 0 : index
    %1 = vector.load %arg2[%c0_1, %c0_2] : memref<64x128xbf16, #tpu.memory_space<vmem>>, vector<64x128xbf16>
    %cst = arith.constant dense<0.000000e+00> : vector<32x128xf32>
    %2 = tpu.matmul %0, %1, %cst {dimension_numbers = #tpu.dot_dimension_numbers<[1], [0], [0], [1], [0, 0, 1, 1], [], []>} : vector<32x64xbf16>, vector<64x128xbf16>, vector<32x128xf32> -> vector<32x128xf32>
    %c0_3 = arith.constant 0 : index
    %c0_4 = arith.constant 0 : index
    %3 = vector.load %arg3[%c0_3, %c0_4] : memref<1x128xf32, #tpu.memory_space<vmem>>, vector<1x128xf32>
    %4 = vector.broadcast %3 : vector<1x128xf32> to vector<32x128xf32>
    %5 = arith.addf %2, %4 : vector<32x128xf32>
    %cst_5 = arith.constant dense<0.000000e+00> : vector<128xf32>
    %6 = vector.multi_reduction <add>, %5, %cst_5 [0] : vector<32x128xf32> to vector<128xf32>
    %7 = vector.shape_cast %6 : vector<128xf32> to vector<1x128xf32>
    %cst_6 = arith.constant 3.125000e-02 : f32
    %8 = vector.broadcast %cst_6 : f32 to vector<1x128xf32>
    %9 = arith.mulf %7, %8 : vector<1x128xf32>
    %10 = vector.broadcast %9 : vector<1x128xf32> to vector<32x128xf32>
    %11 = arith.subf %5, %10 : vector<32x128xf32>
    %12 = arith.mulf %11, %11 : vector<32x128xf32>
    %cst_7 = arith.constant dense<0.000000e+00> : vector<128xf32>
    %13 = vector.multi_reduction <add>, %12, %cst_7 [0] : vector<32x128xf32> to vector<128xf32>
    %14 = vector.shape_cast %13 : vector<128xf32> to vector<1x128xf32>
    %cst_8 = arith.constant 3.125000e-02 : f32
    %15 = vector.broadcast %cst_8 : f32 to vector<1x128xf32>
    %16 = arith.mulf %14, %15 : vector<1x128xf32>
    %cst_9 = arith.constant 9.99999974E-6 : f32
    %17 = vector.broadcast %cst_9 : f32 to vector<1x128xf32>
    %18 = arith.addf %16, %17 : vector<1x128xf32>
    %19 = math.rsqrt %18 : vector<1x128xf32>
    %20 = vector.broadcast %19 : vector<1x128xf32> to vector<32x128xf32>
    %21 = arith.mulf %11, %20 : vector<32x128xf32>
    %22 = arith.truncf %21 : vector<32x128xf32> to vector<32x128xbf16>
    %c0_10 = arith.constant 0 : index
    %c0_11 = arith.constant 0 : index
    %23 = vector.load %arg4[%c0_10, %c0_11] : memref<32x128xbf16, #tpu.memory_space<vmem>>, vector<32x128xbf16>
    tpu.vector_store %arg4[%c0_10, %c0_11], %22 {strides = array<i32>} : memref<32x128xbf16, #tpu.memory_space<vmem>>, vector<32x128xbf16>,
    return
  }
  func.func @transform_0(%arg0: i32) -> (i32, i32) {
    %c0_i32 = arith.constant 0 : i32
    %c0_i32_0 = arith.constant 0 : i32
    %c0_i32_1 = arith.constant 0 : i32
    return %c0_i32, %c0_i32_0 : i32, i32
  }
  func.func @transform_1(%arg0: i32) -> (i32, i32) {
    %c0_i32 = arith.constant 0 : i32
    %c0_i32_0 = arith.constant 0 : i32
    return %c0_i32, %arg0 : i32, i32
  }
  func.func @transform_2(%arg0: i32) -> (i32, i32) {
    %c0_i32 = arith.constant 0 : i32
    %c0_i32_0 = arith.constant 0 : i32
    return %c0_i32, %arg0 : i32, i32
  }
  func.func @transform_3(%arg0: i32) -> (i32, i32) {
    %c0_i32 = arith.constant 0 : i32
    %c0_i32_0 = arith.constant 0 : i32
    return %c0_i32, %arg0 : i32, i32
  }
}

module attributes {stable_mosaic.version = 11 : i64} {
  func.func @_conv3x3s1_bn_kernel(%arg0: i32, %arg1: memref<136x128xbf16, #tpu.memory_space<vmem>>, %arg2: memref<9x128x128xbf16, #tpu.memory_space<vmem>>, %arg3: memref<112x1xf32, #tpu.memory_space<vmem>>, %arg4: memref<112x128xbf16, #tpu.memory_space<vmem>>, %arg5: memref<112x128xbf16, #tpu.memory_space<vmem>>, %arg6: memref<112x128xf32, #tpu.memory_space<vmem>>) attributes {dimension_semantics = [#tpu.dimension_semantics<parallel>], iteration_bounds = array<i64: 1>, scalar_prefetch = 0 : i64, scratch_operands = 1 : i64, tpu.core_type = #tpu.core_type<tc>, window_params = [{pipeline_mode = #tpu.pipeline_mode<synchronous>, transform_indices = @transform_0, window_bounds = array<i64: 136, 128>}, {transform_indices = @transform_1, window_bounds = array<i64: 9, 128, 128>}, {pipeline_mode = #tpu.pipeline_mode<synchronous>, transform_indices = @transform_2, window_bounds = array<i64: 112, 1>}, {transform_indices = @transform_3, window_bounds = array<i64: 112, 128>}, {transform_indices = @transform_4, window_bounds = array<i64: 112, 128>}]} {
    %c0 = arith.constant 0 : index
    %c0_0 = arith.constant 0 : index
    %0 = vector.load %arg1[%c0, %c0_0] : memref<136x128xbf16, #tpu.memory_space<vmem>>, vector<112x128xbf16>
    %c0_1 = arith.constant 0 : index
    %c0_2 = arith.constant 0 : index
    %c0_3 = arith.constant 0 : index
    %1 = vector.load %arg2[%c0_1, %c0_2, %c0_3] : memref<9x128x128xbf16, #tpu.memory_space<vmem>>, vector<1x128x128xbf16>
    %2 = vector.shape_cast %1 : vector<1x128x128xbf16> to vector<128x128xbf16>
    %cst = arith.constant dense<0.000000e+00> : vector<112x128xf32>
    %3 = tpu.matmul %0, %2, %cst {dimension_numbers = #tpu.dot_dimension_numbers<[1], [0], [0], [1], [0, 0, 1, 1], [], []>} : vector<112x128xbf16>, vector<128x128xbf16>, vector<112x128xf32> -> vector<112x128xf32>
    %c0_4 = arith.constant 0 : index
    %c0_5 = arith.constant 0 : index
    %4 = vector.load %arg6[%c0_4, %c0_5] : memref<112x128xf32, #tpu.memory_space<vmem>>, vector<112x128xf32>
    tpu.vector_store %arg6[%c0_4, %c0_5], %3 {strides = array<i32>} : memref<112x128xf32, #tpu.memory_space<vmem>>, vector<112x128xf32>,
    %c1 = arith.constant 1 : index
    %c0_6 = arith.constant 0 : index
    %5 = vector.load %arg1[%c1, %c0_6] : memref<136x128xbf16, #tpu.memory_space<vmem>>, vector<112x128xbf16>
    %c1_7 = arith.constant 1 : index
    %c0_8 = arith.constant 0 : index
    %c0_9 = arith.constant 0 : index
    %6 = vector.load %arg2[%c1_7, %c0_8, %c0_9] : memref<9x128x128xbf16, #tpu.memory_space<vmem>>, vector<1x128x128xbf16>
    %7 = vector.shape_cast %6 : vector<1x128x128xbf16> to vector<128x128xbf16>
    %cst_10 = arith.constant dense<0.000000e+00> : vector<112x128xf32>
    %8 = tpu.matmul %5, %7, %cst_10 {dimension_numbers = #tpu.dot_dimension_numbers<[1], [0], [0], [1], [0, 0, 1, 1], [], []>} : vector<112x128xbf16>, vector<128x128xbf16>, vector<112x128xf32> -> vector<112x128xf32>
    %c0_11 = arith.constant 0 : index
    %c0_12 = arith.constant 0 : index
    %9 = vector.load %arg6[%c0_11, %c0_12] : memref<112x128xf32, #tpu.memory_space<vmem>>, vector<112x128xf32>
    %10 = arith.addf %9, %8 : vector<112x128xf32>
    %c0_13 = arith.constant 0 : index
    %c0_14 = arith.constant 0 : index
    %11 = vector.load %arg6[%c0_13, %c0_14] : memref<112x128xf32, #tpu.memory_space<vmem>>, vector<112x128xf32>
    tpu.vector_store %arg6[%c0_13, %c0_14], %10 {strides = array<i32>} : memref<112x128xf32, #tpu.memory_space<vmem>>, vector<112x128xf32>,
    %c2 = arith.constant 2 : index
    %c0_15 = arith.constant 0 : index
    %12 = vector.load %arg1[%c2, %c0_15] : memref<136x128xbf16, #tpu.memory_space<vmem>>, vector<112x128xbf16>
    %c2_16 = arith.constant 2 : index
    %c0_17 = arith.constant 0 : index
    %c0_18 = arith.constant 0 : index
    %13 = vector.load %arg2[%c2_16, %c0_17, %c0_18] : memref<9x128x128xbf16, #tpu.memory_space<vmem>>, vector<1x128x128xbf16>
    %14 = vector.shape_cast %13 : vector<1x128x128xbf16> to vector<128x128xbf16>
    %cst_19 = arith.constant dense<0.000000e+00> : vector<112x128xf32>
    %15 = tpu.matmul %12, %14, %cst_19 {dimension_numbers = #tpu.dot_dimension_numbers<[1], [0], [0], [1], [0, 0, 1, 1], [], []>} : vector<112x128xbf16>, vector<128x128xbf16>, vector<112x128xf32> -> vector<112x128xf32>
    %c0_20 = arith.constant 0 : index
    %c0_21 = arith.constant 0 : index
    %16 = vector.load %arg6[%c0_20, %c0_21] : memref<112x128xf32, #tpu.memory_space<vmem>>, vector<112x128xf32>
    %17 = arith.addf %16, %15 : vector<112x128xf32>
    %c0_22 = arith.constant 0 : index
    %c0_23 = arith.constant 0 : index
    %18 = vector.load %arg6[%c0_22, %c0_23] : memref<112x128xf32, #tpu.memory_space<vmem>>, vector<112x128xf32>
    tpu.vector_store %arg6[%c0_22, %c0_23], %17 {strides = array<i32>} : memref<112x128xf32, #tpu.memory_space<vmem>>, vector<112x128xf32>,
    %c8 = arith.constant 8 : index
    %c0_24 = arith.constant 0 : index
    %19 = vector.load %arg1[%c8, %c0_24] : memref<136x128xbf16, #tpu.memory_space<vmem>>, vector<112x128xbf16>
    %c3 = arith.constant 3 : index
    %c0_25 = arith.constant 0 : index
    %c0_26 = arith.constant 0 : index
    %20 = vector.load %arg2[%c3, %c0_25, %c0_26] : memref<9x128x128xbf16, #tpu.memory_space<vmem>>, vector<1x128x128xbf16>
    %21 = vector.shape_cast %20 : vector<1x128x128xbf16> to vector<128x128xbf16>
    %cst_27 = arith.constant dense<0.000000e+00> : vector<112x128xf32>
    %22 = tpu.matmul %19, %21, %cst_27 {dimension_numbers = #tpu.dot_dimension_numbers<[1], [0], [0], [1], [0, 0, 1, 1], [], []>} : vector<112x128xbf16>, vector<128x128xbf16>, vector<112x128xf32> -> vector<112x128xf32>
    %c0_28 = arith.constant 0 : index
    %c0_29 = arith.constant 0 : index
    %23 = vector.load %arg6[%c0_28, %c0_29] : memref<112x128xf32, #tpu.memory_space<vmem>>, vector<112x128xf32>
    %24 = arith.addf %23, %22 : vector<112x128xf32>
    %c0_30 = arith.constant 0 : index
    %c0_31 = arith.constant 0 : index
    %25 = vector.load %arg6[%c0_30, %c0_31] : memref<112x128xf32, #tpu.memory_space<vmem>>, vector<112x128xf32>
    tpu.vector_store %arg6[%c0_30, %c0_31], %24 {strides = array<i32>} : memref<112x128xf32, #tpu.memory_space<vmem>>, vector<112x128xf32>,
    %c9 = arith.constant 9 : index
    %c0_32 = arith.constant 0 : index
    %26 = vector.load %arg1[%c9, %c0_32] : memref<136x128xbf16, #tpu.memory_space<vmem>>, vector<112x128xbf16>
    %c4 = arith.constant 4 : index
    %c0_33 = arith.constant 0 : index
    %c0_34 = arith.constant 0 : index
    %27 = vector.load %arg2[%c4, %c0_33, %c0_34] : memref<9x128x128xbf16, #tpu.memory_space<vmem>>, vector<1x128x128xbf16>
    %28 = vector.shape_cast %27 : vector<1x128x128xbf16> to vector<128x128xbf16>
    %cst_35 = arith.constant dense<0.000000e+00> : vector<112x128xf32>
    %29 = tpu.matmul %26, %28, %cst_35 {dimension_numbers = #tpu.dot_dimension_numbers<[1], [0], [0], [1], [0, 0, 1, 1], [], []>} : vector<112x128xbf16>, vector<128x128xbf16>, vector<112x128xf32> -> vector<112x128xf32>
    %c0_36 = arith.constant 0 : index
    %c0_37 = arith.constant 0 : index
    %30 = vector.load %arg6[%c0_36, %c0_37] : memref<112x128xf32, #tpu.memory_space<vmem>>, vector<112x128xf32>
    %31 = arith.addf %30, %29 : vector<112x128xf32>
    %c0_38 = arith.constant 0 : index
    %c0_39 = arith.constant 0 : index
    %32 = vector.load %arg6[%c0_38, %c0_39] : memref<112x128xf32, #tpu.memory_space<vmem>>, vector<112x128xf32>
    tpu.vector_store %arg6[%c0_38, %c0_39], %31 {strides = array<i32>} : memref<112x128xf32, #tpu.memory_space<vmem>>, vector<112x128xf32>,
    %c10 = arith.constant 10 : index
    %c0_40 = arith.constant 0 : index
    %33 = vector.load %arg1[%c10, %c0_40] : memref<136x128xbf16, #tpu.memory_space<vmem>>, vector<112x128xbf16>
    %c5 = arith.constant 5 : index
    %c0_41 = arith.constant 0 : index
    %c0_42 = arith.constant 0 : index
    %34 = vector.load %arg2[%c5, %c0_41, %c0_42] : memref<9x128x128xbf16, #tpu.memory_space<vmem>>, vector<1x128x128xbf16>
    %35 = vector.shape_cast %34 : vector<1x128x128xbf16> to vector<128x128xbf16>
    %cst_43 = arith.constant dense<0.000000e+00> : vector<112x128xf32>
    %36 = tpu.matmul %33, %35, %cst_43 {dimension_numbers = #tpu.dot_dimension_numbers<[1], [0], [0], [1], [0, 0, 1, 1], [], []>} : vector<112x128xbf16>, vector<128x128xbf16>, vector<112x128xf32> -> vector<112x128xf32>
    %c0_44 = arith.constant 0 : index
    %c0_45 = arith.constant 0 : index
    %37 = vector.load %arg6[%c0_44, %c0_45] : memref<112x128xf32, #tpu.memory_space<vmem>>, vector<112x128xf32>
    %38 = arith.addf %37, %36 : vector<112x128xf32>
    %c0_46 = arith.constant 0 : index
    %c0_47 = arith.constant 0 : index
    %39 = vector.load %arg6[%c0_46, %c0_47] : memref<112x128xf32, #tpu.memory_space<vmem>>, vector<112x128xf32>
    tpu.vector_store %arg6[%c0_46, %c0_47], %38 {strides = array<i32>} : memref<112x128xf32, #tpu.memory_space<vmem>>, vector<112x128xf32>,
    %c16 = arith.constant 16 : index
    %c0_48 = arith.constant 0 : index
    %40 = vector.load %arg1[%c16, %c0_48] : memref<136x128xbf16, #tpu.memory_space<vmem>>, vector<112x128xbf16>
    %c6 = arith.constant 6 : index
    %c0_49 = arith.constant 0 : index
    %c0_50 = arith.constant 0 : index
    %41 = vector.load %arg2[%c6, %c0_49, %c0_50] : memref<9x128x128xbf16, #tpu.memory_space<vmem>>, vector<1x128x128xbf16>
    %42 = vector.shape_cast %41 : vector<1x128x128xbf16> to vector<128x128xbf16>
    %cst_51 = arith.constant dense<0.000000e+00> : vector<112x128xf32>
    %43 = tpu.matmul %40, %42, %cst_51 {dimension_numbers = #tpu.dot_dimension_numbers<[1], [0], [0], [1], [0, 0, 1, 1], [], []>} : vector<112x128xbf16>, vector<128x128xbf16>, vector<112x128xf32> -> vector<112x128xf32>
    %c0_52 = arith.constant 0 : index
    %c0_53 = arith.constant 0 : index
    %44 = vector.load %arg6[%c0_52, %c0_53] : memref<112x128xf32, #tpu.memory_space<vmem>>, vector<112x128xf32>
    %45 = arith.addf %44, %43 : vector<112x128xf32>
    %c0_54 = arith.constant 0 : index
    %c0_55 = arith.constant 0 : index
    %46 = vector.load %arg6[%c0_54, %c0_55] : memref<112x128xf32, #tpu.memory_space<vmem>>, vector<112x128xf32>
    tpu.vector_store %arg6[%c0_54, %c0_55], %45 {strides = array<i32>} : memref<112x128xf32, #tpu.memory_space<vmem>>, vector<112x128xf32>,
    %c17 = arith.constant 17 : index
    %c0_56 = arith.constant 0 : index
    %47 = vector.load %arg1[%c17, %c0_56] : memref<136x128xbf16, #tpu.memory_space<vmem>>, vector<112x128xbf16>
    %c7 = arith.constant 7 : index
    %c0_57 = arith.constant 0 : index
    %c0_58 = arith.constant 0 : index
    %48 = vector.load %arg2[%c7, %c0_57, %c0_58] : memref<9x128x128xbf16, #tpu.memory_space<vmem>>, vector<1x128x128xbf16>
    %49 = vector.shape_cast %48 : vector<1x128x128xbf16> to vector<128x128xbf16>
    %cst_59 = arith.constant dense<0.000000e+00> : vector<112x128xf32>
    %50 = tpu.matmul %47, %49, %cst_59 {dimension_numbers = #tpu.dot_dimension_numbers<[1], [0], [0], [1], [0, 0, 1, 1], [], []>} : vector<112x128xbf16>, vector<128x128xbf16>, vector<112x128xf32> -> vector<112x128xf32>
    %c0_60 = arith.constant 0 : index
    %c0_61 = arith.constant 0 : index
    %51 = vector.load %arg6[%c0_60, %c0_61] : memref<112x128xf32, #tpu.memory_space<vmem>>, vector<112x128xf32>
    %52 = arith.addf %51, %50 : vector<112x128xf32>
    %c0_62 = arith.constant 0 : index
    %c0_63 = arith.constant 0 : index
    %53 = vector.load %arg6[%c0_62, %c0_63] : memref<112x128xf32, #tpu.memory_space<vmem>>, vector<112x128xf32>
    tpu.vector_store %arg6[%c0_62, %c0_63], %52 {strides = array<i32>} : memref<112x128xf32, #tpu.memory_space<vmem>>, vector<112x128xf32>,
    %c18 = arith.constant 18 : index
    %c0_64 = arith.constant 0 : index
    %54 = vector.load %arg1[%c18, %c0_64] : memref<136x128xbf16, #tpu.memory_space<vmem>>, vector<112x128xbf16>
    %c8_65 = arith.constant 8 : index
    %c0_66 = arith.constant 0 : index
    %c0_67 = arith.constant 0 : index
    %55 = vector.load %arg2[%c8_65, %c0_66, %c0_67] : memref<9x128x128xbf16, #tpu.memory_space<vmem>>, vector<1x128x128xbf16>
    %56 = vector.shape_cast %55 : vector<1x128x128xbf16> to vector<128x128xbf16>
    %cst_68 = arith.constant dense<0.000000e+00> : vector<112x128xf32>
    %57 = tpu.matmul %54, %56, %cst_68 {dimension_numbers = #tpu.dot_dimension_numbers<[1], [0], [0], [1], [0, 0, 1, 1], [], []>} : vector<112x128xbf16>, vector<128x128xbf16>, vector<112x128xf32> -> vector<112x128xf32>
    %c0_69 = arith.constant 0 : index
    %c0_70 = arith.constant 0 : index
    %58 = vector.load %arg6[%c0_69, %c0_70] : memref<112x128xf32, #tpu.memory_space<vmem>>, vector<112x128xf32>
    %59 = arith.addf %58, %57 : vector<112x128xf32>
    %c0_71 = arith.constant 0 : index
    %c0_72 = arith.constant 0 : index
    %60 = vector.load %arg6[%c0_71, %c0_72] : memref<112x128xf32, #tpu.memory_space<vmem>>, vector<112x128xf32>
    tpu.vector_store %arg6[%c0_71, %c0_72], %59 {strides = array<i32>} : memref<112x128xf32, #tpu.memory_space<vmem>>, vector<112x128xf32>,
    %c0_73 = arith.constant 0 : index
    %c0_74 = arith.constant 0 : index
    %61 = vector.load %arg3[%c0_73, %c0_74] : memref<112x1xf32, #tpu.memory_space<vmem>>, vector<112x1xf32>
    %c0_75 = arith.constant 0 : index
    %c0_76 = arith.constant 0 : index
    %62 = vector.load %arg6[%c0_75, %c0_76] : memref<112x128xf32, #tpu.memory_space<vmem>>, vector<112x128xf32>
    %63 = vector.broadcast %61 : vector<112x1xf32> to vector<112x128xf32>
    %64 = arith.mulf %62, %63 : vector<112x128xf32>
    %cst_77 = arith.constant dense<0.000000e+00> : vector<128xf32>
    %65 = vector.multi_reduction <add>, %64, %cst_77 [0] : vector<112x128xf32> to vector<128xf32>
    %66 = vector.shape_cast %65 : vector<128xf32> to vector<1x128xf32>
    %cst_78 = arith.constant 3.125000e-02 : f32
    %67 = vector.broadcast %cst_78 : f32 to vector<1x128xf32>
    %68 = arith.mulf %66, %67 : vector<1x128xf32>
    %69 = vector.broadcast %68 : vector<1x128xf32> to vector<112x128xf32>
    %70 = arith.subf %62, %69 : vector<112x128xf32>
    %71 = arith.mulf %70, %70 : vector<112x128xf32>
    %72 = vector.broadcast %61 : vector<112x1xf32> to vector<112x128xf32>
    %73 = arith.mulf %71, %72 : vector<112x128xf32>
    %cst_79 = arith.constant dense<0.000000e+00> : vector<128xf32>
    %74 = vector.multi_reduction <add>, %73, %cst_79 [0] : vector<112x128xf32> to vector<128xf32>
    %75 = vector.shape_cast %74 : vector<128xf32> to vector<1x128xf32>
    %cst_80 = arith.constant 3.125000e-02 : f32
    %76 = vector.broadcast %cst_80 : f32 to vector<1x128xf32>
    %77 = arith.mulf %75, %76 : vector<1x128xf32>
    %cst_81 = arith.constant 9.99999974E-6 : f32
    %78 = vector.broadcast %cst_81 : f32 to vector<1x128xf32>
    %79 = arith.addf %77, %78 : vector<1x128xf32>
    %80 = math.rsqrt %79 : vector<1x128xf32>
    %81 = vector.broadcast %80 : vector<1x128xf32> to vector<112x128xf32>
    %82 = arith.mulf %70, %81 : vector<112x128xf32>
    %c0_82 = arith.constant 0 : index
    %c0_83 = arith.constant 0 : index
    %83 = vector.load %arg4[%c0_82, %c0_83] : memref<112x128xbf16, #tpu.memory_space<vmem>>, vector<112x128xbf16>
    %84 = arith.extf %83 : vector<112x128xbf16> to vector<112x128xf32>
    %85 = arith.addf %82, %84 : vector<112x128xf32>
    %cst_84 = arith.constant 0.000000e+00 : f32
    %86 = vector.broadcast %cst_84 : f32 to vector<112x128xf32>
    %87 = arith.maximumf %85, %86 : vector<112x128xf32>
    %88 = arith.truncf %87 : vector<112x128xf32> to vector<112x128xbf16>
    %c0_85 = arith.constant 0 : index
    %c0_86 = arith.constant 0 : index
    %89 = vector.load %arg5[%c0_85, %c0_86] : memref<112x128xbf16, #tpu.memory_space<vmem>>, vector<112x128xbf16>
    tpu.vector_store %arg5[%c0_85, %c0_86], %88 {strides = array<i32>} : memref<112x128xbf16, #tpu.memory_space<vmem>>, vector<112x128xbf16>,
    return
  }
  func.func @transform_0(%arg0: i32) -> (i32, i32) {
    %c0_i32 = arith.constant 0 : i32
    %c0_i32_0 = arith.constant 0 : i32
    %c0_i32_1 = arith.constant 0 : i32
    return %c0_i32, %c0_i32_0 : i32, i32
  }
  func.func @transform_1(%arg0: i32) -> (i32, i32, i32) {
    %c0_i32 = arith.constant 0 : i32
    %c0_i32_0 = arith.constant 0 : i32
    %c0_i32_1 = arith.constant 0 : i32
    return %c0_i32, %c0_i32_0, %arg0 : i32, i32, i32
  }
  func.func @transform_2(%arg0: i32) -> (i32, i32) {
    %c0_i32 = arith.constant 0 : i32
    %c0_i32_0 = arith.constant 0 : i32
    %c0_i32_1 = arith.constant 0 : i32
    return %c0_i32, %c0_i32_0 : i32, i32
  }
  func.func @transform_3(%arg0: i32) -> (i32, i32) {
    %c0_i32 = arith.constant 0 : i32
    %c0_i32_0 = arith.constant 0 : i32
    return %c0_i32, %arg0 : i32, i32
  }
  func.func @transform_4(%arg0: i32) -> (i32, i32) {
    %c0_i32 = arith.constant 0 : i32
    %c0_i32_0 = arith.constant 0 : i32
    return %c0_i32, %arg0 : i32, i32
  }
}

module attributes {stable_mosaic.version = 11 : i64} {
  func.func @_conv3x3s1_bn_kernel(%arg0: i32, %arg1: memref<136x128xbf16, #tpu.memory_space<vmem>>, %arg2: memref<9x128x128xbf16, #tpu.memory_space<vmem>>, %arg3: memref<112x1xf32, #tpu.memory_space<vmem>>, %arg4: memref<112x128xbf16, #tpu.memory_space<vmem>>, %arg5: memref<112x128xf32, #tpu.memory_space<vmem>>) attributes {dimension_semantics = [#tpu.dimension_semantics<parallel>], iteration_bounds = array<i64: 1>, scalar_prefetch = 0 : i64, scratch_operands = 1 : i64, tpu.core_type = #tpu.core_type<tc>, window_params = [{pipeline_mode = #tpu.pipeline_mode<synchronous>, transform_indices = @transform_0, window_bounds = array<i64: 136, 128>}, {transform_indices = @transform_1, window_bounds = array<i64: 9, 128, 128>}, {pipeline_mode = #tpu.pipeline_mode<synchronous>, transform_indices = @transform_2, window_bounds = array<i64: 112, 1>}, {transform_indices = @transform_3, window_bounds = array<i64: 112, 128>}]} {
    %c0 = arith.constant 0 : index
    %c0_0 = arith.constant 0 : index
    %0 = vector.load %arg1[%c0, %c0_0] : memref<136x128xbf16, #tpu.memory_space<vmem>>, vector<112x128xbf16>
    %c0_1 = arith.constant 0 : index
    %c0_2 = arith.constant 0 : index
    %c0_3 = arith.constant 0 : index
    %1 = vector.load %arg2[%c0_1, %c0_2, %c0_3] : memref<9x128x128xbf16, #tpu.memory_space<vmem>>, vector<1x128x128xbf16>
    %2 = vector.shape_cast %1 : vector<1x128x128xbf16> to vector<128x128xbf16>
    %cst = arith.constant dense<0.000000e+00> : vector<112x128xf32>
    %3 = tpu.matmul %0, %2, %cst {dimension_numbers = #tpu.dot_dimension_numbers<[1], [0], [0], [1], [0, 0, 1, 1], [], []>} : vector<112x128xbf16>, vector<128x128xbf16>, vector<112x128xf32> -> vector<112x128xf32>
    %c0_4 = arith.constant 0 : index
    %c0_5 = arith.constant 0 : index
    %4 = vector.load %arg5[%c0_4, %c0_5] : memref<112x128xf32, #tpu.memory_space<vmem>>, vector<112x128xf32>
    tpu.vector_store %arg5[%c0_4, %c0_5], %3 {strides = array<i32>} : memref<112x128xf32, #tpu.memory_space<vmem>>, vector<112x128xf32>,
    %c1 = arith.constant 1 : index
    %c0_6 = arith.constant 0 : index
    %5 = vector.load %arg1[%c1, %c0_6] : memref<136x128xbf16, #tpu.memory_space<vmem>>, vector<112x128xbf16>
    %c1_7 = arith.constant 1 : index
    %c0_8 = arith.constant 0 : index
    %c0_9 = arith.constant 0 : index
    %6 = vector.load %arg2[%c1_7, %c0_8, %c0_9] : memref<9x128x128xbf16, #tpu.memory_space<vmem>>, vector<1x128x128xbf16>
    %7 = vector.shape_cast %6 : vector<1x128x128xbf16> to vector<128x128xbf16>
    %cst_10 = arith.constant dense<0.000000e+00> : vector<112x128xf32>
    %8 = tpu.matmul %5, %7, %cst_10 {dimension_numbers = #tpu.dot_dimension_numbers<[1], [0], [0], [1], [0, 0, 1, 1], [], []>} : vector<112x128xbf16>, vector<128x128xbf16>, vector<112x128xf32> -> vector<112x128xf32>
    %c0_11 = arith.constant 0 : index
    %c0_12 = arith.constant 0 : index
    %9 = vector.load %arg5[%c0_11, %c0_12] : memref<112x128xf32, #tpu.memory_space<vmem>>, vector<112x128xf32>
    %10 = arith.addf %9, %8 : vector<112x128xf32>
    %c0_13 = arith.constant 0 : index
    %c0_14 = arith.constant 0 : index
    %11 = vector.load %arg5[%c0_13, %c0_14] : memref<112x128xf32, #tpu.memory_space<vmem>>, vector<112x128xf32>
    tpu.vector_store %arg5[%c0_13, %c0_14], %10 {strides = array<i32>} : memref<112x128xf32, #tpu.memory_space<vmem>>, vector<112x128xf32>,
    %c2 = arith.constant 2 : index
    %c0_15 = arith.constant 0 : index
    %12 = vector.load %arg1[%c2, %c0_15] : memref<136x128xbf16, #tpu.memory_space<vmem>>, vector<112x128xbf16>
    %c2_16 = arith.constant 2 : index
    %c0_17 = arith.constant 0 : index
    %c0_18 = arith.constant 0 : index
    %13 = vector.load %arg2[%c2_16, %c0_17, %c0_18] : memref<9x128x128xbf16, #tpu.memory_space<vmem>>, vector<1x128x128xbf16>
    %14 = vector.shape_cast %13 : vector<1x128x128xbf16> to vector<128x128xbf16>
    %cst_19 = arith.constant dense<0.000000e+00> : vector<112x128xf32>
    %15 = tpu.matmul %12, %14, %cst_19 {dimension_numbers = #tpu.dot_dimension_numbers<[1], [0], [0], [1], [0, 0, 1, 1], [], []>} : vector<112x128xbf16>, vector<128x128xbf16>, vector<112x128xf32> -> vector<112x128xf32>
    %c0_20 = arith.constant 0 : index
    %c0_21 = arith.constant 0 : index
    %16 = vector.load %arg5[%c0_20, %c0_21] : memref<112x128xf32, #tpu.memory_space<vmem>>, vector<112x128xf32>
    %17 = arith.addf %16, %15 : vector<112x128xf32>
    %c0_22 = arith.constant 0 : index
    %c0_23 = arith.constant 0 : index
    %18 = vector.load %arg5[%c0_22, %c0_23] : memref<112x128xf32, #tpu.memory_space<vmem>>, vector<112x128xf32>
    tpu.vector_store %arg5[%c0_22, %c0_23], %17 {strides = array<i32>} : memref<112x128xf32, #tpu.memory_space<vmem>>, vector<112x128xf32>,
    %c8 = arith.constant 8 : index
    %c0_24 = arith.constant 0 : index
    %19 = vector.load %arg1[%c8, %c0_24] : memref<136x128xbf16, #tpu.memory_space<vmem>>, vector<112x128xbf16>
    %c3 = arith.constant 3 : index
    %c0_25 = arith.constant 0 : index
    %c0_26 = arith.constant 0 : index
    %20 = vector.load %arg2[%c3, %c0_25, %c0_26] : memref<9x128x128xbf16, #tpu.memory_space<vmem>>, vector<1x128x128xbf16>
    %21 = vector.shape_cast %20 : vector<1x128x128xbf16> to vector<128x128xbf16>
    %cst_27 = arith.constant dense<0.000000e+00> : vector<112x128xf32>
    %22 = tpu.matmul %19, %21, %cst_27 {dimension_numbers = #tpu.dot_dimension_numbers<[1], [0], [0], [1], [0, 0, 1, 1], [], []>} : vector<112x128xbf16>, vector<128x128xbf16>, vector<112x128xf32> -> vector<112x128xf32>
    %c0_28 = arith.constant 0 : index
    %c0_29 = arith.constant 0 : index
    %23 = vector.load %arg5[%c0_28, %c0_29] : memref<112x128xf32, #tpu.memory_space<vmem>>, vector<112x128xf32>
    %24 = arith.addf %23, %22 : vector<112x128xf32>
    %c0_30 = arith.constant 0 : index
    %c0_31 = arith.constant 0 : index
    %25 = vector.load %arg5[%c0_30, %c0_31] : memref<112x128xf32, #tpu.memory_space<vmem>>, vector<112x128xf32>
    tpu.vector_store %arg5[%c0_30, %c0_31], %24 {strides = array<i32>} : memref<112x128xf32, #tpu.memory_space<vmem>>, vector<112x128xf32>,
    %c9 = arith.constant 9 : index
    %c0_32 = arith.constant 0 : index
    %26 = vector.load %arg1[%c9, %c0_32] : memref<136x128xbf16, #tpu.memory_space<vmem>>, vector<112x128xbf16>
    %c4 = arith.constant 4 : index
    %c0_33 = arith.constant 0 : index
    %c0_34 = arith.constant 0 : index
    %27 = vector.load %arg2[%c4, %c0_33, %c0_34] : memref<9x128x128xbf16, #tpu.memory_space<vmem>>, vector<1x128x128xbf16>
    %28 = vector.shape_cast %27 : vector<1x128x128xbf16> to vector<128x128xbf16>
    %cst_35 = arith.constant dense<0.000000e+00> : vector<112x128xf32>
    %29 = tpu.matmul %26, %28, %cst_35 {dimension_numbers = #tpu.dot_dimension_numbers<[1], [0], [0], [1], [0, 0, 1, 1], [], []>} : vector<112x128xbf16>, vector<128x128xbf16>, vector<112x128xf32> -> vector<112x128xf32>
    %c0_36 = arith.constant 0 : index
    %c0_37 = arith.constant 0 : index
    %30 = vector.load %arg5[%c0_36, %c0_37] : memref<112x128xf32, #tpu.memory_space<vmem>>, vector<112x128xf32>
    %31 = arith.addf %30, %29 : vector<112x128xf32>
    %c0_38 = arith.constant 0 : index
    %c0_39 = arith.constant 0 : index
    %32 = vector.load %arg5[%c0_38, %c0_39] : memref<112x128xf32, #tpu.memory_space<vmem>>, vector<112x128xf32>
    tpu.vector_store %arg5[%c0_38, %c0_39], %31 {strides = array<i32>} : memref<112x128xf32, #tpu.memory_space<vmem>>, vector<112x128xf32>,
    %c10 = arith.constant 10 : index
    %c0_40 = arith.constant 0 : index
    %33 = vector.load %arg1[%c10, %c0_40] : memref<136x128xbf16, #tpu.memory_space<vmem>>, vector<112x128xbf16>
    %c5 = arith.constant 5 : index
    %c0_41 = arith.constant 0 : index
    %c0_42 = arith.constant 0 : index
    %34 = vector.load %arg2[%c5, %c0_41, %c0_42] : memref<9x128x128xbf16, #tpu.memory_space<vmem>>, vector<1x128x128xbf16>
    %35 = vector.shape_cast %34 : vector<1x128x128xbf16> to vector<128x128xbf16>
    %cst_43 = arith.constant dense<0.000000e+00> : vector<112x128xf32>
    %36 = tpu.matmul %33, %35, %cst_43 {dimension_numbers = #tpu.dot_dimension_numbers<[1], [0], [0], [1], [0, 0, 1, 1], [], []>} : vector<112x128xbf16>, vector<128x128xbf16>, vector<112x128xf32> -> vector<112x128xf32>
    %c0_44 = arith.constant 0 : index
    %c0_45 = arith.constant 0 : index
    %37 = vector.load %arg5[%c0_44, %c0_45] : memref<112x128xf32, #tpu.memory_space<vmem>>, vector<112x128xf32>
    %38 = arith.addf %37, %36 : vector<112x128xf32>
    %c0_46 = arith.constant 0 : index
    %c0_47 = arith.constant 0 : index
    %39 = vector.load %arg5[%c0_46, %c0_47] : memref<112x128xf32, #tpu.memory_space<vmem>>, vector<112x128xf32>
    tpu.vector_store %arg5[%c0_46, %c0_47], %38 {strides = array<i32>} : memref<112x128xf32, #tpu.memory_space<vmem>>, vector<112x128xf32>,
    %c16 = arith.constant 16 : index
    %c0_48 = arith.constant 0 : index
    %40 = vector.load %arg1[%c16, %c0_48] : memref<136x128xbf16, #tpu.memory_space<vmem>>, vector<112x128xbf16>
    %c6 = arith.constant 6 : index
    %c0_49 = arith.constant 0 : index
    %c0_50 = arith.constant 0 : index
    %41 = vector.load %arg2[%c6, %c0_49, %c0_50] : memref<9x128x128xbf16, #tpu.memory_space<vmem>>, vector<1x128x128xbf16>
    %42 = vector.shape_cast %41 : vector<1x128x128xbf16> to vector<128x128xbf16>
    %cst_51 = arith.constant dense<0.000000e+00> : vector<112x128xf32>
    %43 = tpu.matmul %40, %42, %cst_51 {dimension_numbers = #tpu.dot_dimension_numbers<[1], [0], [0], [1], [0, 0, 1, 1], [], []>} : vector<112x128xbf16>, vector<128x128xbf16>, vector<112x128xf32> -> vector<112x128xf32>
    %c0_52 = arith.constant 0 : index
    %c0_53 = arith.constant 0 : index
    %44 = vector.load %arg5[%c0_52, %c0_53] : memref<112x128xf32, #tpu.memory_space<vmem>>, vector<112x128xf32>
    %45 = arith.addf %44, %43 : vector<112x128xf32>
    %c0_54 = arith.constant 0 : index
    %c0_55 = arith.constant 0 : index
    %46 = vector.load %arg5[%c0_54, %c0_55] : memref<112x128xf32, #tpu.memory_space<vmem>>, vector<112x128xf32>
    tpu.vector_store %arg5[%c0_54, %c0_55], %45 {strides = array<i32>} : memref<112x128xf32, #tpu.memory_space<vmem>>, vector<112x128xf32>,
    %c17 = arith.constant 17 : index
    %c0_56 = arith.constant 0 : index
    %47 = vector.load %arg1[%c17, %c0_56] : memref<136x128xbf16, #tpu.memory_space<vmem>>, vector<112x128xbf16>
    %c7 = arith.constant 7 : index
    %c0_57 = arith.constant 0 : index
    %c0_58 = arith.constant 0 : index
    %48 = vector.load %arg2[%c7, %c0_57, %c0_58] : memref<9x128x128xbf16, #tpu.memory_space<vmem>>, vector<1x128x128xbf16>
    %49 = vector.shape_cast %48 : vector<1x128x128xbf16> to vector<128x128xbf16>
    %cst_59 = arith.constant dense<0.000000e+00> : vector<112x128xf32>
    %50 = tpu.matmul %47, %49, %cst_59 {dimension_numbers = #tpu.dot_dimension_numbers<[1], [0], [0], [1], [0, 0, 1, 1], [], []>} : vector<112x128xbf16>, vector<128x128xbf16>, vector<112x128xf32> -> vector<112x128xf32>
    %c0_60 = arith.constant 0 : index
    %c0_61 = arith.constant 0 : index
    %51 = vector.load %arg5[%c0_60, %c0_61] : memref<112x128xf32, #tpu.memory_space<vmem>>, vector<112x128xf32>
    %52 = arith.addf %51, %50 : vector<112x128xf32>
    %c0_62 = arith.constant 0 : index
    %c0_63 = arith.constant 0 : index
    %53 = vector.load %arg5[%c0_62, %c0_63] : memref<112x128xf32, #tpu.memory_space<vmem>>, vector<112x128xf32>
    tpu.vector_store %arg5[%c0_62, %c0_63], %52 {strides = array<i32>} : memref<112x128xf32, #tpu.memory_space<vmem>>, vector<112x128xf32>,
    %c18 = arith.constant 18 : index
    %c0_64 = arith.constant 0 : index
    %54 = vector.load %arg1[%c18, %c0_64] : memref<136x128xbf16, #tpu.memory_space<vmem>>, vector<112x128xbf16>
    %c8_65 = arith.constant 8 : index
    %c0_66 = arith.constant 0 : index
    %c0_67 = arith.constant 0 : index
    %55 = vector.load %arg2[%c8_65, %c0_66, %c0_67] : memref<9x128x128xbf16, #tpu.memory_space<vmem>>, vector<1x128x128xbf16>
    %56 = vector.shape_cast %55 : vector<1x128x128xbf16> to vector<128x128xbf16>
    %cst_68 = arith.constant dense<0.000000e+00> : vector<112x128xf32>
    %57 = tpu.matmul %54, %56, %cst_68 {dimension_numbers = #tpu.dot_dimension_numbers<[1], [0], [0], [1], [0, 0, 1, 1], [], []>} : vector<112x128xbf16>, vector<128x128xbf16>, vector<112x128xf32> -> vector<112x128xf32>
    %c0_69 = arith.constant 0 : index
    %c0_70 = arith.constant 0 : index
    %58 = vector.load %arg5[%c0_69, %c0_70] : memref<112x128xf32, #tpu.memory_space<vmem>>, vector<112x128xf32>
    %59 = arith.addf %58, %57 : vector<112x128xf32>
    %c0_71 = arith.constant 0 : index
    %c0_72 = arith.constant 0 : index
    %60 = vector.load %arg5[%c0_71, %c0_72] : memref<112x128xf32, #tpu.memory_space<vmem>>, vector<112x128xf32>
    tpu.vector_store %arg5[%c0_71, %c0_72], %59 {strides = array<i32>} : memref<112x128xf32, #tpu.memory_space<vmem>>, vector<112x128xf32>,
    %c0_73 = arith.constant 0 : index
    %c0_74 = arith.constant 0 : index
    %61 = vector.load %arg3[%c0_73, %c0_74] : memref<112x1xf32, #tpu.memory_space<vmem>>, vector<112x1xf32>
    %c0_75 = arith.constant 0 : index
    %c0_76 = arith.constant 0 : index
    %62 = vector.load %arg5[%c0_75, %c0_76] : memref<112x128xf32, #tpu.memory_space<vmem>>, vector<112x128xf32>
    %63 = vector.broadcast %61 : vector<112x1xf32> to vector<112x128xf32>
    %64 = arith.mulf %62, %63 : vector<112x128xf32>
    %cst_77 = arith.constant dense<0.000000e+00> : vector<128xf32>
    %65 = vector.multi_reduction <add>, %64, %cst_77 [0] : vector<112x128xf32> to vector<128xf32>
    %66 = vector.shape_cast %65 : vector<128xf32> to vector<1x128xf32>
    %cst_78 = arith.constant 3.125000e-02 : f32
    %67 = vector.broadcast %cst_78 : f32 to vector<1x128xf32>
    %68 = arith.mulf %66, %67 : vector<1x128xf32>
    %69 = vector.broadcast %68 : vector<1x128xf32> to vector<112x128xf32>
    %70 = arith.subf %62, %69 : vector<112x128xf32>
    %71 = arith.mulf %70, %70 : vector<112x128xf32>
    %72 = vector.broadcast %61 : vector<112x1xf32> to vector<112x128xf32>
    %73 = arith.mulf %71, %72 : vector<112x128xf32>
    %cst_79 = arith.constant dense<0.000000e+00> : vector<128xf32>
    %74 = vector.multi_reduction <add>, %73, %cst_79 [0] : vector<112x128xf32> to vector<128xf32>
    %75 = vector.shape_cast %74 : vector<128xf32> to vector<1x128xf32>
    %cst_80 = arith.constant 3.125000e-02 : f32
    %76 = vector.broadcast %cst_80 : f32 to vector<1x128xf32>
    %77 = arith.mulf %75, %76 : vector<1x128xf32>
    %cst_81 = arith.constant 9.99999974E-6 : f32
    %78 = vector.broadcast %cst_81 : f32 to vector<1x128xf32>
    %79 = arith.addf %77, %78 : vector<1x128xf32>
    %80 = math.rsqrt %79 : vector<1x128xf32>
    %81 = vector.broadcast %80 : vector<1x128xf32> to vector<112x128xf32>
    %82 = arith.mulf %70, %81 : vector<112x128xf32>
    %cst_82 = arith.constant 0.000000e+00 : f32
    %83 = vector.broadcast %cst_82 : f32 to vector<112x128xf32>
    %84 = arith.maximumf %82, %83 : vector<112x128xf32>
    %85 = arith.truncf %84 : vector<112x128xf32> to vector<112x128xbf16>
    %c0_83 = arith.constant 0 : index
    %c0_84 = arith.constant 0 : index
    %86 = vector.load %arg4[%c0_83, %c0_84] : memref<112x128xbf16, #tpu.memory_space<vmem>>, vector<112x128xbf16>
    tpu.vector_store %arg4[%c0_83, %c0_84], %85 {strides = array<i32>} : memref<112x128xbf16, #tpu.memory_space<vmem>>, vector<112x128xbf16>,
    return
  }
  func.func @transform_0(%arg0: i32) -> (i32, i32) {
    %c0_i32 = arith.constant 0 : i32
    %c0_i32_0 = arith.constant 0 : i32
    %c0_i32_1 = arith.constant 0 : i32
    return %c0_i32, %c0_i32_0 : i32, i32
  }
  func.func @transform_1(%arg0: i32) -> (i32, i32, i32) {
    %c0_i32 = arith.constant 0 : i32
    %c0_i32_0 = arith.constant 0 : i32
    %c0_i32_1 = arith.constant 0 : i32
    return %c0_i32, %c0_i32_0, %arg0 : i32, i32, i32
  }
  func.func @transform_2(%arg0: i32) -> (i32, i32) {
    %c0_i32 = arith.constant 0 : i32
    %c0_i32_0 = arith.constant 0 : i32
    %c0_i32_1 = arith.constant 0 : i32
    return %c0_i32, %c0_i32_0 : i32, i32
  }
  func.func @transform_3(%arg0: i32) -> (i32, i32) {
    %c0_i32 = arith.constant 0 : i32
    %c0_i32_0 = arith.constant 0 : i32
    return %c0_i32, %arg0 : i32, i32
  }
}

module attributes {stable_mosaic.version = 11 : i64} {
  func.func @_gemm_bn_kernel(%arg0: i32, %arg1: memref<8x1152xbf16, #tpu.memory_space<vmem>>, %arg2: memref<1152x128xbf16, #tpu.memory_space<vmem>>, %arg3: memref<1x128xf32, #tpu.memory_space<vmem>>, %arg4: memref<8x128xbf16, #tpu.memory_space<vmem>>) attributes {dimension_semantics = [#tpu.dimension_semantics<parallel>], iteration_bounds = array<i64: 2>, scalar_prefetch = 0 : i64, scratch_operands = 0 : i64, tpu.core_type = #tpu.core_type<tc>, window_params = [{pipeline_mode = #tpu.pipeline_mode<synchronous>, transform_indices = @transform_0, window_bounds = array<i64: 8, 1152>}, {transform_indices = @transform_1, window_bounds = array<i64: 1152, 128>}, {transform_indices = @transform_2, window_bounds = array<i64: 1, 128>}, {transform_indices = @transform_3, window_bounds = array<i64: 8, 128>}]} {
    %c0 = arith.constant 0 : index
    %c0_0 = arith.constant 0 : index
    %0 = vector.load %arg1[%c0, %c0_0] : memref<8x1152xbf16, #tpu.memory_space<vmem>>, vector<8x1152xbf16>
    %c0_1 = arith.constant 0 : index
    %c0_2 = arith.constant 0 : index
    %1 = vector.load %arg2[%c0_1, %c0_2] : memref<1152x128xbf16, #tpu.memory_space<vmem>>, vector<1152x128xbf16>
    %cst = arith.constant dense<0.000000e+00> : vector<8x128xf32>
    %2 = tpu.matmul %0, %1, %cst {dimension_numbers = #tpu.dot_dimension_numbers<[1], [0], [0], [1], [0, 0, 1, 1], [], []>} : vector<8x1152xbf16>, vector<1152x128xbf16>, vector<8x128xf32> -> vector<8x128xf32>
    %c0_3 = arith.constant 0 : index
    %c0_4 = arith.constant 0 : index
    %3 = vector.load %arg3[%c0_3, %c0_4] : memref<1x128xf32, #tpu.memory_space<vmem>>, vector<1x128xf32>
    %4 = vector.broadcast %3 : vector<1x128xf32> to vector<8x128xf32>
    %5 = arith.addf %2, %4 : vector<8x128xf32>
    %cst_5 = arith.constant dense<0.000000e+00> : vector<128xf32>
    %6 = vector.multi_reduction <add>, %5, %cst_5 [0] : vector<8x128xf32> to vector<128xf32>
    %7 = vector.shape_cast %6 : vector<128xf32> to vector<1x128xf32>
    %cst_6 = arith.constant 1.250000e-01 : f32
    %8 = vector.broadcast %cst_6 : f32 to vector<1x128xf32>
    %9 = arith.mulf %7, %8 : vector<1x128xf32>
    %10 = vector.broadcast %9 : vector<1x128xf32> to vector<8x128xf32>
    %11 = arith.subf %5, %10 : vector<8x128xf32>
    %12 = arith.mulf %11, %11 : vector<8x128xf32>
    %cst_7 = arith.constant dense<0.000000e+00> : vector<128xf32>
    %13 = vector.multi_reduction <add>, %12, %cst_7 [0] : vector<8x128xf32> to vector<128xf32>
    %14 = vector.shape_cast %13 : vector<128xf32> to vector<1x128xf32>
    %cst_8 = arith.constant 1.250000e-01 : f32
    %15 = vector.broadcast %cst_8 : f32 to vector<1x128xf32>
    %16 = arith.mulf %14, %15 : vector<1x128xf32>
    %cst_9 = arith.constant 9.99999974E-6 : f32
    %17 = vector.broadcast %cst_9 : f32 to vector<1x128xf32>
    %18 = arith.addf %16, %17 : vector<1x128xf32>
    %19 = math.rsqrt %18 : vector<1x128xf32>
    %20 = vector.broadcast %19 : vector<1x128xf32> to vector<8x128xf32>
    %21 = arith.mulf %11, %20 : vector<8x128xf32>
    %cst_10 = arith.constant 0.000000e+00 : f32
    %22 = vector.broadcast %cst_10 : f32 to vector<8x128xf32>
    %23 = arith.maximumf %21, %22 : vector<8x128xf32>
    %24 = arith.truncf %23 : vector<8x128xf32> to vector<8x128xbf16>
    %c0_11 = arith.constant 0 : index
    %c0_12 = arith.constant 0 : index
    %25 = vector.load %arg4[%c0_11, %c0_12] : memref<8x128xbf16, #tpu.memory_space<vmem>>, vector<8x128xbf16>
    tpu.vector_store %arg4[%c0_11, %c0_12], %24 {strides = array<i32>} : memref<8x128xbf16, #tpu.memory_space<vmem>>, vector<8x128xbf16>,
    return
  }
  func.func @transform_0(%arg0: i32) -> (i32, i32) {
    %c0_i32 = arith.constant 0 : i32
    %c0_i32_0 = arith.constant 0 : i32
    %c0_i32_1 = arith.constant 0 : i32
    return %c0_i32, %c0_i32_0 : i32, i32
  }
  func.func @transform_1(%arg0: i32) -> (i32, i32) {
    %c0_i32 = arith.constant 0 : i32
    %c0_i32_0 = arith.constant 0 : i32
    return %c0_i32, %arg0 : i32, i32
  }
  func.func @transform_2(%arg0: i32) -> (i32, i32) {
    %c0_i32 = arith.constant 0 : i32
    %c0_i32_0 = arith.constant 0 : i32
    return %c0_i32, %arg0 : i32, i32
  }
  func.func @transform_3(%arg0: i32) -> (i32, i32) {
    %c0_i32 = arith.constant 0 : i32
    %c0_i32_0 = arith.constant 0 : i32
    return %c0_i32, %arg0 : i32, i32
  }
}

module attributes {stable_mosaic.version = 11 : i64} {
  func.func @_gemm_bn_kernel(%arg0: i32, %arg1: memref<8x128xbf16, #tpu.memory_space<vmem>>, %arg2: memref<128x128xbf16, #tpu.memory_space<vmem>>, %arg3: memref<1x128xf32, #tpu.memory_space<vmem>>, %arg4: memref<8x128xbf16, #tpu.memory_space<vmem>>) attributes {dimension_semantics = [#tpu.dimension_semantics<parallel>], iteration_bounds = array<i64: 2>, scalar_prefetch = 0 : i64, scratch_operands = 0 : i64, tpu.core_type = #tpu.core_type<tc>, window_params = [{pipeline_mode = #tpu.pipeline_mode<synchronous>, transform_indices = @transform_0, window_bounds = array<i64: 8, 128>}, {transform_indices = @transform_1, window_bounds = array<i64: 128, 128>}, {transform_indices = @transform_2, window_bounds = array<i64: 1, 128>}, {transform_indices = @transform_3, window_bounds = array<i64: 8, 128>}]} {
    %c0 = arith.constant 0 : index
    %c0_0 = arith.constant 0 : index
    %0 = vector.load %arg1[%c0, %c0_0] : memref<8x128xbf16, #tpu.memory_space<vmem>>, vector<8x128xbf16>
    %c0_1 = arith.constant 0 : index
    %c0_2 = arith.constant 0 : index
    %1 = vector.load %arg2[%c0_1, %c0_2] : memref<128x128xbf16, #tpu.memory_space<vmem>>, vector<128x128xbf16>
    %cst = arith.constant dense<0.000000e+00> : vector<8x128xf32>
    %2 = tpu.matmul %0, %1, %cst {dimension_numbers = #tpu.dot_dimension_numbers<[1], [0], [0], [1], [0, 0, 1, 1], [], []>} : vector<8x128xbf16>, vector<128x128xbf16>, vector<8x128xf32> -> vector<8x128xf32>
    %c0_3 = arith.constant 0 : index
    %c0_4 = arith.constant 0 : index
    %3 = vector.load %arg3[%c0_3, %c0_4] : memref<1x128xf32, #tpu.memory_space<vmem>>, vector<1x128xf32>
    %4 = vector.broadcast %3 : vector<1x128xf32> to vector<8x128xf32>
    %5 = arith.addf %2, %4 : vector<8x128xf32>
    %cst_5 = arith.constant dense<0.000000e+00> : vector<128xf32>
    %6 = vector.multi_reduction <add>, %5, %cst_5 [0] : vector<8x128xf32> to vector<128xf32>
    %7 = vector.shape_cast %6 : vector<128xf32> to vector<1x128xf32>
    %cst_6 = arith.constant 1.250000e-01 : f32
    %8 = vector.broadcast %cst_6 : f32 to vector<1x128xf32>
    %9 = arith.mulf %7, %8 : vector<1x128xf32>
    %10 = vector.broadcast %9 : vector<1x128xf32> to vector<8x128xf32>
    %11 = arith.subf %5, %10 : vector<8x128xf32>
    %12 = arith.mulf %11, %11 : vector<8x128xf32>
    %cst_7 = arith.constant dense<0.000000e+00> : vector<128xf32>
    %13 = vector.multi_reduction <add>, %12, %cst_7 [0] : vector<8x128xf32> to vector<128xf32>
    %14 = vector.shape_cast %13 : vector<128xf32> to vector<1x128xf32>
    %cst_8 = arith.constant 1.250000e-01 : f32
    %15 = vector.broadcast %cst_8 : f32 to vector<1x128xf32>
    %16 = arith.mulf %14, %15 : vector<1x128xf32>
    %cst_9 = arith.constant 9.99999974E-6 : f32
    %17 = vector.broadcast %cst_9 : f32 to vector<1x128xf32>
    %18 = arith.addf %16, %17 : vector<1x128xf32>
    %19 = math.rsqrt %18 : vector<1x128xf32>
    %20 = vector.broadcast %19 : vector<1x128xf32> to vector<8x128xf32>
    %21 = arith.mulf %11, %20 : vector<8x128xf32>
    %22 = arith.truncf %21 : vector<8x128xf32> to vector<8x128xbf16>
    %c0_10 = arith.constant 0 : index
    %c0_11 = arith.constant 0 : index
    %23 = vector.load %arg4[%c0_10, %c0_11] : memref<8x128xbf16, #tpu.memory_space<vmem>>, vector<8x128xbf16>
    tpu.vector_store %arg4[%c0_10, %c0_11], %22 {strides = array<i32>} : memref<8x128xbf16, #tpu.memory_space<vmem>>, vector<8x128xbf16>,
    return
  }
  func.func @transform_0(%arg0: i32) -> (i32, i32) {
    %c0_i32 = arith.constant 0 : i32
    %c0_i32_0 = arith.constant 0 : i32
    %c0_i32_1 = arith.constant 0 : i32
    return %c0_i32, %c0_i32_0 : i32, i32
  }
  func.func @transform_1(%arg0: i32) -> (i32, i32) {
    %c0_i32 = arith.constant 0 : i32
    %c0_i32_0 = arith.constant 0 : i32
    return %c0_i32, %arg0 : i32, i32
  }
  func.func @transform_2(%arg0: i32) -> (i32, i32) {
    %c0_i32 = arith.constant 0 : i32
    %c0_i32_0 = arith.constant 0 : i32
    return %c0_i32, %arg0 : i32, i32
  }
  func.func @transform_3(%arg0: i32) -> (i32, i32) {
    %c0_i32 = arith.constant 0 : i32
    %c0_i32_0 = arith.constant 0 : i32
    return %c0_i32, %arg0 : i32, i32
  }
}

module attributes {stable_mosaic.version = 11 : i64} {
  func.func @_conv3x3s1_bn_kernel(%arg0: i32, %arg1: memref<104x256xbf16, #tpu.memory_space<vmem>>, %arg2: memref<9x256x128xbf16, #tpu.memory_space<vmem>>, %arg3: memref<80x1xf32, #tpu.memory_space<vmem>>, %arg4: memref<80x128xbf16, #tpu.memory_space<vmem>>, %arg5: memref<80x128xbf16, #tpu.memory_space<vmem>>, %arg6: memref<80x128xf32, #tpu.memory_space<vmem>>) attributes {dimension_semantics = [#tpu.dimension_semantics<parallel>], iteration_bounds = array<i64: 2>, scalar_prefetch = 0 : i64, scratch_operands = 1 : i64, tpu.core_type = #tpu.core_type<tc>, window_params = [{pipeline_mode = #tpu.pipeline_mode<synchronous>, transform_indices = @transform_0, window_bounds = array<i64: 104, 256>}, {transform_indices = @transform_1, window_bounds = array<i64: 9, 256, 128>}, {pipeline_mode = #tpu.pipeline_mode<synchronous>, transform_indices = @transform_2, window_bounds = array<i64: 80, 1>}, {transform_indices = @transform_3, window_bounds = array<i64: 80, 128>}, {transform_indices = @transform_4, window_bounds = array<i64: 80, 128>}]} {
    %c0 = arith.constant 0 : index
    %c0_0 = arith.constant 0 : index
    %0 = vector.load %arg1[%c0, %c0_0] : memref<104x256xbf16, #tpu.memory_space<vmem>>, vector<80x256xbf16>
    %c0_1 = arith.constant 0 : index
    %c0_2 = arith.constant 0 : index
    %c0_3 = arith.constant 0 : index
    %1 = vector.load %arg2[%c0_1, %c0_2, %c0_3] : memref<9x256x128xbf16, #tpu.memory_space<vmem>>, vector<1x256x128xbf16>
    %2 = vector.shape_cast %1 : vector<1x256x128xbf16> to vector<256x128xbf16>
    %cst = arith.constant dense<0.000000e+00> : vector<80x128xf32>
    %3 = tpu.matmul %0, %2, %cst {dimension_numbers = #tpu.dot_dimension_numbers<[1], [0], [0], [1], [0, 0, 1, 1], [], []>} : vector<80x256xbf16>, vector<256x128xbf16>, vector<80x128xf32> -> vector<80x128xf32>
    %c0_4 = arith.constant 0 : index
    %c0_5 = arith.constant 0 : index
    %4 = vector.load %arg6[%c0_4, %c0_5] : memref<80x128xf32, #tpu.memory_space<vmem>>, vector<80x128xf32>
    tpu.vector_store %arg6[%c0_4, %c0_5], %3 {strides = array<i32>} : memref<80x128xf32, #tpu.memory_space<vmem>>, vector<80x128xf32>,
    %c1 = arith.constant 1 : index
    %c0_6 = arith.constant 0 : index
    %5 = vector.load %arg1[%c1, %c0_6] : memref<104x256xbf16, #tpu.memory_space<vmem>>, vector<80x256xbf16>
    %c1_7 = arith.constant 1 : index
    %c0_8 = arith.constant 0 : index
    %c0_9 = arith.constant 0 : index
    %6 = vector.load %arg2[%c1_7, %c0_8, %c0_9] : memref<9x256x128xbf16, #tpu.memory_space<vmem>>, vector<1x256x128xbf16>
    %7 = vector.shape_cast %6 : vector<1x256x128xbf16> to vector<256x128xbf16>
    %cst_10 = arith.constant dense<0.000000e+00> : vector<80x128xf32>
    %8 = tpu.matmul %5, %7, %cst_10 {dimension_numbers = #tpu.dot_dimension_numbers<[1], [0], [0], [1], [0, 0, 1, 1], [], []>} : vector<80x256xbf16>, vector<256x128xbf16>, vector<80x128xf32> -> vector<80x128xf32>
    %c0_11 = arith.constant 0 : index
    %c0_12 = arith.constant 0 : index
    %9 = vector.load %arg6[%c0_11, %c0_12] : memref<80x128xf32, #tpu.memory_space<vmem>>, vector<80x128xf32>
    %10 = arith.addf %9, %8 : vector<80x128xf32>
    %c0_13 = arith.constant 0 : index
    %c0_14 = arith.constant 0 : index
    %11 = vector.load %arg6[%c0_13, %c0_14] : memref<80x128xf32, #tpu.memory_space<vmem>>, vector<80x128xf32>
    tpu.vector_store %arg6[%c0_13, %c0_14], %10 {strides = array<i32>} : memref<80x128xf32, #tpu.memory_space<vmem>>, vector<80x128xf32>,
    %c2 = arith.constant 2 : index
    %c0_15 = arith.constant 0 : index
    %12 = vector.load %arg1[%c2, %c0_15] : memref<104x256xbf16, #tpu.memory_space<vmem>>, vector<80x256xbf16>
    %c2_16 = arith.constant 2 : index
    %c0_17 = arith.constant 0 : index
    %c0_18 = arith.constant 0 : index
    %13 = vector.load %arg2[%c2_16, %c0_17, %c0_18] : memref<9x256x128xbf16, #tpu.memory_space<vmem>>, vector<1x256x128xbf16>
    %14 = vector.shape_cast %13 : vector<1x256x128xbf16> to vector<256x128xbf16>
    %cst_19 = arith.constant dense<0.000000e+00> : vector<80x128xf32>
    %15 = tpu.matmul %12, %14, %cst_19 {dimension_numbers = #tpu.dot_dimension_numbers<[1], [0], [0], [1], [0, 0, 1, 1], [], []>} : vector<80x256xbf16>, vector<256x128xbf16>, vector<80x128xf32> -> vector<80x128xf32>
    %c0_20 = arith.constant 0 : index
    %c0_21 = arith.constant 0 : index
    %16 = vector.load %arg6[%c0_20, %c0_21] : memref<80x128xf32, #tpu.memory_space<vmem>>, vector<80x128xf32>
    %17 = arith.addf %16, %15 : vector<80x128xf32>
    %c0_22 = arith.constant 0 : index
    %c0_23 = arith.constant 0 : index
    %18 = vector.load %arg6[%c0_22, %c0_23] : memref<80x128xf32, #tpu.memory_space<vmem>>, vector<80x128xf32>
    tpu.vector_store %arg6[%c0_22, %c0_23], %17 {strides = array<i32>} : memref<80x128xf32, #tpu.memory_space<vmem>>, vector<80x128xf32>,
    %c8 = arith.constant 8 : index
    %c0_24 = arith.constant 0 : index
    %19 = vector.load %arg1[%c8, %c0_24] : memref<104x256xbf16, #tpu.memory_space<vmem>>, vector<80x256xbf16>
    %c3 = arith.constant 3 : index
    %c0_25 = arith.constant 0 : index
    %c0_26 = arith.constant 0 : index
    %20 = vector.load %arg2[%c3, %c0_25, %c0_26] : memref<9x256x128xbf16, #tpu.memory_space<vmem>>, vector<1x256x128xbf16>
    %21 = vector.shape_cast %20 : vector<1x256x128xbf16> to vector<256x128xbf16>
    %cst_27 = arith.constant dense<0.000000e+00> : vector<80x128xf32>
    %22 = tpu.matmul %19, %21, %cst_27 {dimension_numbers = #tpu.dot_dimension_numbers<[1], [0], [0], [1], [0, 0, 1, 1], [], []>} : vector<80x256xbf16>, vector<256x128xbf16>, vector<80x128xf32> -> vector<80x128xf32>
    %c0_28 = arith.constant 0 : index
    %c0_29 = arith.constant 0 : index
    %23 = vector.load %arg6[%c0_28, %c0_29] : memref<80x128xf32, #tpu.memory_space<vmem>>, vector<80x128xf32>
    %24 = arith.addf %23, %22 : vector<80x128xf32>
    %c0_30 = arith.constant 0 : index
    %c0_31 = arith.constant 0 : index
    %25 = vector.load %arg6[%c0_30, %c0_31] : memref<80x128xf32, #tpu.memory_space<vmem>>, vector<80x128xf32>
    tpu.vector_store %arg6[%c0_30, %c0_31], %24 {strides = array<i32>} : memref<80x128xf32, #tpu.memory_space<vmem>>, vector<80x128xf32>,
    %c9 = arith.constant 9 : index
    %c0_32 = arith.constant 0 : index
    %26 = vector.load %arg1[%c9, %c0_32] : memref<104x256xbf16, #tpu.memory_space<vmem>>, vector<80x256xbf16>
    %c4 = arith.constant 4 : index
    %c0_33 = arith.constant 0 : index
    %c0_34 = arith.constant 0 : index
    %27 = vector.load %arg2[%c4, %c0_33, %c0_34] : memref<9x256x128xbf16, #tpu.memory_space<vmem>>, vector<1x256x128xbf16>
    %28 = vector.shape_cast %27 : vector<1x256x128xbf16> to vector<256x128xbf16>
    %cst_35 = arith.constant dense<0.000000e+00> : vector<80x128xf32>
    %29 = tpu.matmul %26, %28, %cst_35 {dimension_numbers = #tpu.dot_dimension_numbers<[1], [0], [0], [1], [0, 0, 1, 1], [], []>} : vector<80x256xbf16>, vector<256x128xbf16>, vector<80x128xf32> -> vector<80x128xf32>
    %c0_36 = arith.constant 0 : index
    %c0_37 = arith.constant 0 : index
    %30 = vector.load %arg6[%c0_36, %c0_37] : memref<80x128xf32, #tpu.memory_space<vmem>>, vector<80x128xf32>
    %31 = arith.addf %30, %29 : vector<80x128xf32>
    %c0_38 = arith.constant 0 : index
    %c0_39 = arith.constant 0 : index
    %32 = vector.load %arg6[%c0_38, %c0_39] : memref<80x128xf32, #tpu.memory_space<vmem>>, vector<80x128xf32>
    tpu.vector_store %arg6[%c0_38, %c0_39], %31 {strides = array<i32>} : memref<80x128xf32, #tpu.memory_space<vmem>>, vector<80x128xf32>,
    %c10 = arith.constant 10 : index
    %c0_40 = arith.constant 0 : index
    %33 = vector.load %arg1[%c10, %c0_40] : memref<104x256xbf16, #tpu.memory_space<vmem>>, vector<80x256xbf16>
    %c5 = arith.constant 5 : index
    %c0_41 = arith.constant 0 : index
    %c0_42 = arith.constant 0 : index
    %34 = vector.load %arg2[%c5, %c0_41, %c0_42] : memref<9x256x128xbf16, #tpu.memory_space<vmem>>, vector<1x256x128xbf16>
    %35 = vector.shape_cast %34 : vector<1x256x128xbf16> to vector<256x128xbf16>
    %cst_43 = arith.constant dense<0.000000e+00> : vector<80x128xf32>
    %36 = tpu.matmul %33, %35, %cst_43 {dimension_numbers = #tpu.dot_dimension_numbers<[1], [0], [0], [1], [0, 0, 1, 1], [], []>} : vector<80x256xbf16>, vector<256x128xbf16>, vector<80x128xf32> -> vector<80x128xf32>
    %c0_44 = arith.constant 0 : index
    %c0_45 = arith.constant 0 : index
    %37 = vector.load %arg6[%c0_44, %c0_45] : memref<80x128xf32, #tpu.memory_space<vmem>>, vector<80x128xf32>
    %38 = arith.addf %37, %36 : vector<80x128xf32>
    %c0_46 = arith.constant 0 : index
    %c0_47 = arith.constant 0 : index
    %39 = vector.load %arg6[%c0_46, %c0_47] : memref<80x128xf32, #tpu.memory_space<vmem>>, vector<80x128xf32>
    tpu.vector_store %arg6[%c0_46, %c0_47], %38 {strides = array<i32>} : memref<80x128xf32, #tpu.memory_space<vmem>>, vector<80x128xf32>,
    %c16 = arith.constant 16 : index
    %c0_48 = arith.constant 0 : index
    %40 = vector.load %arg1[%c16, %c0_48] : memref<104x256xbf16, #tpu.memory_space<vmem>>, vector<80x256xbf16>
    %c6 = arith.constant 6 : index
    %c0_49 = arith.constant 0 : index
    %c0_50 = arith.constant 0 : index
    %41 = vector.load %arg2[%c6, %c0_49, %c0_50] : memref<9x256x128xbf16, #tpu.memory_space<vmem>>, vector<1x256x128xbf16>
    %42 = vector.shape_cast %41 : vector<1x256x128xbf16> to vector<256x128xbf16>
    %cst_51 = arith.constant dense<0.000000e+00> : vector<80x128xf32>
    %43 = tpu.matmul %40, %42, %cst_51 {dimension_numbers = #tpu.dot_dimension_numbers<[1], [0], [0], [1], [0, 0, 1, 1], [], []>} : vector<80x256xbf16>, vector<256x128xbf16>, vector<80x128xf32> -> vector<80x128xf32>
    %c0_52 = arith.constant 0 : index
    %c0_53 = arith.constant 0 : index
    %44 = vector.load %arg6[%c0_52, %c0_53] : memref<80x128xf32, #tpu.memory_space<vmem>>, vector<80x128xf32>
    %45 = arith.addf %44, %43 : vector<80x128xf32>
    %c0_54 = arith.constant 0 : index
    %c0_55 = arith.constant 0 : index
    %46 = vector.load %arg6[%c0_54, %c0_55] : memref<80x128xf32, #tpu.memory_space<vmem>>, vector<80x128xf32>
    tpu.vector_store %arg6[%c0_54, %c0_55], %45 {strides = array<i32>} : memref<80x128xf32, #tpu.memory_space<vmem>>, vector<80x128xf32>,
    %c17 = arith.constant 17 : index
    %c0_56 = arith.constant 0 : index
    %47 = vector.load %arg1[%c17, %c0_56] : memref<104x256xbf16, #tpu.memory_space<vmem>>, vector<80x256xbf16>
    %c7 = arith.constant 7 : index
    %c0_57 = arith.constant 0 : index
    %c0_58 = arith.constant 0 : index
    %48 = vector.load %arg2[%c7, %c0_57, %c0_58] : memref<9x256x128xbf16, #tpu.memory_space<vmem>>, vector<1x256x128xbf16>
    %49 = vector.shape_cast %48 : vector<1x256x128xbf16> to vector<256x128xbf16>
    %cst_59 = arith.constant dense<0.000000e+00> : vector<80x128xf32>
    %50 = tpu.matmul %47, %49, %cst_59 {dimension_numbers = #tpu.dot_dimension_numbers<[1], [0], [0], [1], [0, 0, 1, 1], [], []>} : vector<80x256xbf16>, vector<256x128xbf16>, vector<80x128xf32> -> vector<80x128xf32>
    %c0_60 = arith.constant 0 : index
    %c0_61 = arith.constant 0 : index
    %51 = vector.load %arg6[%c0_60, %c0_61] : memref<80x128xf32, #tpu.memory_space<vmem>>, vector<80x128xf32>
    %52 = arith.addf %51, %50 : vector<80x128xf32>
    %c0_62 = arith.constant 0 : index
    %c0_63 = arith.constant 0 : index
    %53 = vector.load %arg6[%c0_62, %c0_63] : memref<80x128xf32, #tpu.memory_space<vmem>>, vector<80x128xf32>
    tpu.vector_store %arg6[%c0_62, %c0_63], %52 {strides = array<i32>} : memref<80x128xf32, #tpu.memory_space<vmem>>, vector<80x128xf32>,
    %c18 = arith.constant 18 : index
    %c0_64 = arith.constant 0 : index
    %54 = vector.load %arg1[%c18, %c0_64] : memref<104x256xbf16, #tpu.memory_space<vmem>>, vector<80x256xbf16>
    %c8_65 = arith.constant 8 : index
    %c0_66 = arith.constant 0 : index
    %c0_67 = arith.constant 0 : index
    %55 = vector.load %arg2[%c8_65, %c0_66, %c0_67] : memref<9x256x128xbf16, #tpu.memory_space<vmem>>, vector<1x256x128xbf16>
    %56 = vector.shape_cast %55 : vector<1x256x128xbf16> to vector<256x128xbf16>
    %cst_68 = arith.constant dense<0.000000e+00> : vector<80x128xf32>
    %57 = tpu.matmul %54, %56, %cst_68 {dimension_numbers = #tpu.dot_dimension_numbers<[1], [0], [0], [1], [0, 0, 1, 1], [], []>} : vector<80x256xbf16>, vector<256x128xbf16>, vector<80x128xf32> -> vector<80x128xf32>
    %c0_69 = arith.constant 0 : index
    %c0_70 = arith.constant 0 : index
    %58 = vector.load %arg6[%c0_69, %c0_70] : memref<80x128xf32, #tpu.memory_space<vmem>>, vector<80x128xf32>
    %59 = arith.addf %58, %57 : vector<80x128xf32>
    %c0_71 = arith.constant 0 : index
    %c0_72 = arith.constant 0 : index
    %60 = vector.load %arg6[%c0_71, %c0_72] : memref<80x128xf32, #tpu.memory_space<vmem>>, vector<80x128xf32>
    tpu.vector_store %arg6[%c0_71, %c0_72], %59 {strides = array<i32>} : memref<80x128xf32, #tpu.memory_space<vmem>>, vector<80x128xf32>,
    %c0_73 = arith.constant 0 : index
    %c0_74 = arith.constant 0 : index
    %61 = vector.load %arg3[%c0_73, %c0_74] : memref<80x1xf32, #tpu.memory_space<vmem>>, vector<80x1xf32>
    %c0_75 = arith.constant 0 : index
    %c0_76 = arith.constant 0 : index
    %62 = vector.load %arg6[%c0_75, %c0_76] : memref<80x128xf32, #tpu.memory_space<vmem>>, vector<80x128xf32>
    %63 = vector.broadcast %61 : vector<80x1xf32> to vector<80x128xf32>
    %64 = arith.mulf %62, %63 : vector<80x128xf32>
    %cst_77 = arith.constant dense<0.000000e+00> : vector<128xf32>
    %65 = vector.multi_reduction <add>, %64, %cst_77 [0] : vector<80x128xf32> to vector<128xf32>
    %66 = vector.shape_cast %65 : vector<128xf32> to vector<1x128xf32>
    %cst_78 = arith.constant 1.250000e-01 : f32
    %67 = vector.broadcast %cst_78 : f32 to vector<1x128xf32>
    %68 = arith.mulf %66, %67 : vector<1x128xf32>
    %69 = vector.broadcast %68 : vector<1x128xf32> to vector<80x128xf32>
    %70 = arith.subf %62, %69 : vector<80x128xf32>
    %71 = arith.mulf %70, %70 : vector<80x128xf32>
    %72 = vector.broadcast %61 : vector<80x1xf32> to vector<80x128xf32>
    %73 = arith.mulf %71, %72 : vector<80x128xf32>
    %cst_79 = arith.constant dense<0.000000e+00> : vector<128xf32>
    %74 = vector.multi_reduction <add>, %73, %cst_79 [0] : vector<80x128xf32> to vector<128xf32>
    %75 = vector.shape_cast %74 : vector<128xf32> to vector<1x128xf32>
    %cst_80 = arith.constant 1.250000e-01 : f32
    %76 = vector.broadcast %cst_80 : f32 to vector<1x128xf32>
    %77 = arith.mulf %75, %76 : vector<1x128xf32>
    %cst_81 = arith.constant 9.99999974E-6 : f32
    %78 = vector.broadcast %cst_81 : f32 to vector<1x128xf32>
    %79 = arith.addf %77, %78 : vector<1x128xf32>
    %80 = math.rsqrt %79 : vector<1x128xf32>
    %81 = vector.broadcast %80 : vector<1x128xf32> to vector<80x128xf32>
    %82 = arith.mulf %70, %81 : vector<80x128xf32>
    %c0_82 = arith.constant 0 : index
    %c0_83 = arith.constant 0 : index
    %83 = vector.load %arg4[%c0_82, %c0_83] : memref<80x128xbf16, #tpu.memory_space<vmem>>, vector<80x128xbf16>
    %84 = arith.extf %83 : vector<80x128xbf16> to vector<80x128xf32>
    %85 = arith.addf %82, %84 : vector<80x128xf32>
    %cst_84 = arith.constant 0.000000e+00 : f32
    %86 = vector.broadcast %cst_84 : f32 to vector<80x128xf32>
    %87 = arith.maximumf %85, %86 : vector<80x128xf32>
    %88 = arith.truncf %87 : vector<80x128xf32> to vector<80x128xbf16>
    %c0_85 = arith.constant 0 : index
    %c0_86 = arith.constant 0 : index
    %89 = vector.load %arg5[%c0_85, %c0_86] : memref<80x128xbf16, #tpu.memory_space<vmem>>, vector<80x128xbf16>
    tpu.vector_store %arg5[%c0_85, %c0_86], %88 {strides = array<i32>} : memref<80x128xbf16, #tpu.memory_space<vmem>>, vector<80x128xbf16>,
    return
  }
  func.func @transform_0(%arg0: i32) -> (i32, i32) {
    %c0_i32 = arith.constant 0 : i32
    %c0_i32_0 = arith.constant 0 : i32
    %c0_i32_1 = arith.constant 0 : i32
    return %c0_i32, %c0_i32_0 : i32, i32
  }
  func.func @transform_1(%arg0: i32) -> (i32, i32, i32) {
    %c0_i32 = arith.constant 0 : i32
    %c0_i32_0 = arith.constant 0 : i32
    %c0_i32_1 = arith.constant 0 : i32
    return %c0_i32, %c0_i32_0, %arg0 : i32, i32, i32
  }
  func.func @transform_2(%arg0: i32) -> (i32, i32) {
    %c0_i32 = arith.constant 0 : i32
    %c0_i32_0 = arith.constant 0 : i32
    %c0_i32_1 = arith.constant 0 : i32
    return %c0_i32, %c0_i32_0 : i32, i32
  }
  func.func @transform_3(%arg0: i32) -> (i32, i32) {
    %c0_i32 = arith.constant 0 : i32
    %c0_i32_0 = arith.constant 0 : i32
    return %c0_i32, %arg0 : i32, i32
  }
  func.func @transform_4(%arg0: i32) -> (i32, i32) {
    %c0_i32 = arith.constant 0 : i32
    %c0_i32_0 = arith.constant 0 : i32
    return %c0_i32, %arg0 : i32, i32
  }
}

module attributes {stable_mosaic.version = 11 : i64} {
  func.func @_conv3x3s1_bn_kernel(%arg0: i32, %arg1: memref<104x256xbf16, #tpu.memory_space<vmem>>, %arg2: memref<9x256x128xbf16, #tpu.memory_space<vmem>>, %arg3: memref<80x1xf32, #tpu.memory_space<vmem>>, %arg4: memref<80x128xbf16, #tpu.memory_space<vmem>>, %arg5: memref<80x128xf32, #tpu.memory_space<vmem>>) attributes {dimension_semantics = [#tpu.dimension_semantics<parallel>], iteration_bounds = array<i64: 2>, scalar_prefetch = 0 : i64, scratch_operands = 1 : i64, tpu.core_type = #tpu.core_type<tc>, window_params = [{pipeline_mode = #tpu.pipeline_mode<synchronous>, transform_indices = @transform_0, window_bounds = array<i64: 104, 256>}, {transform_indices = @transform_1, window_bounds = array<i64: 9, 256, 128>}, {pipeline_mode = #tpu.pipeline_mode<synchronous>, transform_indices = @transform_2, window_bounds = array<i64: 80, 1>}, {transform_indices = @transform_3, window_bounds = array<i64: 80, 128>}]} {
    %c0 = arith.constant 0 : index
    %c0_0 = arith.constant 0 : index
    %0 = vector.load %arg1[%c0, %c0_0] : memref<104x256xbf16, #tpu.memory_space<vmem>>, vector<80x256xbf16>
    %c0_1 = arith.constant 0 : index
    %c0_2 = arith.constant 0 : index
    %c0_3 = arith.constant 0 : index
    %1 = vector.load %arg2[%c0_1, %c0_2, %c0_3] : memref<9x256x128xbf16, #tpu.memory_space<vmem>>, vector<1x256x128xbf16>
    %2 = vector.shape_cast %1 : vector<1x256x128xbf16> to vector<256x128xbf16>
    %cst = arith.constant dense<0.000000e+00> : vector<80x128xf32>
    %3 = tpu.matmul %0, %2, %cst {dimension_numbers = #tpu.dot_dimension_numbers<[1], [0], [0], [1], [0, 0, 1, 1], [], []>} : vector<80x256xbf16>, vector<256x128xbf16>, vector<80x128xf32> -> vector<80x128xf32>
    %c0_4 = arith.constant 0 : index
    %c0_5 = arith.constant 0 : index
    %4 = vector.load %arg5[%c0_4, %c0_5] : memref<80x128xf32, #tpu.memory_space<vmem>>, vector<80x128xf32>
    tpu.vector_store %arg5[%c0_4, %c0_5], %3 {strides = array<i32>} : memref<80x128xf32, #tpu.memory_space<vmem>>, vector<80x128xf32>,
    %c1 = arith.constant 1 : index
    %c0_6 = arith.constant 0 : index
    %5 = vector.load %arg1[%c1, %c0_6] : memref<104x256xbf16, #tpu.memory_space<vmem>>, vector<80x256xbf16>
    %c1_7 = arith.constant 1 : index
    %c0_8 = arith.constant 0 : index
    %c0_9 = arith.constant 0 : index
    %6 = vector.load %arg2[%c1_7, %c0_8, %c0_9] : memref<9x256x128xbf16, #tpu.memory_space<vmem>>, vector<1x256x128xbf16>
    %7 = vector.shape_cast %6 : vector<1x256x128xbf16> to vector<256x128xbf16>
    %cst_10 = arith.constant dense<0.000000e+00> : vector<80x128xf32>
    %8 = tpu.matmul %5, %7, %cst_10 {dimension_numbers = #tpu.dot_dimension_numbers<[1], [0], [0], [1], [0, 0, 1, 1], [], []>} : vector<80x256xbf16>, vector<256x128xbf16>, vector<80x128xf32> -> vector<80x128xf32>
    %c0_11 = arith.constant 0 : index
    %c0_12 = arith.constant 0 : index
    %9 = vector.load %arg5[%c0_11, %c0_12] : memref<80x128xf32, #tpu.memory_space<vmem>>, vector<80x128xf32>
    %10 = arith.addf %9, %8 : vector<80x128xf32>
    %c0_13 = arith.constant 0 : index
    %c0_14 = arith.constant 0 : index
    %11 = vector.load %arg5[%c0_13, %c0_14] : memref<80x128xf32, #tpu.memory_space<vmem>>, vector<80x128xf32>
    tpu.vector_store %arg5[%c0_13, %c0_14], %10 {strides = array<i32>} : memref<80x128xf32, #tpu.memory_space<vmem>>, vector<80x128xf32>,
    %c2 = arith.constant 2 : index
    %c0_15 = arith.constant 0 : index
    %12 = vector.load %arg1[%c2, %c0_15] : memref<104x256xbf16, #tpu.memory_space<vmem>>, vector<80x256xbf16>
    %c2_16 = arith.constant 2 : index
    %c0_17 = arith.constant 0 : index
    %c0_18 = arith.constant 0 : index
    %13 = vector.load %arg2[%c2_16, %c0_17, %c0_18] : memref<9x256x128xbf16, #tpu.memory_space<vmem>>, vector<1x256x128xbf16>
    %14 = vector.shape_cast %13 : vector<1x256x128xbf16> to vector<256x128xbf16>
    %cst_19 = arith.constant dense<0.000000e+00> : vector<80x128xf32>
    %15 = tpu.matmul %12, %14, %cst_19 {dimension_numbers = #tpu.dot_dimension_numbers<[1], [0], [0], [1], [0, 0, 1, 1], [], []>} : vector<80x256xbf16>, vector<256x128xbf16>, vector<80x128xf32> -> vector<80x128xf32>
    %c0_20 = arith.constant 0 : index
    %c0_21 = arith.constant 0 : index
    %16 = vector.load %arg5[%c0_20, %c0_21] : memref<80x128xf32, #tpu.memory_space<vmem>>, vector<80x128xf32>
    %17 = arith.addf %16, %15 : vector<80x128xf32>
    %c0_22 = arith.constant 0 : index
    %c0_23 = arith.constant 0 : index
    %18 = vector.load %arg5[%c0_22, %c0_23] : memref<80x128xf32, #tpu.memory_space<vmem>>, vector<80x128xf32>
    tpu.vector_store %arg5[%c0_22, %c0_23], %17 {strides = array<i32>} : memref<80x128xf32, #tpu.memory_space<vmem>>, vector<80x128xf32>,
    %c8 = arith.constant 8 : index
    %c0_24 = arith.constant 0 : index
    %19 = vector.load %arg1[%c8, %c0_24] : memref<104x256xbf16, #tpu.memory_space<vmem>>, vector<80x256xbf16>
    %c3 = arith.constant 3 : index
    %c0_25 = arith.constant 0 : index
    %c0_26 = arith.constant 0 : index
    %20 = vector.load %arg2[%c3, %c0_25, %c0_26] : memref<9x256x128xbf16, #tpu.memory_space<vmem>>, vector<1x256x128xbf16>
    %21 = vector.shape_cast %20 : vector<1x256x128xbf16> to vector<256x128xbf16>
    %cst_27 = arith.constant dense<0.000000e+00> : vector<80x128xf32>
    %22 = tpu.matmul %19, %21, %cst_27 {dimension_numbers = #tpu.dot_dimension_numbers<[1], [0], [0], [1], [0, 0, 1, 1], [], []>} : vector<80x256xbf16>, vector<256x128xbf16>, vector<80x128xf32> -> vector<80x128xf32>
    %c0_28 = arith.constant 0 : index
    %c0_29 = arith.constant 0 : index
    %23 = vector.load %arg5[%c0_28, %c0_29] : memref<80x128xf32, #tpu.memory_space<vmem>>, vector<80x128xf32>
    %24 = arith.addf %23, %22 : vector<80x128xf32>
    %c0_30 = arith.constant 0 : index
    %c0_31 = arith.constant 0 : index
    %25 = vector.load %arg5[%c0_30, %c0_31] : memref<80x128xf32, #tpu.memory_space<vmem>>, vector<80x128xf32>
    tpu.vector_store %arg5[%c0_30, %c0_31], %24 {strides = array<i32>} : memref<80x128xf32, #tpu.memory_space<vmem>>, vector<80x128xf32>,
    %c9 = arith.constant 9 : index
    %c0_32 = arith.constant 0 : index
    %26 = vector.load %arg1[%c9, %c0_32] : memref<104x256xbf16, #tpu.memory_space<vmem>>, vector<80x256xbf16>
    %c4 = arith.constant 4 : index
    %c0_33 = arith.constant 0 : index
    %c0_34 = arith.constant 0 : index
    %27 = vector.load %arg2[%c4, %c0_33, %c0_34] : memref<9x256x128xbf16, #tpu.memory_space<vmem>>, vector<1x256x128xbf16>
    %28 = vector.shape_cast %27 : vector<1x256x128xbf16> to vector<256x128xbf16>
    %cst_35 = arith.constant dense<0.000000e+00> : vector<80x128xf32>
    %29 = tpu.matmul %26, %28, %cst_35 {dimension_numbers = #tpu.dot_dimension_numbers<[1], [0], [0], [1], [0, 0, 1, 1], [], []>} : vector<80x256xbf16>, vector<256x128xbf16>, vector<80x128xf32> -> vector<80x128xf32>
    %c0_36 = arith.constant 0 : index
    %c0_37 = arith.constant 0 : index
    %30 = vector.load %arg5[%c0_36, %c0_37] : memref<80x128xf32, #tpu.memory_space<vmem>>, vector<80x128xf32>
    %31 = arith.addf %30, %29 : vector<80x128xf32>
    %c0_38 = arith.constant 0 : index
    %c0_39 = arith.constant 0 : index
    %32 = vector.load %arg5[%c0_38, %c0_39] : memref<80x128xf32, #tpu.memory_space<vmem>>, vector<80x128xf32>
    tpu.vector_store %arg5[%c0_38, %c0_39], %31 {strides = array<i32>} : memref<80x128xf32, #tpu.memory_space<vmem>>, vector<80x128xf32>,
    %c10 = arith.constant 10 : index
    %c0_40 = arith.constant 0 : index
    %33 = vector.load %arg1[%c10, %c0_40] : memref<104x256xbf16, #tpu.memory_space<vmem>>, vector<80x256xbf16>
    %c5 = arith.constant 5 : index
    %c0_41 = arith.constant 0 : index
    %c0_42 = arith.constant 0 : index
    %34 = vector.load %arg2[%c5, %c0_41, %c0_42] : memref<9x256x128xbf16, #tpu.memory_space<vmem>>, vector<1x256x128xbf16>
    %35 = vector.shape_cast %34 : vector<1x256x128xbf16> to vector<256x128xbf16>
    %cst_43 = arith.constant dense<0.000000e+00> : vector<80x128xf32>
    %36 = tpu.matmul %33, %35, %cst_43 {dimension_numbers = #tpu.dot_dimension_numbers<[1], [0], [0], [1], [0, 0, 1, 1], [], []>} : vector<80x256xbf16>, vector<256x128xbf16>, vector<80x128xf32> -> vector<80x128xf32>
    %c0_44 = arith.constant 0 : index
    %c0_45 = arith.constant 0 : index
    %37 = vector.load %arg5[%c0_44, %c0_45] : memref<80x128xf32, #tpu.memory_space<vmem>>, vector<80x128xf32>
    %38 = arith.addf %37, %36 : vector<80x128xf32>
    %c0_46 = arith.constant 0 : index
    %c0_47 = arith.constant 0 : index
    %39 = vector.load %arg5[%c0_46, %c0_47] : memref<80x128xf32, #tpu.memory_space<vmem>>, vector<80x128xf32>
    tpu.vector_store %arg5[%c0_46, %c0_47], %38 {strides = array<i32>} : memref<80x128xf32, #tpu.memory_space<vmem>>, vector<80x128xf32>,
    %c16 = arith.constant 16 : index
    %c0_48 = arith.constant 0 : index
    %40 = vector.load %arg1[%c16, %c0_48] : memref<104x256xbf16, #tpu.memory_space<vmem>>, vector<80x256xbf16>
    %c6 = arith.constant 6 : index
    %c0_49 = arith.constant 0 : index
    %c0_50 = arith.constant 0 : index
    %41 = vector.load %arg2[%c6, %c0_49, %c0_50] : memref<9x256x128xbf16, #tpu.memory_space<vmem>>, vector<1x256x128xbf16>
    %42 = vector.shape_cast %41 : vector<1x256x128xbf16> to vector<256x128xbf16>
    %cst_51 = arith.constant dense<0.000000e+00> : vector<80x128xf32>
    %43 = tpu.matmul %40, %42, %cst_51 {dimension_numbers = #tpu.dot_dimension_numbers<[1], [0], [0], [1], [0, 0, 1, 1], [], []>} : vector<80x256xbf16>, vector<256x128xbf16>, vector<80x128xf32> -> vector<80x128xf32>
    %c0_52 = arith.constant 0 : index
    %c0_53 = arith.constant 0 : index
    %44 = vector.load %arg5[%c0_52, %c0_53] : memref<80x128xf32, #tpu.memory_space<vmem>>, vector<80x128xf32>
    %45 = arith.addf %44, %43 : vector<80x128xf32>
    %c0_54 = arith.constant 0 : index
    %c0_55 = arith.constant 0 : index
    %46 = vector.load %arg5[%c0_54, %c0_55] : memref<80x128xf32, #tpu.memory_space<vmem>>, vector<80x128xf32>
    tpu.vector_store %arg5[%c0_54, %c0_55], %45 {strides = array<i32>} : memref<80x128xf32, #tpu.memory_space<vmem>>, vector<80x128xf32>,
    %c17 = arith.constant 17 : index
    %c0_56 = arith.constant 0 : index
    %47 = vector.load %arg1[%c17, %c0_56] : memref<104x256xbf16, #tpu.memory_space<vmem>>, vector<80x256xbf16>
    %c7 = arith.constant 7 : index
    %c0_57 = arith.constant 0 : index
    %c0_58 = arith.constant 0 : index
    %48 = vector.load %arg2[%c7, %c0_57, %c0_58] : memref<9x256x128xbf16, #tpu.memory_space<vmem>>, vector<1x256x128xbf16>
    %49 = vector.shape_cast %48 : vector<1x256x128xbf16> to vector<256x128xbf16>
    %cst_59 = arith.constant dense<0.000000e+00> : vector<80x128xf32>
    %50 = tpu.matmul %47, %49, %cst_59 {dimension_numbers = #tpu.dot_dimension_numbers<[1], [0], [0], [1], [0, 0, 1, 1], [], []>} : vector<80x256xbf16>, vector<256x128xbf16>, vector<80x128xf32> -> vector<80x128xf32>
    %c0_60 = arith.constant 0 : index
    %c0_61 = arith.constant 0 : index
    %51 = vector.load %arg5[%c0_60, %c0_61] : memref<80x128xf32, #tpu.memory_space<vmem>>, vector<80x128xf32>
    %52 = arith.addf %51, %50 : vector<80x128xf32>
    %c0_62 = arith.constant 0 : index
    %c0_63 = arith.constant 0 : index
    %53 = vector.load %arg5[%c0_62, %c0_63] : memref<80x128xf32, #tpu.memory_space<vmem>>, vector<80x128xf32>
    tpu.vector_store %arg5[%c0_62, %c0_63], %52 {strides = array<i32>} : memref<80x128xf32, #tpu.memory_space<vmem>>, vector<80x128xf32>,
    %c18 = arith.constant 18 : index
    %c0_64 = arith.constant 0 : index
    %54 = vector.load %arg1[%c18, %c0_64] : memref<104x256xbf16, #tpu.memory_space<vmem>>, vector<80x256xbf16>
    %c8_65 = arith.constant 8 : index
    %c0_66 = arith.constant 0 : index
    %c0_67 = arith.constant 0 : index
    %55 = vector.load %arg2[%c8_65, %c0_66, %c0_67] : memref<9x256x128xbf16, #tpu.memory_space<vmem>>, vector<1x256x128xbf16>
    %56 = vector.shape_cast %55 : vector<1x256x128xbf16> to vector<256x128xbf16>
    %cst_68 = arith.constant dense<0.000000e+00> : vector<80x128xf32>
    %57 = tpu.matmul %54, %56, %cst_68 {dimension_numbers = #tpu.dot_dimension_numbers<[1], [0], [0], [1], [0, 0, 1, 1], [], []>} : vector<80x256xbf16>, vector<256x128xbf16>, vector<80x128xf32> -> vector<80x128xf32>
    %c0_69 = arith.constant 0 : index
    %c0_70 = arith.constant 0 : index
    %58 = vector.load %arg5[%c0_69, %c0_70] : memref<80x128xf32, #tpu.memory_space<vmem>>, vector<80x128xf32>
    %59 = arith.addf %58, %57 : vector<80x128xf32>
    %c0_71 = arith.constant 0 : index
    %c0_72 = arith.constant 0 : index
    %60 = vector.load %arg5[%c0_71, %c0_72] : memref<80x128xf32, #tpu.memory_space<vmem>>, vector<80x128xf32>
    tpu.vector_store %arg5[%c0_71, %c0_72], %59 {strides = array<i32>} : memref<80x128xf32, #tpu.memory_space<vmem>>, vector<80x128xf32>,
    %c0_73 = arith.constant 0 : index
    %c0_74 = arith.constant 0 : index
    %61 = vector.load %arg3[%c0_73, %c0_74] : memref<80x1xf32, #tpu.memory_space<vmem>>, vector<80x1xf32>
    %c0_75 = arith.constant 0 : index
    %c0_76 = arith.constant 0 : index
    %62 = vector.load %arg5[%c0_75, %c0_76] : memref<80x128xf32, #tpu.memory_space<vmem>>, vector<80x128xf32>
    %63 = vector.broadcast %61 : vector<80x1xf32> to vector<80x128xf32>
    %64 = arith.mulf %62, %63 : vector<80x128xf32>
    %cst_77 = arith.constant dense<0.000000e+00> : vector<128xf32>
    %65 = vector.multi_reduction <add>, %64, %cst_77 [0] : vector<80x128xf32> to vector<128xf32>
    %66 = vector.shape_cast %65 : vector<128xf32> to vector<1x128xf32>
    %cst_78 = arith.constant 1.250000e-01 : f32
    %67 = vector.broadcast %cst_78 : f32 to vector<1x128xf32>
    %68 = arith.mulf %66, %67 : vector<1x128xf32>
    %69 = vector.broadcast %68 : vector<1x128xf32> to vector<80x128xf32>
    %70 = arith.subf %62, %69 : vector<80x128xf32>
    %71 = arith.mulf %70, %70 : vector<80x128xf32>
    %72 = vector.broadcast %61 : vector<80x1xf32> to vector<80x128xf32>
    %73 = arith.mulf %71, %72 : vector<80x128xf32>
    %cst_79 = arith.constant dense<0.000000e+00> : vector<128xf32>
    %74 = vector.multi_reduction <add>, %73, %cst_79 [0] : vector<80x128xf32> to vector<128xf32>
    %75 = vector.shape_cast %74 : vector<128xf32> to vector<1x128xf32>
    %cst_80 = arith.constant 1.250000e-01 : f32
    %76 = vector.broadcast %cst_80 : f32 to vector<1x128xf32>
    %77 = arith.mulf %75, %76 : vector<1x128xf32>
    %cst_81 = arith.constant 9.99999974E-6 : f32
    %78 = vector.broadcast %cst_81 : f32 to vector<1x128xf32>
    %79 = arith.addf %77, %78 : vector<1x128xf32>
    %80 = math.rsqrt %79 : vector<1x128xf32>
    %81 = vector.broadcast %80 : vector<1x128xf32> to vector<80x128xf32>
    %82 = arith.mulf %70, %81 : vector<80x128xf32>
    %cst_82 = arith.constant 0.000000e+00 : f32
    %83 = vector.broadcast %cst_82 : f32 to vector<80x128xf32>
    %84 = arith.maximumf %82, %83 : vector<80x128xf32>
    %85 = arith.truncf %84 : vector<80x128xf32> to vector<80x128xbf16>
    %c0_83 = arith.constant 0 : index
    %c0_84 = arith.constant 0 : index
    %86 = vector.load %arg4[%c0_83, %c0_84] : memref<80x128xbf16, #tpu.memory_space<vmem>>, vector<80x128xbf16>
    tpu.vector_store %arg4[%c0_83, %c0_84], %85 {strides = array<i32>} : memref<80x128xbf16, #tpu.memory_space<vmem>>, vector<80x128xbf16>,
    return
  }
  func.func @transform_0(%arg0: i32) -> (i32, i32) {
    %c0_i32 = arith.constant 0 : i32
    %c0_i32_0 = arith.constant 0 : i32
    %c0_i32_1 = arith.constant 0 : i32
    return %c0_i32, %c0_i32_0 : i32, i32
  }
  func.func @transform_1(%arg0: i32) -> (i32, i32, i32) {
    %c0_i32 = arith.constant 0 : i32
    %c0_i32_0 = arith.constant 0 : i32
    %c0_i32_1 = arith.constant 0 : i32
    return %c0_i32, %c0_i32_0, %arg0 : i32, i32, i32
  }
  func.func @transform_2(%arg0: i32) -> (i32, i32) {
    %c0_i32 = arith.constant 0 : i32
    %c0_i32_0 = arith.constant 0 : i32
    %c0_i32_1 = arith.constant 0 : i32
    return %c0_i32, %c0_i32_0 : i32, i32
  }
  func.func @transform_3(%arg0: i32) -> (i32, i32) {
    %c0_i32 = arith.constant 0 : i32
    %c0_i32_0 = arith.constant 0 : i32
    return %c0_i32, %arg0 : i32, i32
  }
}

module attributes {stable_mosaic.version = 11 : i64} {
  func.func @_conv3x3s1_bn_kernel(%arg0: i32, %arg1: memref<136x384xbf16, #tpu.memory_space<vmem>>, %arg2: memref<9x384x128xbf16, #tpu.memory_space<vmem>>, %arg3: memref<112x1xf32, #tpu.memory_space<vmem>>, %arg4: memref<112x128xbf16, #tpu.memory_space<vmem>>, %arg5: memref<112x128xf32, #tpu.memory_space<vmem>>) attributes {dimension_semantics = [#tpu.dimension_semantics<parallel>], iteration_bounds = array<i64: 1>, scalar_prefetch = 0 : i64, scratch_operands = 1 : i64, tpu.core_type = #tpu.core_type<tc>, window_params = [{pipeline_mode = #tpu.pipeline_mode<synchronous>, transform_indices = @transform_0, window_bounds = array<i64: 136, 384>}, {transform_indices = @transform_1, window_bounds = array<i64: 9, 384, 128>}, {pipeline_mode = #tpu.pipeline_mode<synchronous>, transform_indices = @transform_2, window_bounds = array<i64: 112, 1>}, {transform_indices = @transform_3, window_bounds = array<i64: 112, 128>}]} {
    %c0 = arith.constant 0 : index
    %c0_0 = arith.constant 0 : index
    %0 = vector.load %arg1[%c0, %c0_0] : memref<136x384xbf16, #tpu.memory_space<vmem>>, vector<112x384xbf16>
    %c0_1 = arith.constant 0 : index
    %c0_2 = arith.constant 0 : index
    %c0_3 = arith.constant 0 : index
    %1 = vector.load %arg2[%c0_1, %c0_2, %c0_3] : memref<9x384x128xbf16, #tpu.memory_space<vmem>>, vector<1x384x128xbf16>
    %2 = vector.shape_cast %1 : vector<1x384x128xbf16> to vector<384x128xbf16>
    %cst = arith.constant dense<0.000000e+00> : vector<112x128xf32>
    %3 = tpu.matmul %0, %2, %cst {dimension_numbers = #tpu.dot_dimension_numbers<[1], [0], [0], [1], [0, 0, 1, 1], [], []>} : vector<112x384xbf16>, vector<384x128xbf16>, vector<112x128xf32> -> vector<112x128xf32>
    %c0_4 = arith.constant 0 : index
    %c0_5 = arith.constant 0 : index
    %4 = vector.load %arg5[%c0_4, %c0_5] : memref<112x128xf32, #tpu.memory_space<vmem>>, vector<112x128xf32>
    tpu.vector_store %arg5[%c0_4, %c0_5], %3 {strides = array<i32>} : memref<112x128xf32, #tpu.memory_space<vmem>>, vector<112x128xf32>,
    %c1 = arith.constant 1 : index
    %c0_6 = arith.constant 0 : index
    %5 = vector.load %arg1[%c1, %c0_6] : memref<136x384xbf16, #tpu.memory_space<vmem>>, vector<112x384xbf16>
    %c1_7 = arith.constant 1 : index
    %c0_8 = arith.constant 0 : index
    %c0_9 = arith.constant 0 : index
    %6 = vector.load %arg2[%c1_7, %c0_8, %c0_9] : memref<9x384x128xbf16, #tpu.memory_space<vmem>>, vector<1x384x128xbf16>
    %7 = vector.shape_cast %6 : vector<1x384x128xbf16> to vector<384x128xbf16>
    %cst_10 = arith.constant dense<0.000000e+00> : vector<112x128xf32>
    %8 = tpu.matmul %5, %7, %cst_10 {dimension_numbers = #tpu.dot_dimension_numbers<[1], [0], [0], [1], [0, 0, 1, 1], [], []>} : vector<112x384xbf16>, vector<384x128xbf16>, vector<112x128xf32> -> vector<112x128xf32>
    %c0_11 = arith.constant 0 : index
    %c0_12 = arith.constant 0 : index
    %9 = vector.load %arg5[%c0_11, %c0_12] : memref<112x128xf32, #tpu.memory_space<vmem>>, vector<112x128xf32>
    %10 = arith.addf %9, %8 : vector<112x128xf32>
    %c0_13 = arith.constant 0 : index
    %c0_14 = arith.constant 0 : index
    %11 = vector.load %arg5[%c0_13, %c0_14] : memref<112x128xf32, #tpu.memory_space<vmem>>, vector<112x128xf32>
    tpu.vector_store %arg5[%c0_13, %c0_14], %10 {strides = array<i32>} : memref<112x128xf32, #tpu.memory_space<vmem>>, vector<112x128xf32>,
    %c2 = arith.constant 2 : index
    %c0_15 = arith.constant 0 : index
    %12 = vector.load %arg1[%c2, %c0_15] : memref<136x384xbf16, #tpu.memory_space<vmem>>, vector<112x384xbf16>
    %c2_16 = arith.constant 2 : index
    %c0_17 = arith.constant 0 : index
    %c0_18 = arith.constant 0 : index
    %13 = vector.load %arg2[%c2_16, %c0_17, %c0_18] : memref<9x384x128xbf16, #tpu.memory_space<vmem>>, vector<1x384x128xbf16>
    %14 = vector.shape_cast %13 : vector<1x384x128xbf16> to vector<384x128xbf16>
    %cst_19 = arith.constant dense<0.000000e+00> : vector<112x128xf32>
    %15 = tpu.matmul %12, %14, %cst_19 {dimension_numbers = #tpu.dot_dimension_numbers<[1], [0], [0], [1], [0, 0, 1, 1], [], []>} : vector<112x384xbf16>, vector<384x128xbf16>, vector<112x128xf32> -> vector<112x128xf32>
    %c0_20 = arith.constant 0 : index
    %c0_21 = arith.constant 0 : index
    %16 = vector.load %arg5[%c0_20, %c0_21] : memref<112x128xf32, #tpu.memory_space<vmem>>, vector<112x128xf32>
    %17 = arith.addf %16, %15 : vector<112x128xf32>
    %c0_22 = arith.constant 0 : index
    %c0_23 = arith.constant 0 : index
    %18 = vector.load %arg5[%c0_22, %c0_23] : memref<112x128xf32, #tpu.memory_space<vmem>>, vector<112x128xf32>
    tpu.vector_store %arg5[%c0_22, %c0_23], %17 {strides = array<i32>} : memref<112x128xf32, #tpu.memory_space<vmem>>, vector<112x128xf32>,
    %c8 = arith.constant 8 : index
    %c0_24 = arith.constant 0 : index
    %19 = vector.load %arg1[%c8, %c0_24] : memref<136x384xbf16, #tpu.memory_space<vmem>>, vector<112x384xbf16>
    %c3 = arith.constant 3 : index
    %c0_25 = arith.constant 0 : index
    %c0_26 = arith.constant 0 : index
    %20 = vector.load %arg2[%c3, %c0_25, %c0_26] : memref<9x384x128xbf16, #tpu.memory_space<vmem>>, vector<1x384x128xbf16>
    %21 = vector.shape_cast %20 : vector<1x384x128xbf16> to vector<384x128xbf16>
    %cst_27 = arith.constant dense<0.000000e+00> : vector<112x128xf32>
    %22 = tpu.matmul %19, %21, %cst_27 {dimension_numbers = #tpu.dot_dimension_numbers<[1], [0], [0], [1], [0, 0, 1, 1], [], []>} : vector<112x384xbf16>, vector<384x128xbf16>, vector<112x128xf32> -> vector<112x128xf32>
    %c0_28 = arith.constant 0 : index
    %c0_29 = arith.constant 0 : index
    %23 = vector.load %arg5[%c0_28, %c0_29] : memref<112x128xf32, #tpu.memory_space<vmem>>, vector<112x128xf32>
    %24 = arith.addf %23, %22 : vector<112x128xf32>
    %c0_30 = arith.constant 0 : index
    %c0_31 = arith.constant 0 : index
    %25 = vector.load %arg5[%c0_30, %c0_31] : memref<112x128xf32, #tpu.memory_space<vmem>>, vector<112x128xf32>
    tpu.vector_store %arg5[%c0_30, %c0_31], %24 {strides = array<i32>} : memref<112x128xf32, #tpu.memory_space<vmem>>, vector<112x128xf32>,
    %c9 = arith.constant 9 : index
    %c0_32 = arith.constant 0 : index
    %26 = vector.load %arg1[%c9, %c0_32] : memref<136x384xbf16, #tpu.memory_space<vmem>>, vector<112x384xbf16>
    %c4 = arith.constant 4 : index
    %c0_33 = arith.constant 0 : index
    %c0_34 = arith.constant 0 : index
    %27 = vector.load %arg2[%c4, %c0_33, %c0_34] : memref<9x384x128xbf16, #tpu.memory_space<vmem>>, vector<1x384x128xbf16>
    %28 = vector.shape_cast %27 : vector<1x384x128xbf16> to vector<384x128xbf16>
    %cst_35 = arith.constant dense<0.000000e+00> : vector<112x128xf32>
    %29 = tpu.matmul %26, %28, %cst_35 {dimension_numbers = #tpu.dot_dimension_numbers<[1], [0], [0], [1], [0, 0, 1, 1], [], []>} : vector<112x384xbf16>, vector<384x128xbf16>, vector<112x128xf32> -> vector<112x128xf32>
    %c0_36 = arith.constant 0 : index
    %c0_37 = arith.constant 0 : index
    %30 = vector.load %arg5[%c0_36, %c0_37] : memref<112x128xf32, #tpu.memory_space<vmem>>, vector<112x128xf32>
    %31 = arith.addf %30, %29 : vector<112x128xf32>
    %c0_38 = arith.constant 0 : index
    %c0_39 = arith.constant 0 : index
    %32 = vector.load %arg5[%c0_38, %c0_39] : memref<112x128xf32, #tpu.memory_space<vmem>>, vector<112x128xf32>
    tpu.vector_store %arg5[%c0_38, %c0_39], %31 {strides = array<i32>} : memref<112x128xf32, #tpu.memory_space<vmem>>, vector<112x128xf32>,
    %c10 = arith.constant 10 : index
    %c0_40 = arith.constant 0 : index
    %33 = vector.load %arg1[%c10, %c0_40] : memref<136x384xbf16, #tpu.memory_space<vmem>>, vector<112x384xbf16>
    %c5 = arith.constant 5 : index
    %c0_41 = arith.constant 0 : index
    %c0_42 = arith.constant 0 : index
    %34 = vector.load %arg2[%c5, %c0_41, %c0_42] : memref<9x384x128xbf16, #tpu.memory_space<vmem>>, vector<1x384x128xbf16>
    %35 = vector.shape_cast %34 : vector<1x384x128xbf16> to vector<384x128xbf16>
    %cst_43 = arith.constant dense<0.000000e+00> : vector<112x128xf32>
    %36 = tpu.matmul %33, %35, %cst_43 {dimension_numbers = #tpu.dot_dimension_numbers<[1], [0], [0], [1], [0, 0, 1, 1], [], []>} : vector<112x384xbf16>, vector<384x128xbf16>, vector<112x128xf32> -> vector<112x128xf32>
    %c0_44 = arith.constant 0 : index
    %c0_45 = arith.constant 0 : index
    %37 = vector.load %arg5[%c0_44, %c0_45] : memref<112x128xf32, #tpu.memory_space<vmem>>, vector<112x128xf32>
    %38 = arith.addf %37, %36 : vector<112x128xf32>
    %c0_46 = arith.constant 0 : index
    %c0_47 = arith.constant 0 : index
    %39 = vector.load %arg5[%c0_46, %c0_47] : memref<112x128xf32, #tpu.memory_space<vmem>>, vector<112x128xf32>
    tpu.vector_store %arg5[%c0_46, %c0_47], %38 {strides = array<i32>} : memref<112x128xf32, #tpu.memory_space<vmem>>, vector<112x128xf32>,
    %c16 = arith.constant 16 : index
    %c0_48 = arith.constant 0 : index
    %40 = vector.load %arg1[%c16, %c0_48] : memref<136x384xbf16, #tpu.memory_space<vmem>>, vector<112x384xbf16>
    %c6 = arith.constant 6 : index
    %c0_49 = arith.constant 0 : index
    %c0_50 = arith.constant 0 : index
    %41 = vector.load %arg2[%c6, %c0_49, %c0_50] : memref<9x384x128xbf16, #tpu.memory_space<vmem>>, vector<1x384x128xbf16>
    %42 = vector.shape_cast %41 : vector<1x384x128xbf16> to vector<384x128xbf16>
    %cst_51 = arith.constant dense<0.000000e+00> : vector<112x128xf32>
    %43 = tpu.matmul %40, %42, %cst_51 {dimension_numbers = #tpu.dot_dimension_numbers<[1], [0], [0], [1], [0, 0, 1, 1], [], []>} : vector<112x384xbf16>, vector<384x128xbf16>, vector<112x128xf32> -> vector<112x128xf32>
    %c0_52 = arith.constant 0 : index
    %c0_53 = arith.constant 0 : index
    %44 = vector.load %arg5[%c0_52, %c0_53] : memref<112x128xf32, #tpu.memory_space<vmem>>, vector<112x128xf32>
    %45 = arith.addf %44, %43 : vector<112x128xf32>
    %c0_54 = arith.constant 0 : index
    %c0_55 = arith.constant 0 : index
    %46 = vector.load %arg5[%c0_54, %c0_55] : memref<112x128xf32, #tpu.memory_space<vmem>>, vector<112x128xf32>
    tpu.vector_store %arg5[%c0_54, %c0_55], %45 {strides = array<i32>} : memref<112x128xf32, #tpu.memory_space<vmem>>, vector<112x128xf32>,
    %c17 = arith.constant 17 : index
    %c0_56 = arith.constant 0 : index
    %47 = vector.load %arg1[%c17, %c0_56] : memref<136x384xbf16, #tpu.memory_space<vmem>>, vector<112x384xbf16>
    %c7 = arith.constant 7 : index
    %c0_57 = arith.constant 0 : index
    %c0_58 = arith.constant 0 : index
    %48 = vector.load %arg2[%c7, %c0_57, %c0_58] : memref<9x384x128xbf16, #tpu.memory_space<vmem>>, vector<1x384x128xbf16>
    %49 = vector.shape_cast %48 : vector<1x384x128xbf16> to vector<384x128xbf16>
    %cst_59 = arith.constant dense<0.000000e+00> : vector<112x128xf32>
    %50 = tpu.matmul %47, %49, %cst_59 {dimension_numbers = #tpu.dot_dimension_numbers<[1], [0], [0], [1], [0, 0, 1, 1], [], []>} : vector<112x384xbf16>, vector<384x128xbf16>, vector<112x128xf32> -> vector<112x128xf32>
    %c0_60 = arith.constant 0 : index
    %c0_61 = arith.constant 0 : index
    %51 = vector.load %arg5[%c0_60, %c0_61] : memref<112x128xf32, #tpu.memory_space<vmem>>, vector<112x128xf32>
    %52 = arith.addf %51, %50 : vector<112x128xf32>
    %c0_62 = arith.constant 0 : index
    %c0_63 = arith.constant 0 : index
    %53 = vector.load %arg5[%c0_62, %c0_63] : memref<112x128xf32, #tpu.memory_space<vmem>>, vector<112x128xf32>
    tpu.vector_store %arg5[%c0_62, %c0_63], %52 {strides = array<i32>} : memref<112x128xf32, #tpu.memory_space<vmem>>, vector<112x128xf32>,
    %c18 = arith.constant 18 : index
    %c0_64 = arith.constant 0 : index
    %54 = vector.load %arg1[%c18, %c0_64] : memref<136x384xbf16, #tpu.memory_space<vmem>>, vector<112x384xbf16>
    %c8_65 = arith.constant 8 : index
    %c0_66 = arith.constant 0 : index
    %c0_67 = arith.constant 0 : index
    %55 = vector.load %arg2[%c8_65, %c0_66, %c0_67] : memref<9x384x128xbf16, #tpu.memory_space<vmem>>, vector<1x384x128xbf16>
    %56 = vector.shape_cast %55 : vector<1x384x128xbf16> to vector<384x128xbf16>
    %cst_68 = arith.constant dense<0.000000e+00> : vector<112x128xf32>
    %57 = tpu.matmul %54, %56, %cst_68 {dimension_numbers = #tpu.dot_dimension_numbers<[1], [0], [0], [1], [0, 0, 1, 1], [], []>} : vector<112x384xbf16>, vector<384x128xbf16>, vector<112x128xf32> -> vector<112x128xf32>
    %c0_69 = arith.constant 0 : index
    %c0_70 = arith.constant 0 : index
    %58 = vector.load %arg5[%c0_69, %c0_70] : memref<112x128xf32, #tpu.memory_space<vmem>>, vector<112x128xf32>
    %59 = arith.addf %58, %57 : vector<112x128xf32>
    %c0_71 = arith.constant 0 : index
    %c0_72 = arith.constant 0 : index
    %60 = vector.load %arg5[%c0_71, %c0_72] : memref<112x128xf32, #tpu.memory_space<vmem>>, vector<112x128xf32>
    tpu.vector_store %arg5[%c0_71, %c0_72], %59 {strides = array<i32>} : memref<112x128xf32, #tpu.memory_space<vmem>>, vector<112x128xf32>,
    %c0_73 = arith.constant 0 : index
    %c0_74 = arith.constant 0 : index
    %61 = vector.load %arg3[%c0_73, %c0_74] : memref<112x1xf32, #tpu.memory_space<vmem>>, vector<112x1xf32>
    %c0_75 = arith.constant 0 : index
    %c0_76 = arith.constant 0 : index
    %62 = vector.load %arg5[%c0_75, %c0_76] : memref<112x128xf32, #tpu.memory_space<vmem>>, vector<112x128xf32>
    %63 = vector.broadcast %61 : vector<112x1xf32> to vector<112x128xf32>
    %64 = arith.mulf %62, %63 : vector<112x128xf32>
    %cst_77 = arith.constant dense<0.000000e+00> : vector<128xf32>
    %65 = vector.multi_reduction <add>, %64, %cst_77 [0] : vector<112x128xf32> to vector<128xf32>
    %66 = vector.shape_cast %65 : vector<128xf32> to vector<1x128xf32>
    %cst_78 = arith.constant 3.125000e-02 : f32
    %67 = vector.broadcast %cst_78 : f32 to vector<1x128xf32>
    %68 = arith.mulf %66, %67 : vector<1x128xf32>
    %69 = vector.broadcast %68 : vector<1x128xf32> to vector<112x128xf32>
    %70 = arith.subf %62, %69 : vector<112x128xf32>
    %71 = arith.mulf %70, %70 : vector<112x128xf32>
    %72 = vector.broadcast %61 : vector<112x1xf32> to vector<112x128xf32>
    %73 = arith.mulf %71, %72 : vector<112x128xf32>
    %cst_79 = arith.constant dense<0.000000e+00> : vector<128xf32>
    %74 = vector.multi_reduction <add>, %73, %cst_79 [0] : vector<112x128xf32> to vector<128xf32>
    %75 = vector.shape_cast %74 : vector<128xf32> to vector<1x128xf32>
    %cst_80 = arith.constant 3.125000e-02 : f32
    %76 = vector.broadcast %cst_80 : f32 to vector<1x128xf32>
    %77 = arith.mulf %75, %76 : vector<1x128xf32>
    %cst_81 = arith.constant 9.99999974E-6 : f32
    %78 = vector.broadcast %cst_81 : f32 to vector<1x128xf32>
    %79 = arith.addf %77, %78 : vector<1x128xf32>
    %80 = math.rsqrt %79 : vector<1x128xf32>
    %81 = vector.broadcast %80 : vector<1x128xf32> to vector<112x128xf32>
    %82 = arith.mulf %70, %81 : vector<112x128xf32>
    %cst_82 = arith.constant 0.000000e+00 : f32
    %83 = vector.broadcast %cst_82 : f32 to vector<112x128xf32>
    %84 = arith.maximumf %82, %83 : vector<112x128xf32>
    %85 = arith.truncf %84 : vector<112x128xf32> to vector<112x128xbf16>
    %c0_83 = arith.constant 0 : index
    %c0_84 = arith.constant 0 : index
    %86 = vector.load %arg4[%c0_83, %c0_84] : memref<112x128xbf16, #tpu.memory_space<vmem>>, vector<112x128xbf16>
    tpu.vector_store %arg4[%c0_83, %c0_84], %85 {strides = array<i32>} : memref<112x128xbf16, #tpu.memory_space<vmem>>, vector<112x128xbf16>,
    return
  }
  func.func @transform_0(%arg0: i32) -> (i32, i32) {
    %c0_i32 = arith.constant 0 : i32
    %c0_i32_0 = arith.constant 0 : i32
    %c0_i32_1 = arith.constant 0 : i32
    return %c0_i32, %c0_i32_0 : i32, i32
  }
  func.func @transform_1(%arg0: i32) -> (i32, i32, i32) {
    %c0_i32 = arith.constant 0 : i32
    %c0_i32_0 = arith.constant 0 : i32
    %c0_i32_1 = arith.constant 0 : i32
    return %c0_i32, %c0_i32_0, %arg0 : i32, i32, i32
  }
  func.func @transform_2(%arg0: i32) -> (i32, i32) {
    %c0_i32 = arith.constant 0 : i32
    %c0_i32_0 = arith.constant 0 : i32
    %c0_i32_1 = arith.constant 0 : i32
    return %c0_i32, %c0_i32_0 : i32, i32
  }
  func.func @transform_3(%arg0: i32) -> (i32, i32) {
    %c0_i32 = arith.constant 0 : i32
    %c0_i32_0 = arith.constant 0 : i32
    return %c0_i32, %arg0 : i32, i32
  }
}

module attributes {stable_mosaic.version = 11 : i64} {
  func.func @_conv3x3s1_bn_kernel(%arg0: i32, %arg1: memref<400x192xbf16, #tpu.memory_space<vmem>>, %arg2: memref<9x192x192xbf16, #tpu.memory_space<vmem>>, %arg3: memref<352x1xf32, #tpu.memory_space<vmem>>, %arg4: memref<352x192xbf16, #tpu.memory_space<vmem>>, %arg5: memref<352x192xf32, #tpu.memory_space<vmem>>) attributes {dimension_semantics = [#tpu.dimension_semantics<parallel>], iteration_bounds = array<i64: 1>, scalar_prefetch = 0 : i64, scratch_operands = 1 : i64, tpu.core_type = #tpu.core_type<tc>, window_params = [{pipeline_mode = #tpu.pipeline_mode<synchronous>, transform_indices = @transform_0, window_bounds = array<i64: 400, 192>}, {transform_indices = @transform_1, window_bounds = array<i64: 9, 192, 192>}, {pipeline_mode = #tpu.pipeline_mode<synchronous>, transform_indices = @transform_2, window_bounds = array<i64: 352, 1>}, {transform_indices = @transform_3, window_bounds = array<i64: 352, 192>}]} {
    %c0 = arith.constant 0 : index
    %c0_0 = arith.constant 0 : index
    %0 = vector.load %arg1[%c0, %c0_0] : memref<400x192xbf16, #tpu.memory_space<vmem>>, vector<352x192xbf16>
    %c0_1 = arith.constant 0 : index
    %c0_2 = arith.constant 0 : index
    %c0_3 = arith.constant 0 : index
    %1 = vector.load %arg2[%c0_1, %c0_2, %c0_3] : memref<9x192x192xbf16, #tpu.memory_space<vmem>>, vector<1x192x192xbf16>
    %2 = vector.shape_cast %1 : vector<1x192x192xbf16> to vector<192x192xbf16>
    %cst = arith.constant dense<0.000000e+00> : vector<352x192xf32>
    %3 = tpu.matmul %0, %2, %cst {dimension_numbers = #tpu.dot_dimension_numbers<[1], [0], [0], [1], [0, 0, 1, 1], [], []>} : vector<352x192xbf16>, vector<192x192xbf16>, vector<352x192xf32> -> vector<352x192xf32>
    %c0_4 = arith.constant 0 : index
    %c0_5 = arith.constant 0 : index
    %4 = vector.load %arg5[%c0_4, %c0_5] : memref<352x192xf32, #tpu.memory_space<vmem>>, vector<352x192xf32>
    tpu.vector_store %arg5[%c0_4, %c0_5], %3 {strides = array<i32>} : memref<352x192xf32, #tpu.memory_space<vmem>>, vector<352x192xf32>,
    %c1 = arith.constant 1 : index
    %c0_6 = arith.constant 0 : index
    %5 = vector.load %arg1[%c1, %c0_6] : memref<400x192xbf16, #tpu.memory_space<vmem>>, vector<352x192xbf16>
    %c1_7 = arith.constant 1 : index
    %c0_8 = arith.constant 0 : index
    %c0_9 = arith.constant 0 : index
    %6 = vector.load %arg2[%c1_7, %c0_8, %c0_9] : memref<9x192x192xbf16, #tpu.memory_space<vmem>>, vector<1x192x192xbf16>
    %7 = vector.shape_cast %6 : vector<1x192x192xbf16> to vector<192x192xbf16>
    %cst_10 = arith.constant dense<0.000000e+00> : vector<352x192xf32>
    %8 = tpu.matmul %5, %7, %cst_10 {dimension_numbers = #tpu.dot_dimension_numbers<[1], [0], [0], [1], [0, 0, 1, 1], [], []>} : vector<352x192xbf16>, vector<192x192xbf16>, vector<352x192xf32> -> vector<352x192xf32>
    %c0_11 = arith.constant 0 : index
    %c0_12 = arith.constant 0 : index
    %9 = vector.load %arg5[%c0_11, %c0_12] : memref<352x192xf32, #tpu.memory_space<vmem>>, vector<352x192xf32>
    %10 = arith.addf %9, %8 : vector<352x192xf32>
    %c0_13 = arith.constant 0 : index
    %c0_14 = arith.constant 0 : index
    %11 = vector.load %arg5[%c0_13, %c0_14] : memref<352x192xf32, #tpu.memory_space<vmem>>, vector<352x192xf32>
    tpu.vector_store %arg5[%c0_13, %c0_14], %10 {strides = array<i32>} : memref<352x192xf32, #tpu.memory_space<vmem>>, vector<352x192xf32>,
    %c2 = arith.constant 2 : index
    %c0_15 = arith.constant 0 : index
    %12 = vector.load %arg1[%c2, %c0_15] : memref<400x192xbf16, #tpu.memory_space<vmem>>, vector<352x192xbf16>
    %c2_16 = arith.constant 2 : index
    %c0_17 = arith.constant 0 : index
    %c0_18 = arith.constant 0 : index
    %13 = vector.load %arg2[%c2_16, %c0_17, %c0_18] : memref<9x192x192xbf16, #tpu.memory_space<vmem>>, vector<1x192x192xbf16>
    %14 = vector.shape_cast %13 : vector<1x192x192xbf16> to vector<192x192xbf16>
    %cst_19 = arith.constant dense<0.000000e+00> : vector<352x192xf32>
    %15 = tpu.matmul %12, %14, %cst_19 {dimension_numbers = #tpu.dot_dimension_numbers<[1], [0], [0], [1], [0, 0, 1, 1], [], []>} : vector<352x192xbf16>, vector<192x192xbf16>, vector<352x192xf32> -> vector<352x192xf32>
    %c0_20 = arith.constant 0 : index
    %c0_21 = arith.constant 0 : index
    %16 = vector.load %arg5[%c0_20, %c0_21] : memref<352x192xf32, #tpu.memory_space<vmem>>, vector<352x192xf32>
    %17 = arith.addf %16, %15 : vector<352x192xf32>
    %c0_22 = arith.constant 0 : index
    %c0_23 = arith.constant 0 : index
    %18 = vector.load %arg5[%c0_22, %c0_23] : memref<352x192xf32, #tpu.memory_space<vmem>>, vector<352x192xf32>
    tpu.vector_store %arg5[%c0_22, %c0_23], %17 {strides = array<i32>} : memref<352x192xf32, #tpu.memory_space<vmem>>, vector<352x192xf32>,
    %c16 = arith.constant 16 : index
    %c0_24 = arith.constant 0 : index
    %19 = vector.load %arg1[%c16, %c0_24] : memref<400x192xbf16, #tpu.memory_space<vmem>>, vector<352x192xbf16>
    %c3 = arith.constant 3 : index
    %c0_25 = arith.constant 0 : index
    %c0_26 = arith.constant 0 : index
    %20 = vector.load %arg2[%c3, %c0_25, %c0_26] : memref<9x192x192xbf16, #tpu.memory_space<vmem>>, vector<1x192x192xbf16>
    %21 = vector.shape_cast %20 : vector<1x192x192xbf16> to vector<192x192xbf16>
    %cst_27 = arith.constant dense<0.000000e+00> : vector<352x192xf32>
    %22 = tpu.matmul %19, %21, %cst_27 {dimension_numbers = #tpu.dot_dimension_numbers<[1], [0], [0], [1], [0, 0, 1, 1], [], []>} : vector<352x192xbf16>, vector<192x192xbf16>, vector<352x192xf32> -> vector<352x192xf32>
    %c0_28 = arith.constant 0 : index
    %c0_29 = arith.constant 0 : index
    %23 = vector.load %arg5[%c0_28, %c0_29] : memref<352x192xf32, #tpu.memory_space<vmem>>, vector<352x192xf32>
    %24 = arith.addf %23, %22 : vector<352x192xf32>
    %c0_30 = arith.constant 0 : index
    %c0_31 = arith.constant 0 : index
    %25 = vector.load %arg5[%c0_30, %c0_31] : memref<352x192xf32, #tpu.memory_space<vmem>>, vector<352x192xf32>
    tpu.vector_store %arg5[%c0_30, %c0_31], %24 {strides = array<i32>} : memref<352x192xf32, #tpu.memory_space<vmem>>, vector<352x192xf32>,
    %c17 = arith.constant 17 : index
    %c0_32 = arith.constant 0 : index
    %26 = vector.load %arg1[%c17, %c0_32] : memref<400x192xbf16, #tpu.memory_space<vmem>>, vector<352x192xbf16>
    %c4 = arith.constant 4 : index
    %c0_33 = arith.constant 0 : index
    %c0_34 = arith.constant 0 : index
    %27 = vector.load %arg2[%c4, %c0_33, %c0_34] : memref<9x192x192xbf16, #tpu.memory_space<vmem>>, vector<1x192x192xbf16>
    %28 = vector.shape_cast %27 : vector<1x192x192xbf16> to vector<192x192xbf16>
    %cst_35 = arith.constant dense<0.000000e+00> : vector<352x192xf32>
    %29 = tpu.matmul %26, %28, %cst_35 {dimension_numbers = #tpu.dot_dimension_numbers<[1], [0], [0], [1], [0, 0, 1, 1], [], []>} : vector<352x192xbf16>, vector<192x192xbf16>, vector<352x192xf32> -> vector<352x192xf32>
    %c0_36 = arith.constant 0 : index
    %c0_37 = arith.constant 0 : index
    %30 = vector.load %arg5[%c0_36, %c0_37] : memref<352x192xf32, #tpu.memory_space<vmem>>, vector<352x192xf32>
    %31 = arith.addf %30, %29 : vector<352x192xf32>
    %c0_38 = arith.constant 0 : index
    %c0_39 = arith.constant 0 : index
    %32 = vector.load %arg5[%c0_38, %c0_39] : memref<352x192xf32, #tpu.memory_space<vmem>>, vector<352x192xf32>
    tpu.vector_store %arg5[%c0_38, %c0_39], %31 {strides = array<i32>} : memref<352x192xf32, #tpu.memory_space<vmem>>, vector<352x192xf32>,
    %c18 = arith.constant 18 : index
    %c0_40 = arith.constant 0 : index
    %33 = vector.load %arg1[%c18, %c0_40] : memref<400x192xbf16, #tpu.memory_space<vmem>>, vector<352x192xbf16>
    %c5 = arith.constant 5 : index
    %c0_41 = arith.constant 0 : index
    %c0_42 = arith.constant 0 : index
    %34 = vector.load %arg2[%c5, %c0_41, %c0_42] : memref<9x192x192xbf16, #tpu.memory_space<vmem>>, vector<1x192x192xbf16>
    %35 = vector.shape_cast %34 : vector<1x192x192xbf16> to vector<192x192xbf16>
    %cst_43 = arith.constant dense<0.000000e+00> : vector<352x192xf32>
    %36 = tpu.matmul %33, %35, %cst_43 {dimension_numbers = #tpu.dot_dimension_numbers<[1], [0], [0], [1], [0, 0, 1, 1], [], []>} : vector<352x192xbf16>, vector<192x192xbf16>, vector<352x192xf32> -> vector<352x192xf32>
    %c0_44 = arith.constant 0 : index
    %c0_45 = arith.constant 0 : index
    %37 = vector.load %arg5[%c0_44, %c0_45] : memref<352x192xf32, #tpu.memory_space<vmem>>, vector<352x192xf32>
    %38 = arith.addf %37, %36 : vector<352x192xf32>
    %c0_46 = arith.constant 0 : index
    %c0_47 = arith.constant 0 : index
    %39 = vector.load %arg5[%c0_46, %c0_47] : memref<352x192xf32, #tpu.memory_space<vmem>>, vector<352x192xf32>
    tpu.vector_store %arg5[%c0_46, %c0_47], %38 {strides = array<i32>} : memref<352x192xf32, #tpu.memory_space<vmem>>, vector<352x192xf32>,
    %c32 = arith.constant 32 : index
    %c0_48 = arith.constant 0 : index
    %40 = vector.load %arg1[%c32, %c0_48] : memref<400x192xbf16, #tpu.memory_space<vmem>>, vector<352x192xbf16>
    %c6 = arith.constant 6 : index
    %c0_49 = arith.constant 0 : index
    %c0_50 = arith.constant 0 : index
    %41 = vector.load %arg2[%c6, %c0_49, %c0_50] : memref<9x192x192xbf16, #tpu.memory_space<vmem>>, vector<1x192x192xbf16>
    %42 = vector.shape_cast %41 : vector<1x192x192xbf16> to vector<192x192xbf16>
    %cst_51 = arith.constant dense<0.000000e+00> : vector<352x192xf32>
    %43 = tpu.matmul %40, %42, %cst_51 {dimension_numbers = #tpu.dot_dimension_numbers<[1], [0], [0], [1], [0, 0, 1, 1], [], []>} : vector<352x192xbf16>, vector<192x192xbf16>, vector<352x192xf32> -> vector<352x192xf32>
    %c0_52 = arith.constant 0 : index
    %c0_53 = arith.constant 0 : index
    %44 = vector.load %arg5[%c0_52, %c0_53] : memref<352x192xf32, #tpu.memory_space<vmem>>, vector<352x192xf32>
    %45 = arith.addf %44, %43 : vector<352x192xf32>
    %c0_54 = arith.constant 0 : index
    %c0_55 = arith.constant 0 : index
    %46 = vector.load %arg5[%c0_54, %c0_55] : memref<352x192xf32, #tpu.memory_space<vmem>>, vector<352x192xf32>
    tpu.vector_store %arg5[%c0_54, %c0_55], %45 {strides = array<i32>} : memref<352x192xf32, #tpu.memory_space<vmem>>, vector<352x192xf32>,
    %c33 = arith.constant 33 : index
    %c0_56 = arith.constant 0 : index
    %47 = vector.load %arg1[%c33, %c0_56] : memref<400x192xbf16, #tpu.memory_space<vmem>>, vector<352x192xbf16>
    %c7 = arith.constant 7 : index
    %c0_57 = arith.constant 0 : index
    %c0_58 = arith.constant 0 : index
    %48 = vector.load %arg2[%c7, %c0_57, %c0_58] : memref<9x192x192xbf16, #tpu.memory_space<vmem>>, vector<1x192x192xbf16>
    %49 = vector.shape_cast %48 : vector<1x192x192xbf16> to vector<192x192xbf16>
    %cst_59 = arith.constant dense<0.000000e+00> : vector<352x192xf32>
    %50 = tpu.matmul %47, %49, %cst_59 {dimension_numbers = #tpu.dot_dimension_numbers<[1], [0], [0], [1], [0, 0, 1, 1], [], []>} : vector<352x192xbf16>, vector<192x192xbf16>, vector<352x192xf32> -> vector<352x192xf32>
    %c0_60 = arith.constant 0 : index
    %c0_61 = arith.constant 0 : index
    %51 = vector.load %arg5[%c0_60, %c0_61] : memref<352x192xf32, #tpu.memory_space<vmem>>, vector<352x192xf32>
    %52 = arith.addf %51, %50 : vector<352x192xf32>
    %c0_62 = arith.constant 0 : index
    %c0_63 = arith.constant 0 : index
    %53 = vector.load %arg5[%c0_62, %c0_63] : memref<352x192xf32, #tpu.memory_space<vmem>>, vector<352x192xf32>
    tpu.vector_store %arg5[%c0_62, %c0_63], %52 {strides = array<i32>} : memref<352x192xf32, #tpu.memory_space<vmem>>, vector<352x192xf32>,
    %c34 = arith.constant 34 : index
    %c0_64 = arith.constant 0 : index
    %54 = vector.load %arg1[%c34, %c0_64] : memref<400x192xbf16, #tpu.memory_space<vmem>>, vector<352x192xbf16>
    %c8 = arith.constant 8 : index
    %c0_65 = arith.constant 0 : index
    %c0_66 = arith.constant 0 : index
    %55 = vector.load %arg2[%c8, %c0_65, %c0_66] : memref<9x192x192xbf16, #tpu.memory_space<vmem>>, vector<1x192x192xbf16>
    %56 = vector.shape_cast %55 : vector<1x192x192xbf16> to vector<192x192xbf16>
    %cst_67 = arith.constant dense<0.000000e+00> : vector<352x192xf32>
    %57 = tpu.matmul %54, %56, %cst_67 {dimension_numbers = #tpu.dot_dimension_numbers<[1], [0], [0], [1], [0, 0, 1, 1], [], []>} : vector<352x192xbf16>, vector<192x192xbf16>, vector<352x192xf32> -> vector<352x192xf32>
    %c0_68 = arith.constant 0 : index
    %c0_69 = arith.constant 0 : index
    %58 = vector.load %arg5[%c0_68, %c0_69] : memref<352x192xf32, #tpu.memory_space<vmem>>, vector<352x192xf32>
    %59 = arith.addf %58, %57 : vector<352x192xf32>
    %c0_70 = arith.constant 0 : index
    %c0_71 = arith.constant 0 : index
    %60 = vector.load %arg5[%c0_70, %c0_71] : memref<352x192xf32, #tpu.memory_space<vmem>>, vector<352x192xf32>
    tpu.vector_store %arg5[%c0_70, %c0_71], %59 {strides = array<i32>} : memref<352x192xf32, #tpu.memory_space<vmem>>, vector<352x192xf32>,
    %c0_72 = arith.constant 0 : index
    %c0_73 = arith.constant 0 : index
    %61 = vector.load %arg3[%c0_72, %c0_73] : memref<352x1xf32, #tpu.memory_space<vmem>>, vector<352x1xf32>
    %c0_74 = arith.constant 0 : index
    %c0_75 = arith.constant 0 : index
    %62 = vector.load %arg5[%c0_74, %c0_75] : memref<352x192xf32, #tpu.memory_space<vmem>>, vector<352x192xf32>
    %63 = vector.broadcast %61 : vector<352x1xf32> to vector<352x192xf32>
    %64 = arith.mulf %62, %63 : vector<352x192xf32>
    %cst_76 = arith.constant dense<0.000000e+00> : vector<192xf32>
    %65 = vector.multi_reduction <add>, %64, %cst_76 [0] : vector<352x192xf32> to vector<192xf32>
    %66 = vector.shape_cast %65 : vector<192xf32> to vector<1x192xf32>
    %cst_77 = arith.constant 7.812500e-03 : f32
    %67 = vector.broadcast %cst_77 : f32 to vector<1x192xf32>
    %68 = arith.mulf %66, %67 : vector<1x192xf32>
    %69 = vector.broadcast %68 : vector<1x192xf32> to vector<352x192xf32>
    %70 = arith.subf %62, %69 : vector<352x192xf32>
    %71 = arith.mulf %70, %70 : vector<352x192xf32>
    %72 = vector.broadcast %61 : vector<352x1xf32> to vector<352x192xf32>
    %73 = arith.mulf %71, %72 : vector<352x192xf32>
    %cst_78 = arith.constant dense<0.000000e+00> : vector<192xf32>
    %74 = vector.multi_reduction <add>, %73, %cst_78 [0] : vector<352x192xf32> to vector<192xf32>
    %75 = vector.shape_cast %74 : vector<192xf32> to vector<1x192xf32>
    %cst_79 = arith.constant 7.812500e-03 : f32
    %76 = vector.broadcast %cst_79 : f32 to vector<1x192xf32>
    %77 = arith.mulf %75, %76 : vector<1x192xf32>
    %cst_80 = arith.constant 9.99999974E-6 : f32
    %78 = vector.broadcast %cst_80 : f32 to vector<1x192xf32>
    %79 = arith.addf %77, %78 : vector<1x192xf32>
    %80 = math.rsqrt %79 : vector<1x192xf32>
    %81 = vector.broadcast %80 : vector<1x192xf32> to vector<352x192xf32>
    %82 = arith.mulf %70, %81 : vector<352x192xf32>
    %cst_81 = arith.constant 0.000000e+00 : f32
    %83 = vector.broadcast %cst_81 : f32 to vector<352x192xf32>
    %84 = arith.maximumf %82, %83 : vector<352x192xf32>
    %85 = arith.truncf %84 : vector<352x192xf32> to vector<352x192xbf16>
    %c0_82 = arith.constant 0 : index
    %c0_83 = arith.constant 0 : index
    %86 = vector.load %arg4[%c0_82, %c0_83] : memref<352x192xbf16, #tpu.memory_space<vmem>>, vector<352x192xbf16>
    tpu.vector_store %arg4[%c0_82, %c0_83], %85 {strides = array<i32>} : memref<352x192xbf16, #tpu.memory_space<vmem>>, vector<352x192xbf16>,
    return
  }
  func.func @transform_0(%arg0: i32) -> (i32, i32) {
    %c0_i32 = arith.constant 0 : i32
    %c0_i32_0 = arith.constant 0 : i32
    %c0_i32_1 = arith.constant 0 : i32
    return %c0_i32, %c0_i32_0 : i32, i32
  }
  func.func @transform_1(%arg0: i32) -> (i32, i32, i32) {
    %c0_i32 = arith.constant 0 : i32
    %c0_i32_0 = arith.constant 0 : i32
    %c0_i32_1 = arith.constant 0 : i32
    return %c0_i32, %c0_i32_0, %arg0 : i32, i32, i32
  }
  func.func @transform_2(%arg0: i32) -> (i32, i32) {
    %c0_i32 = arith.constant 0 : i32
    %c0_i32_0 = arith.constant 0 : i32
    %c0_i32_1 = arith.constant 0 : i32
    return %c0_i32, %c0_i32_0 : i32, i32
  }
  func.func @transform_3(%arg0: i32) -> (i32, i32) {
    %c0_i32 = arith.constant 0 : i32
    %c0_i32_0 = arith.constant 0 : i32
    return %c0_i32, %arg0 : i32, i32
  }
}

module attributes {stable_mosaic.version = 11 : i64} {
  func.func @_conv3x3s1_bn_kernel(%arg0: i32, %arg1: memref<984x256xbf16, #tpu.memory_space<vmem>>, %arg2: memref<9x256x128xbf16, #tpu.memory_space<vmem>>, %arg3: memref<912x1xf32, #tpu.memory_space<vmem>>, %arg4: memref<912x128xbf16, #tpu.memory_space<vmem>>, %arg5: memref<912x128xf32, #tpu.memory_space<vmem>>) attributes {dimension_semantics = [#tpu.dimension_semantics<parallel>], iteration_bounds = array<i64: 1>, scalar_prefetch = 0 : i64, scratch_operands = 1 : i64, tpu.core_type = #tpu.core_type<tc>, window_params = [{pipeline_mode = #tpu.pipeline_mode<synchronous>, transform_indices = @transform_0, window_bounds = array<i64: 984, 256>}, {transform_indices = @transform_1, window_bounds = array<i64: 9, 256, 128>}, {pipeline_mode = #tpu.pipeline_mode<synchronous>, transform_indices = @transform_2, window_bounds = array<i64: 912, 1>}, {transform_indices = @transform_3, window_bounds = array<i64: 912, 128>}]} {
    %c0 = arith.constant 0 : index
    %c0_0 = arith.constant 0 : index
    %0 = vector.load %arg1[%c0, %c0_0] : memref<984x256xbf16, #tpu.memory_space<vmem>>, vector<912x256xbf16>
    %c0_1 = arith.constant 0 : index
    %c0_2 = arith.constant 0 : index
    %c0_3 = arith.constant 0 : index
    %1 = vector.load %arg2[%c0_1, %c0_2, %c0_3] : memref<9x256x128xbf16, #tpu.memory_space<vmem>>, vector<1x256x128xbf16>
    %2 = vector.shape_cast %1 : vector<1x256x128xbf16> to vector<256x128xbf16>
    %cst = arith.constant dense<0.000000e+00> : vector<912x128xf32>
    %3 = tpu.matmul %0, %2, %cst {dimension_numbers = #tpu.dot_dimension_numbers<[1], [0], [0], [1], [0, 0, 1, 1], [], []>} : vector<912x256xbf16>, vector<256x128xbf16>, vector<912x128xf32> -> vector<912x128xf32>
    %c0_4 = arith.constant 0 : index
    %c0_5 = arith.constant 0 : index
    %4 = vector.load %arg5[%c0_4, %c0_5] : memref<912x128xf32, #tpu.memory_space<vmem>>, vector<912x128xf32>
    tpu.vector_store %arg5[%c0_4, %c0_5], %3 {strides = array<i32>} : memref<912x128xf32, #tpu.memory_space<vmem>>, vector<912x128xf32>,
    %c1 = arith.constant 1 : index
    %c0_6 = arith.constant 0 : index
    %5 = vector.load %arg1[%c1, %c0_6] : memref<984x256xbf16, #tpu.memory_space<vmem>>, vector<912x256xbf16>
    %c1_7 = arith.constant 1 : index
    %c0_8 = arith.constant 0 : index
    %c0_9 = arith.constant 0 : index
    %6 = vector.load %arg2[%c1_7, %c0_8, %c0_9] : memref<9x256x128xbf16, #tpu.memory_space<vmem>>, vector<1x256x128xbf16>
    %7 = vector.shape_cast %6 : vector<1x256x128xbf16> to vector<256x128xbf16>
    %cst_10 = arith.constant dense<0.000000e+00> : vector<912x128xf32>
    %8 = tpu.matmul %5, %7, %cst_10 {dimension_numbers = #tpu.dot_dimension_numbers<[1], [0], [0], [1], [0, 0, 1, 1], [], []>} : vector<912x256xbf16>, vector<256x128xbf16>, vector<912x128xf32> -> vector<912x128xf32>
    %c0_11 = arith.constant 0 : index
    %c0_12 = arith.constant 0 : index
    %9 = vector.load %arg5[%c0_11, %c0_12] : memref<912x128xf32, #tpu.memory_space<vmem>>, vector<912x128xf32>
    %10 = arith.addf %9, %8 : vector<912x128xf32>
    %c0_13 = arith.constant 0 : index
    %c0_14 = arith.constant 0 : index
    %11 = vector.load %arg5[%c0_13, %c0_14] : memref<912x128xf32, #tpu.memory_space<vmem>>, vector<912x128xf32>
    tpu.vector_store %arg5[%c0_13, %c0_14], %10 {strides = array<i32>} : memref<912x128xf32, #tpu.memory_space<vmem>>, vector<912x128xf32>,
    %c2 = arith.constant 2 : index
    %c0_15 = arith.constant 0 : index
    %12 = vector.load %arg1[%c2, %c0_15] : memref<984x256xbf16, #tpu.memory_space<vmem>>, vector<912x256xbf16>
    %c2_16 = arith.constant 2 : index
    %c0_17 = arith.constant 0 : index
    %c0_18 = arith.constant 0 : index
    %13 = vector.load %arg2[%c2_16, %c0_17, %c0_18] : memref<9x256x128xbf16, #tpu.memory_space<vmem>>, vector<1x256x128xbf16>
    %14 = vector.shape_cast %13 : vector<1x256x128xbf16> to vector<256x128xbf16>
    %cst_19 = arith.constant dense<0.000000e+00> : vector<912x128xf32>
    %15 = tpu.matmul %12, %14, %cst_19 {dimension_numbers = #tpu.dot_dimension_numbers<[1], [0], [0], [1], [0, 0, 1, 1], [], []>} : vector<912x256xbf16>, vector<256x128xbf16>, vector<912x128xf32> -> vector<912x128xf32>
    %c0_20 = arith.constant 0 : index
    %c0_21 = arith.constant 0 : index
    %16 = vector.load %arg5[%c0_20, %c0_21] : memref<912x128xf32, #tpu.memory_space<vmem>>, vector<912x128xf32>
    %17 = arith.addf %16, %15 : vector<912x128xf32>
    %c0_22 = arith.constant 0 : index
    %c0_23 = arith.constant 0 : index
    %18 = vector.load %arg5[%c0_22, %c0_23] : memref<912x128xf32, #tpu.memory_space<vmem>>, vector<912x128xf32>
    tpu.vector_store %arg5[%c0_22, %c0_23], %17 {strides = array<i32>} : memref<912x128xf32, #tpu.memory_space<vmem>>, vector<912x128xf32>,
    %c24 = arith.constant 24 : index
    %c0_24 = arith.constant 0 : index
    %19 = vector.load %arg1[%c24, %c0_24] : memref<984x256xbf16, #tpu.memory_space<vmem>>, vector<912x256xbf16>
    %c3 = arith.constant 3 : index
    %c0_25 = arith.constant 0 : index
    %c0_26 = arith.constant 0 : index
    %20 = vector.load %arg2[%c3, %c0_25, %c0_26] : memref<9x256x128xbf16, #tpu.memory_space<vmem>>, vector<1x256x128xbf16>
    %21 = vector.shape_cast %20 : vector<1x256x128xbf16> to vector<256x128xbf16>
    %cst_27 = arith.constant dense<0.000000e+00> : vector<912x128xf32>
    %22 = tpu.matmul %19, %21, %cst_27 {dimension_numbers = #tpu.dot_dimension_numbers<[1], [0], [0], [1], [0, 0, 1, 1], [], []>} : vector<912x256xbf16>, vector<256x128xbf16>, vector<912x128xf32> -> vector<912x128xf32>
    %c0_28 = arith.constant 0 : index
    %c0_29 = arith.constant 0 : index
    %23 = vector.load %arg5[%c0_28, %c0_29] : memref<912x128xf32, #tpu.memory_space<vmem>>, vector<912x128xf32>
    %24 = arith.addf %23, %22 : vector<912x128xf32>
    %c0_30 = arith.constant 0 : index
    %c0_31 = arith.constant 0 : index
    %25 = vector.load %arg5[%c0_30, %c0_31] : memref<912x128xf32, #tpu.memory_space<vmem>>, vector<912x128xf32>
    tpu.vector_store %arg5[%c0_30, %c0_31], %24 {strides = array<i32>} : memref<912x128xf32, #tpu.memory_space<vmem>>, vector<912x128xf32>,
    %c25 = arith.constant 25 : index
    %c0_32 = arith.constant 0 : index
    %26 = vector.load %arg1[%c25, %c0_32] : memref<984x256xbf16, #tpu.memory_space<vmem>>, vector<912x256xbf16>
    %c4 = arith.constant 4 : index
    %c0_33 = arith.constant 0 : index
    %c0_34 = arith.constant 0 : index
    %27 = vector.load %arg2[%c4, %c0_33, %c0_34] : memref<9x256x128xbf16, #tpu.memory_space<vmem>>, vector<1x256x128xbf16>
    %28 = vector.shape_cast %27 : vector<1x256x128xbf16> to vector<256x128xbf16>
    %cst_35 = arith.constant dense<0.000000e+00> : vector<912x128xf32>
    %29 = tpu.matmul %26, %28, %cst_35 {dimension_numbers = #tpu.dot_dimension_numbers<[1], [0], [0], [1], [0, 0, 1, 1], [], []>} : vector<912x256xbf16>, vector<256x128xbf16>, vector<912x128xf32> -> vector<912x128xf32>
    %c0_36 = arith.constant 0 : index
    %c0_37 = arith.constant 0 : index
    %30 = vector.load %arg5[%c0_36, %c0_37] : memref<912x128xf32, #tpu.memory_space<vmem>>, vector<912x128xf32>
    %31 = arith.addf %30, %29 : vector<912x128xf32>
    %c0_38 = arith.constant 0 : index
    %c0_39 = arith.constant 0 : index
    %32 = vector.load %arg5[%c0_38, %c0_39] : memref<912x128xf32, #tpu.memory_space<vmem>>, vector<912x128xf32>
    tpu.vector_store %arg5[%c0_38, %c0_39], %31 {strides = array<i32>} : memref<912x128xf32, #tpu.memory_space<vmem>>, vector<912x128xf32>,
    %c26 = arith.constant 26 : index
    %c0_40 = arith.constant 0 : index
    %33 = vector.load %arg1[%c26, %c0_40] : memref<984x256xbf16, #tpu.memory_space<vmem>>, vector<912x256xbf16>
    %c5 = arith.constant 5 : index
    %c0_41 = arith.constant 0 : index
    %c0_42 = arith.constant 0 : index
    %34 = vector.load %arg2[%c5, %c0_41, %c0_42] : memref<9x256x128xbf16, #tpu.memory_space<vmem>>, vector<1x256x128xbf16>
    %35 = vector.shape_cast %34 : vector<1x256x128xbf16> to vector<256x128xbf16>
    %cst_43 = arith.constant dense<0.000000e+00> : vector<912x128xf32>
    %36 = tpu.matmul %33, %35, %cst_43 {dimension_numbers = #tpu.dot_dimension_numbers<[1], [0], [0], [1], [0, 0, 1, 1], [], []>} : vector<912x256xbf16>, vector<256x128xbf16>, vector<912x128xf32> -> vector<912x128xf32>
    %c0_44 = arith.constant 0 : index
    %c0_45 = arith.constant 0 : index
    %37 = vector.load %arg5[%c0_44, %c0_45] : memref<912x128xf32, #tpu.memory_space<vmem>>, vector<912x128xf32>
    %38 = arith.addf %37, %36 : vector<912x128xf32>
    %c0_46 = arith.constant 0 : index
    %c0_47 = arith.constant 0 : index
    %39 = vector.load %arg5[%c0_46, %c0_47] : memref<912x128xf32, #tpu.memory_space<vmem>>, vector<912x128xf32>
    tpu.vector_store %arg5[%c0_46, %c0_47], %38 {strides = array<i32>} : memref<912x128xf32, #tpu.memory_space<vmem>>, vector<912x128xf32>,
    %c48 = arith.constant 48 : index
    %c0_48 = arith.constant 0 : index
    %40 = vector.load %arg1[%c48, %c0_48] : memref<984x256xbf16, #tpu.memory_space<vmem>>, vector<912x256xbf16>
    %c6 = arith.constant 6 : index
    %c0_49 = arith.constant 0 : index
    %c0_50 = arith.constant 0 : index
    %41 = vector.load %arg2[%c6, %c0_49, %c0_50] : memref<9x256x128xbf16, #tpu.memory_space<vmem>>, vector<1x256x128xbf16>
    %42 = vector.shape_cast %41 : vector<1x256x128xbf16> to vector<256x128xbf16>
    %cst_51 = arith.constant dense<0.000000e+00> : vector<912x128xf32>
    %43 = tpu.matmul %40, %42, %cst_51 {dimension_numbers = #tpu.dot_dimension_numbers<[1], [0], [0], [1], [0, 0, 1, 1], [], []>} : vector<912x256xbf16>, vector<256x128xbf16>, vector<912x128xf32> -> vector<912x128xf32>
    %c0_52 = arith.constant 0 : index
    %c0_53 = arith.constant 0 : index
    %44 = vector.load %arg5[%c0_52, %c0_53] : memref<912x128xf32, #tpu.memory_space<vmem>>, vector<912x128xf32>
    %45 = arith.addf %44, %43 : vector<912x128xf32>
    %c0_54 = arith.constant 0 : index
    %c0_55 = arith.constant 0 : index
    %46 = vector.load %arg5[%c0_54, %c0_55] : memref<912x128xf32, #tpu.memory_space<vmem>>, vector<912x128xf32>
    tpu.vector_store %arg5[%c0_54, %c0_55], %45 {strides = array<i32>} : memref<912x128xf32, #tpu.memory_space<vmem>>, vector<912x128xf32>,
    %c49 = arith.constant 49 : index
    %c0_56 = arith.constant 0 : index
    %47 = vector.load %arg1[%c49, %c0_56] : memref<984x256xbf16, #tpu.memory_space<vmem>>, vector<912x256xbf16>
    %c7 = arith.constant 7 : index
    %c0_57 = arith.constant 0 : index
    %c0_58 = arith.constant 0 : index
    %48 = vector.load %arg2[%c7, %c0_57, %c0_58] : memref<9x256x128xbf16, #tpu.memory_space<vmem>>, vector<1x256x128xbf16>
    %49 = vector.shape_cast %48 : vector<1x256x128xbf16> to vector<256x128xbf16>
    %cst_59 = arith.constant dense<0.000000e+00> : vector<912x128xf32>
    %50 = tpu.matmul %47, %49, %cst_59 {dimension_numbers = #tpu.dot_dimension_numbers<[1], [0], [0], [1], [0, 0, 1, 1], [], []>} : vector<912x256xbf16>, vector<256x128xbf16>, vector<912x128xf32> -> vector<912x128xf32>
    %c0_60 = arith.constant 0 : index
    %c0_61 = arith.constant 0 : index
    %51 = vector.load %arg5[%c0_60, %c0_61] : memref<912x128xf32, #tpu.memory_space<vmem>>, vector<912x128xf32>
    %52 = arith.addf %51, %50 : vector<912x128xf32>
    %c0_62 = arith.constant 0 : index
    %c0_63 = arith.constant 0 : index
    %53 = vector.load %arg5[%c0_62, %c0_63] : memref<912x128xf32, #tpu.memory_space<vmem>>, vector<912x128xf32>
    tpu.vector_store %arg5[%c0_62, %c0_63], %52 {strides = array<i32>} : memref<912x128xf32, #tpu.memory_space<vmem>>, vector<912x128xf32>,
    %c50 = arith.constant 50 : index
    %c0_64 = arith.constant 0 : index
    %54 = vector.load %arg1[%c50, %c0_64] : memref<984x256xbf16, #tpu.memory_space<vmem>>, vector<912x256xbf16>
    %c8 = arith.constant 8 : index
    %c0_65 = arith.constant 0 : index
    %c0_66 = arith.constant 0 : index
    %55 = vector.load %arg2[%c8, %c0_65, %c0_66] : memref<9x256x128xbf16, #tpu.memory_space<vmem>>, vector<1x256x128xbf16>
    %56 = vector.shape_cast %55 : vector<1x256x128xbf16> to vector<256x128xbf16>
    %cst_67 = arith.constant dense<0.000000e+00> : vector<912x128xf32>
    %57 = tpu.matmul %54, %56, %cst_67 {dimension_numbers = #tpu.dot_dimension_numbers<[1], [0], [0], [1], [0, 0, 1, 1], [], []>} : vector<912x256xbf16>, vector<256x128xbf16>, vector<912x128xf32> -> vector<912x128xf32>
    %c0_68 = arith.constant 0 : index
    %c0_69 = arith.constant 0 : index
    %58 = vector.load %arg5[%c0_68, %c0_69] : memref<912x128xf32, #tpu.memory_space<vmem>>, vector<912x128xf32>
    %59 = arith.addf %58, %57 : vector<912x128xf32>
    %c0_70 = arith.constant 0 : index
    %c0_71 = arith.constant 0 : index
    %60 = vector.load %arg5[%c0_70, %c0_71] : memref<912x128xf32, #tpu.memory_space<vmem>>, vector<912x128xf32>
    tpu.vector_store %arg5[%c0_70, %c0_71], %59 {strides = array<i32>} : memref<912x128xf32, #tpu.memory_space<vmem>>, vector<912x128xf32>,
    %c0_72 = arith.constant 0 : index
    %c0_73 = arith.constant 0 : index
    %61 = vector.load %arg3[%c0_72, %c0_73] : memref<912x1xf32, #tpu.memory_space<vmem>>, vector<912x1xf32>
    %c0_74 = arith.constant 0 : index
    %c0_75 = arith.constant 0 : index
    %62 = vector.load %arg5[%c0_74, %c0_75] : memref<912x128xf32, #tpu.memory_space<vmem>>, vector<912x128xf32>
    %63 = vector.broadcast %61 : vector<912x1xf32> to vector<912x128xf32>
    %64 = arith.mulf %62, %63 : vector<912x128xf32>
    %cst_76 = arith.constant dense<0.000000e+00> : vector<128xf32>
    %65 = vector.multi_reduction <add>, %64, %cst_76 [0] : vector<912x128xf32> to vector<128xf32>
    %66 = vector.shape_cast %65 : vector<128xf32> to vector<1x128xf32>
    %cst_77 = arith.constant 0.001953125 : f32
    %67 = vector.broadcast %cst_77 : f32 to vector<1x128xf32>
    %68 = arith.mulf %66, %67 : vector<1x128xf32>
    %69 = vector.broadcast %68 : vector<1x128xf32> to vector<912x128xf32>
    %70 = arith.subf %62, %69 : vector<912x128xf32>
    %71 = arith.mulf %70, %70 : vector<912x128xf32>
    %72 = vector.broadcast %61 : vector<912x1xf32> to vector<912x128xf32>
    %73 = arith.mulf %71, %72 : vector<912x128xf32>
    %cst_78 = arith.constant dense<0.000000e+00> : vector<128xf32>
    %74 = vector.multi_reduction <add>, %73, %cst_78 [0] : vector<912x128xf32> to vector<128xf32>
    %75 = vector.shape_cast %74 : vector<128xf32> to vector<1x128xf32>
    %cst_79 = arith.constant 0.001953125 : f32
    %76 = vector.broadcast %cst_79 : f32 to vector<1x128xf32>
    %77 = arith.mulf %75, %76 : vector<1x128xf32>
    %cst_80 = arith.constant 9.99999974E-6 : f32
    %78 = vector.broadcast %cst_80 : f32 to vector<1x128xf32>
    %79 = arith.addf %77, %78 : vector<1x128xf32>
    %80 = math.rsqrt %79 : vector<1x128xf32>
    %81 = vector.broadcast %80 : vector<1x128xf32> to vector<912x128xf32>
    %82 = arith.mulf %70, %81 : vector<912x128xf32>
    %cst_81 = arith.constant 0.000000e+00 : f32
    %83 = vector.broadcast %cst_81 : f32 to vector<912x128xf32>
    %84 = arith.maximumf %82, %83 : vector<912x128xf32>
    %85 = arith.truncf %84 : vector<912x128xf32> to vector<912x128xbf16>
    %c0_82 = arith.constant 0 : index
    %c0_83 = arith.constant 0 : index
    %86 = vector.load %arg4[%c0_82, %c0_83] : memref<912x128xbf16, #tpu.memory_space<vmem>>, vector<912x128xbf16>
    tpu.vector_store %arg4[%c0_82, %c0_83], %85 {strides = array<i32>} : memref<912x128xbf16, #tpu.memory_space<vmem>>, vector<912x128xbf16>,
    return
  }
  func.func @transform_0(%arg0: i32) -> (i32, i32) {
    %c0_i32 = arith.constant 0 : i32
    %c0_i32_0 = arith.constant 0 : i32
    %c0_i32_1 = arith.constant 0 : i32
    return %c0_i32, %c0_i32_0 : i32, i32
  }
  func.func @transform_1(%arg0: i32) -> (i32, i32, i32) {
    %c0_i32 = arith.constant 0 : i32
    %c0_i32_0 = arith.constant 0 : i32
    %c0_i32_1 = arith.constant 0 : i32
    return %c0_i32, %c0_i32_0, %arg0 : i32, i32, i32
  }
  func.func @transform_2(%arg0: i32) -> (i32, i32) {
    %c0_i32 = arith.constant 0 : i32
    %c0_i32_0 = arith.constant 0 : i32
    %c0_i32_1 = arith.constant 0 : i32
    return %c0_i32, %c0_i32_0 : i32, i32
  }
  func.func @transform_3(%arg0: i32) -> (i32, i32) {
    %c0_i32 = arith.constant 0 : i32
    %c0_i32_0 = arith.constant 0 : i32
    return %c0_i32, %arg0 : i32, i32
  }
}

module attributes {stable_mosaic.version = 11 : i64} {
  func.func @_gemm_bn_kernel(%arg0: i32, %arg1: memref<2048x128xbf16, #tpu.memory_space<vmem>>, %arg2: memref<128x128xbf16, #tpu.memory_space<vmem>>, %arg3: memref<1x128xf32, #tpu.memory_space<vmem>>, %arg4: memref<2048x128xf32, #tpu.memory_space<vmem>>) attributes {dimension_semantics = [#tpu.dimension_semantics<parallel>], iteration_bounds = array<i64: 1>, scalar_prefetch = 0 : i64, scratch_operands = 0 : i64, tpu.core_type = #tpu.core_type<tc>, window_params = [{pipeline_mode = #tpu.pipeline_mode<synchronous>, transform_indices = @transform_0, window_bounds = array<i64: 2048, 128>}, {transform_indices = @transform_1, window_bounds = array<i64: 128, 128>}, {transform_indices = @transform_2, window_bounds = array<i64: 1, 128>}, {transform_indices = @transform_3, window_bounds = array<i64: 2048, 128>}]} {
    %c0 = arith.constant 0 : index
    %c0_0 = arith.constant 0 : index
    %0 = vector.load %arg1[%c0, %c0_0] : memref<2048x128xbf16, #tpu.memory_space<vmem>>, vector<2048x128xbf16>
    %c0_1 = arith.constant 0 : index
    %c0_2 = arith.constant 0 : index
    %1 = vector.load %arg2[%c0_1, %c0_2] : memref<128x128xbf16, #tpu.memory_space<vmem>>, vector<128x128xbf16>
    %cst = arith.constant dense<0.000000e+00> : vector<2048x128xf32>
    %2 = tpu.matmul %0, %1, %cst {dimension_numbers = #tpu.dot_dimension_numbers<[1], [0], [0], [1], [0, 0, 1, 1], [], []>} : vector<2048x128xbf16>, vector<128x128xbf16>, vector<2048x128xf32> -> vector<2048x128xf32>
    %c0_3 = arith.constant 0 : index
    %c0_4 = arith.constant 0 : index
    %3 = vector.load %arg3[%c0_3, %c0_4] : memref<1x128xf32, #tpu.memory_space<vmem>>, vector<1x128xf32>
    %4 = vector.broadcast %3 : vector<1x128xf32> to vector<2048x128xf32>
    %5 = arith.addf %2, %4 : vector<2048x128xf32>
    %c0_5 = arith.constant 0 : index
    %c0_6 = arith.constant 0 : index
    %6 = vector.load %arg4[%c0_5, %c0_6] : memref<2048x128xf32, #tpu.memory_space<vmem>>, vector<2048x128xf32>
    tpu.vector_store %arg4[%c0_5, %c0_6], %5 {strides = array<i32>} : memref<2048x128xf32, #tpu.memory_space<vmem>>, vector<2048x128xf32>,
    return
  }
  func.func @transform_0(%arg0: i32) -> (i32, i32) {
    %c0_i32 = arith.constant 0 : i32
    %c0_i32_0 = arith.constant 0 : i32
    %c0_i32_1 = arith.constant 0 : i32
    return %c0_i32, %c0_i32_0 : i32, i32
  }
  func.func @transform_1(%arg0: i32) -> (i32, i32) {
    %c0_i32 = arith.constant 0 : i32
    %c0_i32_0 = arith.constant 0 : i32
    return %c0_i32, %arg0 : i32, i32
  }
  func.func @transform_2(%arg0: i32) -> (i32, i32) {
    %c0_i32 = arith.constant 0 : i32
    %c0_i32_0 = arith.constant 0 : i32
    return %c0_i32, %arg0 : i32, i32
  }
  func.func @transform_3(%arg0: i32) -> (i32, i32) {
    %c0_i32 = arith.constant 0 : i32
    %c0_i32_0 = arith.constant 0 : i32
    return %c0_i32, %arg0 : i32, i32
  }
}

module attributes {stable_mosaic.version = 11 : i64} {
  func.func @_vq_kernel(%arg0: i32, %arg1: memref<1x1024x128xf32, #tpu.memory_space<vmem>>, %arg2: memref<128x6xbf16, #tpu.memory_space<vmem>>, %arg3: memref<6x128xbf16, #tpu.memory_space<vmem>>, %arg4: memref<1x1024x6xf32, #tpu.memory_space<vmem>>, %arg5: memref<1x1024x128xf32, #tpu.memory_space<vmem>>, %arg6: memref<1x1024x128xf32, #tpu.memory_space<vmem>>, %arg7: memref<1x1x128xf32, #tpu.memory_space<vmem>>) attributes {dimension_semantics = [#tpu.dimension_semantics<parallel>], iteration_bounds = array<i64: 2>, scalar_prefetch = 0 : i64, scratch_operands = 0 : i64, tpu.core_type = #tpu.core_type<tc>, window_params = [{transform_indices = @transform_0, window_bounds = array<i64: 1, 1024, 128>}, {pipeline_mode = #tpu.pipeline_mode<synchronous>, transform_indices = @transform_1, window_bounds = array<i64: 128, 6>}, {pipeline_mode = #tpu.pipeline_mode<synchronous>, transform_indices = @transform_2, window_bounds = array<i64: 6, 128>}, {transform_indices = @transform_3, window_bounds = array<i64: 1, 1024, 6>}, {transform_indices = @transform_4, window_bounds = array<i64: 1, 1024, 128>}, {transform_indices = @transform_5, window_bounds = array<i64: 1, 1024, 128>}, {transform_indices = @transform_6, window_bounds = array<i64: 1, 1, 128>}]} {
    %c0 = arith.constant 0 : index
    %c0_0 = arith.constant 0 : index
    %c0_1 = arith.constant 0 : index
    %0 = vector.load %arg1[%c0, %c0_0, %c0_1] : memref<1x1024x128xf32, #tpu.memory_space<vmem>>, vector<1x1024x128xf32>
    %1 = vector.shape_cast %0 : vector<1x1024x128xf32> to vector<1024x128xf32>
    %c0_2 = arith.constant 0 : index
    %c0_3 = arith.constant 0 : index
    %2 = vector.load %arg2[%c0_2, %c0_3] : memref<128x6xbf16, #tpu.memory_space<vmem>>, vector<128x6xbf16>
    %c0_4 = arith.constant 0 : index
    %c0_5 = arith.constant 0 : index
    %3 = vector.load %arg3[%c0_4, %c0_5] : memref<6x128xbf16, #tpu.memory_space<vmem>>, vector<6x128xbf16>
    %c0_6 = arith.constant 0 : index
    %c0_7 = arith.constant 0 : index
    %c0_8 = arith.constant 0 : index
    %4 = vector.load %arg4[%c0_6, %c0_7, %c0_8] : memref<1x1024x6xf32, #tpu.memory_space<vmem>>, vector<1x1024x6xf32>
    %5 = vector.shape_cast %4 : vector<1x1024x6xf32> to vector<1024x6xf32>
    %6 = arith.truncf %1 : vector<1024x128xf32> to vector<1024x128xbf16>
    %cst = arith.constant dense<0.000000e+00> : vector<1024x6xf32>
    %7 = tpu.matmul %6, %2, %cst {dimension_numbers = #tpu.dot_dimension_numbers<[1], [0], [0], [1], [0, 0, 1, 1], [], []>} : vector<1024x128xbf16>, vector<128x6xbf16>, vector<1024x6xf32> -> vector<1024x6xf32>
    %8 = arith.addf %7, %5 : vector<1024x6xf32>
    %cst_9 = arith.constant 1.250000e+00 : f32
    %9 = vector.broadcast %cst_9 : f32 to vector<1024x6xf32>
    %10 = arith.mulf %8, %9 : vector<1024x6xf32>
    %cst_10 = arith.constant dense<0xFF800000> : vector<1024xf32>
    %11 = vector.multi_reduction <maximumf>, %10, %cst_10 [1] : vector<1024x6xf32> to vector<1024xf32>
    %12 = vector.shape_cast %11 : vector<1024xf32> to vector<1024x1xf32>
    %13 = vector.broadcast %12 : vector<1024x1xf32> to vector<1024x6xf32>
    %14 = arith.subf %10, %13 : vector<1024x6xf32>
    %15 = math.exp %14 : vector<1024x6xf32>
    %cst_11 = arith.constant dense<0.000000e+00> : vector<1024xf32>
    %16 = vector.multi_reduction <add>, %15, %cst_11 [1] : vector<1024x6xf32> to vector<1024xf32>
    %17 = vector.shape_cast %16 : vector<1024xf32> to vector<1024x1xf32>
    %18 = tpu.reciprocal %17 {approx = true} : vector<1024x1xf32> -> vector<1024x1xf32>
    %19 = vector.broadcast %18 : vector<1024x1xf32> to vector<1024x6xf32>
    %20 = arith.mulf %15, %19 : vector<1024x6xf32>
    %cst_12 = arith.constant dense<0xFF800000> : vector<6xf32>
    %21 = vector.multi_reduction <maximumf>, %7, %cst_12 [0] : vector<1024x6xf32> to vector<6xf32>
    %22 = vector.shape_cast %21 : vector<6xf32> to vector<1x6xf32>
    %23 = vector.broadcast %22 : vector<1x6xf32> to vector<1024x6xf32>
    %24 = arith.subf %7, %23 : vector<1024x6xf32>
    %25 = math.exp %24 : vector<1024x6xf32>
    %cst_13 = arith.constant dense<0.000000e+00> : vector<6xf32>
    %26 = vector.multi_reduction <add>, %25, %cst_13 [0] : vector<1024x6xf32> to vector<6xf32>
    %27 = vector.shape_cast %26 : vector<6xf32> to vector<1x6xf32>
    %28 = vector.broadcast %27 : vector<1x6xf32> to vector<1024x6xf32>
    %29 = arith.divf %25, %28 : vector<1024x6xf32>
    %cst_14 = arith.constant 6.000000e+00 : f32
    %30 = vector.broadcast %cst_14 : f32 to vector<1024x6xf32>
    %31 = arith.mulf %29, %30 : vector<1024x6xf32>
    %cst_15 = arith.constant 1.000000e-10 : f32
    %32 = vector.broadcast %cst_15 : f32 to vector<1024x6xf32>
    %33 = arith.addf %31, %32 : vector<1024x6xf32>
    %34 = math.log %33 : vector<1024x6xf32>
    %35 = arith.mulf %29, %34 : vector<1024x6xf32>
    %36 = vector.shape_cast %35 : vector<1024x6xf32> to vector<1x1024x6xf32>
    %cst_16 = arith.constant dense<0.000000e+00> : vector<1xf32>
    %37 = vector.multi_reduction <add>, %36, %cst_16 [1, 2] : vector<1x1024x6xf32> to vector<1xf32>
    %38 = vector.shape_cast %37 : vector<1xf32> to vector<1x1x1xf32>
    %39 = vector.extract %38[0, 0, 0] : f32 from vector<1x1x1xf32>
    %40 = vector.broadcast %39 : f32 to vector<1x1xf32>
    %41 = vector.shape_cast %40 : vector<1x1xf32> to vector<1x1xf32>
    %42 = vector.broadcast %41 : vector<1x1xf32> to vector<1x128xf32>
    %c0_17 = arith.constant 0 : index
    %c0_18 = arith.constant 0 : index
    %c0_19 = arith.constant 0 : index
    %43 = vector.load %arg7[%c0_17, %c0_18, %c0_19] : memref<1x1x128xf32, #tpu.memory_space<vmem>>, vector<1x1x128xf32>
    %44 = vector.shape_cast %43 : vector<1x1x128xf32> to vector<1x128xf32>
    %45 = vector.shape_cast %42 : vector<1x128xf32> to vector<1x1x128xf32>
    tpu.vector_store %arg7[%c0_17, %c0_18, %c0_19], %45 {strides = array<i32>} : memref<1x1x128xf32, #tpu.memory_space<vmem>>, vector<1x1x128xf32>,
    %46 = arith.truncf %20 : vector<1024x6xf32> to vector<1024x6xbf16>
    %cst_20 = arith.constant dense<0.000000e+00> : vector<1024x128xf32>
    %47 = tpu.matmul %46, %3, %cst_20 {dimension_numbers = #tpu.dot_dimension_numbers<[1], [0], [0], [1], [0, 0, 1, 1], [], []>} : vector<1024x6xbf16>, vector<6x128xbf16>, vector<1024x128xf32> -> vector<1024x128xf32>
    %48 = arith.mulf %1, %1 : vector<1024x128xf32>
    %cst_21 = arith.constant dense<0.000000e+00> : vector<1024xf32>
    %49 = vector.multi_reduction <add>, %48, %cst_21 [1] : vector<1024x128xf32> to vector<1024xf32>
    %50 = vector.shape_cast %49 : vector<1024xf32> to vector<1024x1xf32>
    %cst_22 = arith.constant 1.000000e-24 : f32
    %51 = vector.broadcast %cst_22 : f32 to vector<1024x1xf32>
    %52 = arith.addf %50, %51 : vector<1024x1xf32>
    %53 = math.rsqrt %52 : vector<1024x1xf32>
    %54 = vector.broadcast %53 : vector<1024x1xf32> to vector<1024x128xf32>
    %55 = arith.mulf %1, %54 : vector<1024x128xf32>
    %c0_23 = arith.constant 0 : index
    %c0_24 = arith.constant 0 : index
    %c0_25 = arith.constant 0 : index
    %56 = vector.load %arg5[%c0_23, %c0_24, %c0_25] : memref<1x1024x128xf32, #tpu.memory_space<vmem>>, vector<1x1024x128xf32>
    %57 = vector.shape_cast %56 : vector<1x1024x128xf32> to vector<1024x128xf32>
    %58 = vector.shape_cast %55 : vector<1024x128xf32> to vector<1x1024x128xf32>
    tpu.vector_store %arg5[%c0_23, %c0_24, %c0_25], %58 {strides = array<i32>} : memref<1x1024x128xf32, #tpu.memory_space<vmem>>, vector<1x1024x128xf32>,
    %59 = arith.mulf %47, %47 : vector<1024x128xf32>
    %cst_26 = arith.constant dense<0.000000e+00> : vector<1024xf32>
    %60 = vector.multi_reduction <add>, %59, %cst_26 [1] : vector<1024x128xf32> to vector<1024xf32>
    %61 = vector.shape_cast %60 : vector<1024xf32> to vector<1024x1xf32>
    %cst_27 = arith.constant 1.000000e-24 : f32
    %62 = vector.broadcast %cst_27 : f32 to vector<1024x1xf32>
    %63 = arith.addf %61, %62 : vector<1024x1xf32>
    %64 = math.rsqrt %63 : vector<1024x1xf32>
    %65 = vector.broadcast %64 : vector<1024x1xf32> to vector<1024x128xf32>
    %66 = arith.mulf %47, %65 : vector<1024x128xf32>
    %c0_28 = arith.constant 0 : index
    %c0_29 = arith.constant 0 : index
    %c0_30 = arith.constant 0 : index
    %67 = vector.load %arg6[%c0_28, %c0_29, %c0_30] : memref<1x1024x128xf32, #tpu.memory_space<vmem>>, vector<1x1024x128xf32>
    %68 = vector.shape_cast %67 : vector<1x1024x128xf32> to vector<1024x128xf32>
    %69 = vector.shape_cast %66 : vector<1024x128xf32> to vector<1x1024x128xf32>
    tpu.vector_store %arg6[%c0_28, %c0_29, %c0_30], %69 {strides = array<i32>} : memref<1x1024x128xf32, #tpu.memory_space<vmem>>, vector<1x1024x128xf32>,
    return
  }
  func.func @transform_0(%arg0: i32) -> (i32, i32, i32) {
    %c0_i32 = arith.constant 0 : i32
    %c0_i32_0 = arith.constant 0 : i32
    %c0_i32_1 = arith.constant 0 : i32
    return %arg0, %c0_i32, %c0_i32_0 : i32, i32, i32
  }
  func.func @transform_1(%arg0: i32) -> (i32, i32) {
    %c0_i32 = arith.constant 0 : i32
    %c0_i32_0 = arith.constant 0 : i32
    %c0_i32_1 = arith.constant 0 : i32
    return %c0_i32, %c0_i32_0 : i32, i32
  }
  func.func @transform_2(%arg0: i32) -> (i32, i32) {
    %c0_i32 = arith.constant 0 : i32
    %c0_i32_0 = arith.constant 0 : i32
    %c0_i32_1 = arith.constant 0 : i32
    return %c0_i32, %c0_i32_0 : i32, i32
  }
  func.func @transform_3(%arg0: i32) -> (i32, i32, i32) {
    %c0_i32 = arith.constant 0 : i32
    %c0_i32_0 = arith.constant 0 : i32
    %c0_i32_1 = arith.constant 0 : i32
    return %arg0, %c0_i32, %c0_i32_0 : i32, i32, i32
  }
  func.func @transform_4(%arg0: i32) -> (i32, i32, i32) {
    %c0_i32 = arith.constant 0 : i32
    %c0_i32_0 = arith.constant 0 : i32
    %c0_i32_1 = arith.constant 0 : i32
    return %arg0, %c0_i32, %c0_i32_0 : i32, i32, i32
  }
  func.func @transform_5(%arg0: i32) -> (i32, i32, i32) {
    %c0_i32 = arith.constant 0 : i32
    %c0_i32_0 = arith.constant 0 : i32
    %c0_i32_1 = arith.constant 0 : i32
    return %arg0, %c0_i32, %c0_i32_0 : i32, i32, i32
  }
  func.func @transform_6(%arg0: i32) -> (i32, i32, i32) {
    %c0_i32 = arith.constant 0 : i32
    %c0_i32_0 = arith.constant 0 : i32
    %c0_i32_1 = arith.constant 0 : i32
    return %arg0, %c0_i32, %c0_i32_0 : i32, i32, i32
  }
}

module attributes {stable_mosaic.version = 11 : i64} {
  func.func @_gemm_bn_kernel(%arg0: i32, %arg1: memref<2x256xbf16, #tpu.memory_space<vmem>>, %arg2: memref<256x128xbf16, #tpu.memory_space<vmem>>, %arg3: memref<1x128xf32, #tpu.memory_space<vmem>>, %arg4: memref<2x128xf32, #tpu.memory_space<vmem>>) attributes {dimension_semantics = [#tpu.dimension_semantics<parallel>], iteration_bounds = array<i64: 6>, scalar_prefetch = 0 : i64, scratch_operands = 0 : i64, tpu.core_type = #tpu.core_type<tc>, window_params = [{pipeline_mode = #tpu.pipeline_mode<synchronous>, transform_indices = @transform_0, window_bounds = array<i64: 2, 256>}, {transform_indices = @transform_1, window_bounds = array<i64: 256, 128>}, {transform_indices = @transform_2, window_bounds = array<i64: 1, 128>}, {transform_indices = @transform_3, window_bounds = array<i64: 2, 128>}]} {
    %c0 = arith.constant 0 : index
    %c0_0 = arith.constant 0 : index
    %0 = vector.load %arg1[%c0, %c0_0] : memref<2x256xbf16, #tpu.memory_space<vmem>>, vector<2x256xbf16>
    %c0_1 = arith.constant 0 : index
    %c0_2 = arith.constant 0 : index
    %1 = vector.load %arg2[%c0_1, %c0_2] : memref<256x128xbf16, #tpu.memory_space<vmem>>, vector<256x128xbf16>
    %cst = arith.constant dense<0.000000e+00> : vector<2x128xf32>
    %2 = tpu.matmul %0, %1, %cst {dimension_numbers = #tpu.dot_dimension_numbers<[1], [0], [0], [1], [0, 0, 1, 1], [], []>} : vector<2x256xbf16>, vector<256x128xbf16>, vector<2x128xf32> -> vector<2x128xf32>
    %c0_3 = arith.constant 0 : index
    %c0_4 = arith.constant 0 : index
    %3 = vector.load %arg3[%c0_3, %c0_4] : memref<1x128xf32, #tpu.memory_space<vmem>>, vector<1x128xf32>
    %4 = vector.broadcast %3 : vector<1x128xf32> to vector<2x128xf32>
    %5 = arith.addf %2, %4 : vector<2x128xf32>
    %cst_5 = arith.constant dense<0.000000e+00> : vector<128xf32>
    %6 = vector.multi_reduction <add>, %5, %cst_5 [0] : vector<2x128xf32> to vector<128xf32>
    %7 = vector.shape_cast %6 : vector<128xf32> to vector<1x128xf32>
    %cst_6 = arith.constant 5.000000e-01 : f32
    %8 = vector.broadcast %cst_6 : f32 to vector<1x128xf32>
    %9 = arith.mulf %7, %8 : vector<1x128xf32>
    %10 = vector.broadcast %9 : vector<1x128xf32> to vector<2x128xf32>
    %11 = arith.subf %5, %10 : vector<2x128xf32>
    %12 = arith.mulf %11, %11 : vector<2x128xf32>
    %cst_7 = arith.constant dense<0.000000e+00> : vector<128xf32>
    %13 = vector.multi_reduction <add>, %12, %cst_7 [0] : vector<2x128xf32> to vector<128xf32>
    %14 = vector.shape_cast %13 : vector<128xf32> to vector<1x128xf32>
    %cst_8 = arith.constant 5.000000e-01 : f32
    %15 = vector.broadcast %cst_8 : f32 to vector<1x128xf32>
    %16 = arith.mulf %14, %15 : vector<1x128xf32>
    %cst_9 = arith.constant 9.99999974E-6 : f32
    %17 = vector.broadcast %cst_9 : f32 to vector<1x128xf32>
    %18 = arith.addf %16, %17 : vector<1x128xf32>
    %19 = math.rsqrt %18 : vector<1x128xf32>
    %20 = vector.broadcast %19 : vector<1x128xf32> to vector<2x128xf32>
    %21 = arith.mulf %11, %20 : vector<2x128xf32>
    %cst_10 = arith.constant 0.000000e+00 : f32
    %22 = vector.broadcast %cst_10 : f32 to vector<2x128xf32>
    %23 = arith.maximumf %21, %22 : vector<2x128xf32>
    %c0_11 = arith.constant 0 : index
    %c0_12 = arith.constant 0 : index
    %24 = vector.load %arg4[%c0_11, %c0_12] : memref<2x128xf32, #tpu.memory_space<vmem>>, vector<2x128xf32>
    tpu.vector_store %arg4[%c0_11, %c0_12], %23 {strides = array<i32>} : memref<2x128xf32, #tpu.memory_space<vmem>>, vector<2x128xf32>,
    return
  }
  func.func @transform_0(%arg0: i32) -> (i32, i32) {
    %c0_i32 = arith.constant 0 : i32
    %c0_i32_0 = arith.constant 0 : i32
    %c0_i32_1 = arith.constant 0 : i32
    return %c0_i32, %c0_i32_0 : i32, i32
  }
  func.func @transform_1(%arg0: i32) -> (i32, i32) {
    %c0_i32 = arith.constant 0 : i32
    %c0_i32_0 = arith.constant 0 : i32
    return %c0_i32, %arg0 : i32, i32
  }
  func.func @transform_2(%arg0: i32) -> (i32, i32) {
    %c0_i32 = arith.constant 0 : i32
    %c0_i32_0 = arith.constant 0 : i32
    return %c0_i32, %arg0 : i32, i32
  }
  func.func @transform_3(%arg0: i32) -> (i32, i32) {
    %c0_i32 = arith.constant 0 : i32
    %c0_i32_0 = arith.constant 0 : i32
    return %c0_i32, %arg0 : i32, i32
  }
}

</mosaic_0001>

<bundles_post_ra>
// kernel: custom-call.2
= control target key start
LH: loop header
LB: loop body
LE: loop exit
PB: predicated region body
PF: predicated region fallthrough
CT: control target
= control target key end

     0   :  { %s6_s0 = inlined_call_operand.vmem [shape: f32[768], index: 0, kind: output, shape index: {}]  }

</bundles_post_ra>
